<compile_context>
chip_gen: v7x
topology: tpu7x:2x2x1
jax: 0.10.0
libtpu: 0.0.40
codegen_flags: <defaults>
</compile_context>

<pallas_src>
import functools
import jax
import jax.numpy as jnp
from jax.experimental import pallas as pl
from jax.experimental.pallas import tpu as pltpu


# Small synthetic configuration consistent with the module's forward pass.
CFG = dict(
    batch=2, channels=3, image=32, patch=8,
    hidden=32, heads=4, layers=2, mlp=128,
    classifier_dims=(64, 32), num_classes=5,
)

NC_PAD = 128     # pad the logits lane axis to a full 128-lane slab
LN_EPS = 1e-6
BN_EPS = 1e-5


def _gelu(x):
    # TODO(synk): PyTorch nn.GELU defaults to the exact erf form; the tanh
    # approximation (~1e-3 difference) is kept for guaranteed Mosaic lowering.
    return jax.nn.gelu(x)


def _layernorm(x, g, b, eps=LN_EPS):
    mean = jnp.mean(x, axis=-1, keepdims=True)
    var = jnp.mean((x - mean) ** 2, axis=-1, keepdims=True)
    return (x - mean) * jax.lax.rsqrt(var + eps) * g + b


# ----------------------------------------------------------------------------
# The single fused kernel (one grid step == one image)
# ----------------------------------------------------------------------------

def _build_fused_kernel(cfg):
    D, nh, L = cfg['hidden'], cfg['heads'], cfg['layers']
    hd = D // nh
    P = (cfg['image'] // cfg['patch']) ** 2
    S = P + 1                                  # +1 cls token
    n_hl = len(cfg['classifier_dims'])
    n_in = 19 + 2 * n_hl + 2                   # total input refs
    scale = 1.0 / (hd ** 0.5)
    f32 = jnp.float32

    def kernel(*refs):
        (patches_ref, patch_w_ref, patch_b_ref, cls_ref, pos_ref,
         ln1_g_ref, ln1_b_ref, qkv_w_ref, qkv_b_ref,
         proj_w_ref, proj_b_ref, ln2_g_ref, ln2_b_ref,
         fc1_w_ref, fc1_b_ref, fc2_w_ref, fc2_b_ref,
         lnf_g_ref, lnf_b_ref) = refs[:19]
        head_refs = refs[19:19 + 2 * n_hl]
        out_w_ref, out_b_ref = refs[19 + 2 * n_hl:n_in]
        logits_ref, emb_ref = refs[n_in], refs[n_in + 1]
        x_ref, attn_ref = refs[n_in + 2], refs[n_in + 3]

        # --- patch embedding (Conv2d-as-matmul) + cls token + pos embed -------
        tok = jnp.dot(patches_ref[...], patch_w_ref[...],
                      preferred_element_type=f32) + patch_b_ref[...]     # [P, D]
        x_ref[0:1, :] = cls_ref[...] + pos_ref[0:1, :]
        x_ref[1:S, :] = tok + pos_ref[1:S, :]
        x = x_ref[...]                                   # [S, D] residual stream

        # --- pre-norm transformer blocks, fully unrolled, VMEM-resident -------
        for l in range(L):
            # MHSA
            h = _layernorm(x, ln1_g_ref[l:l + 1, :], ln1_b_ref[l:l + 1, :])
            qkv = jnp.dot(h, qkv_w_ref[l],
                          preferred_element_type=f32) + qkv_b_ref[l:l + 1, :]
            q = qkv[:, 0:D] * scale          # fold 1/sqrt(hd) into q
            k = qkv[:, D:2 * D]
            v = qkv[:, 2 * D:3 * D]
            for hh in range(nh):             # per-head attention, unrolled
                c0, c1 = hh * hd, (hh + 1) * hd
                s = jax.lax.dot_general(     # q @ k^T without materializing k.T
                    q[:, c0:c1], k[:, c0:c1],
                    (((1,), (1,)), ((), ())), preferred_element_type=f32)
                s = s - jnp.max(s, axis=-1, keepdims=True)
                p = jnp.exp(s)
                p = p * pl.reciprocal(jnp.sum(p, axis=-1, keepdims=True),
                                      approx=True)
                attn_ref[:, c0:c1] = jnp.dot(p, v[:, c0:c1],
                                             preferred_element_type=f32)
            x = x + jnp.dot(attn_ref[...], proj_w_ref[l],
                            preferred_element_type=f32) + proj_b_ref[l:l + 1, :]
            # MLP
            h = _layernorm(x, ln2_g_ref[l:l + 1, :], ln2_b_ref[l:l + 1, :])
            h = _gelu(jnp.dot(h, fc1_w_ref[l],
                              preferred_element_type=f32) + fc1_b_ref[l:l + 1, :])
            x = x + jnp.dot(h, fc2_w_ref[l],
                            preferred_element_type=f32) + fc2_b_ref[l:l + 1, :]

        # --- final LN, mean-pool over sequence, classification head -----------
        x = _layernorm(x, lnf_g_ref[...], lnf_b_ref[...])
        pooled = jnp.mean(x, axis=0, keepdims=True)                     # [1, D]
        emb_ref[...] = pooled.reshape(emb_ref.shape).astype(emb_ref.dtype)

        h = pooled
        for i in range(n_hl):                # Linear (BN folded in) -> GELU
            w_r, b_r = head_refs[2 * i], head_refs[2 * i + 1]
            h = _gelu(jnp.dot(h, w_r[...], preferred_element_type=f32) + b_r[...])
        logits = jnp.dot(h, out_w_ref[...],
                         preferred_element_type=f32) + out_b_ref[...]   # [1, 128]
        logits_ref[...] = logits.reshape(logits_ref.shape).astype(logits_ref.dtype)

    return kernel, n_in, P, S


# ----------------------------------------------------------------------------
# Parameters, packing (stack per-layer weights, fold eval-mode BatchNorm)
# ----------------------------------------------------------------------------

def init_params(key, cfg):
    D, C, Pp = cfg['hidden'], cfg['channels'], cfg['patch']
    patch_dim = C * Pp * Pp
    S = (cfg['image'] // Pp) ** 2 + 1
    ks = jax.random.split(key, 64)
    ki = iter(range(64))
    nrm = lambda shape, scl=0.02: (
        scl * jax.random.normal(ks[next(ki)], shape, dtype=jnp.float32))

    params = dict(
        patch_w=nrm((patch_dim, D)),
        patch_b=jnp.zeros((D,), jnp.float32),
        cls_token=nrm((1, 1, D)),
        pos_embed=nrm((1, S, D)),
        blocks=[],
        ln_f_g=jnp.ones((D,), jnp.float32),
        ln_f_b=jnp.zeros((D,), jnp.float32),
    )
    for _ in range(cfg['layers']):
        params['blocks'].append(dict(
            ln1_g=jnp.ones((D,), jnp.float32), ln1_b=jnp.zeros((D,), jnp.float32),
            qkv_w=nrm((D, 3 * D)), qkv_b=jnp.zeros((3 * D,), jnp.float32),
            proj_w=nrm((D, D)), proj_b=jnp.zeros((D,), jnp.float32),
            ln2_g=jnp.ones((D,), jnp.float32), ln2_b=jnp.zeros((D,), jnp.float32),
            fc1_w=nrm((D, cfg['mlp'])), fc1_b=jnp.zeros((cfg['mlp'],), jnp.float32),
            fc2_w=nrm((cfg['mlp'], D)), fc2_b=jnp.zeros((D,), jnp.float32),
        ))

    head = []
    in_dim = D
    for hd_ in cfg['classifier_dims']:
        head.append(dict(
            w=nrm((in_dim, hd_)), b=jnp.zeros((hd_,), jnp.float32),
            bn_mean=jnp.zeros((hd_,), jnp.float32), bn_var=jnp.ones((hd_,), jnp.float32),
            bn_g=jnp.ones((hd_,), jnp.float32), bn_b=jnp.zeros((hd_,), jnp.float32),
        ))
        in_dim = hd_
    params['head'] = head
    params['out_w'] = nrm((in_dim, cfg['num_classes']))
    params['out_b'] = jnp.zeros((cfg['num_classes'],), jnp.float32)
    return params


def pack_params(params, cfg):
    """Stack per-block params, fold eval-mode BN into the head Linears, pad logits."""
    D = cfg['hidden']
    st = lambda name: jnp.stack([blk[name] for blk in params['blocks']], axis=0)
    packed = [
        params['patch_w'],
        params['patch_b'].reshape(1, -1),
        params['cls_token'].reshape(1, D),
        params['pos_embed'].reshape(-1, D),
        st('ln1_g'), st('ln1_b'), st('qkv_w'), st('qkv_b'),
        st('proj_w'), st('proj_b'), st('ln2_g'), st('ln2_b'),
        st('fc1_w'), st('fc1_b'), st('fc2_w'), st('fc2_b'),
        params['ln_f_g'].reshape(1, D), params['ln_f_b'].reshape(1, D),
    ]
    for layer in params['head']:
        # Linear -> BN(eval) -> GELU  ==  Linear(w*s, (b-mean)*s + beta) -> GELU
        s = layer['bn_g'] * jax.lax.rsqrt(layer['bn_var'] + BN_EPS)
        w_eff = layer['w'] * s[None, :]
        b_eff = (layer['b'] - layer['bn_mean']) * s + layer['bn_b']
        packed += [w_eff, b_eff.reshape(1, -1)]
    out_w, out_b = params['out_w'], params['out_b']
    last, C = out_w.shape
    packed.append(jnp.zeros((last, NC_PAD), jnp.float32).at[:, :C].set(out_w))
    packed.append(jnp.zeros((1, NC_PAD), jnp.float32).at[0, :C].set(out_b))
    return packed


def extract_patches_nchw(x, patch):
    """x: [B, C, H, W] NCHW -> [B, num_patches, C*patch*patch] in (C, ph, pw) order."""
    B, C, H, W = x.shape
    gh, gw = H // patch, W // patch
    x = x.reshape(B, C, gh, patch, gw, patch)
    x = x.transpose(0, 2, 4, 1, 3, 5)              # [B, gh, gw, C, ph, pw]
    return x.reshape(B, gh * gw, C * patch * patch)


# ----------------------------------------------------------------------------
# Forward pass (one pallas_call for the whole model)
# ----------------------------------------------------------------------------

def forward(params, pixel_values, cfg):
    """Returns {'logits': [B, num_classes], 'embeddings': [B, hidden]}."""
    B = pixel_values.shape[0]
    D, C = cfg['hidden'], cfg['num_classes']
    pixel_values = pixel_values.astype(jnp.float32)     # matches CPU float32 path

    patches = extract_patches_nchw(pixel_values, cfg['patch'])      # [B, P, Cpp]
    _, P, Cpp = patches.shape
    patches2d = patches.reshape(B * P, Cpp)

    kernel, n_in, P_k, S = _build_fused_kernel(cfg)
    assert P_k == P

    inputs = [patches2d] + pack_params(params, cfg)
    assert len(inputs) == n_in

    def _whole_spec(a):
        nd = a.ndim
        return pl.BlockSpec(a.shape, lambda b, _nd=nd: (0,) * _nd)

    in_specs = ([pl.BlockSpec((P, Cpp), lambda b: (b, 0))]           # patches of image b
                + [_whole_spec(a) for a in inputs[1:]])              # VMEM-resident weights
    out_shape = (jax.ShapeDtypeStruct((B, 1, NC_PAD), jnp.float32),  # padded logits
                 jax.ShapeDtypeStruct((B, 1, D), jnp.float32))       # pooled embeddings
    out_specs = (pl.BlockSpec((1, 1, NC_PAD), lambda b: (b, 0, 0)),
                 pl.BlockSpec((1, 1, D), lambda b: (b, 0, 0)))

    logits_pad, emb = pl.pallas_call(
        kernel,
        out_shape=out_shape,
        grid=(B,),                                     # one grid step per image
        in_specs=in_specs,
        out_specs=out_specs,
        scratch_shapes=[pltpu.VMEM((S, D), jnp.float32),   # residual-stream assembly
                        pltpu.VMEM((S, D), jnp.float32)],  # per-layer attention output
        compiler_params=pltpu.CompilerParams(
            dimension_semantics=("parallel",)),        # lets v7x split batch over 2 TCs
    )(*inputs)

    # TODO(synk): at production InternViT sizes (D=1024+, S~1025) switch matmul
    # inputs to bf16 and tile attention/MLP to fit v7x's 64 MiB VMEM; exact
    # InternViT internals (layer-scale, qk-norm, pretrained weights) are not
    # reproducible without the checkpoint, so a structurally equivalent ViT is used.
    return {'logits': logits_pad[:, 0, :C], 'embeddings': emb[:, 0, :]}


if __name__ == "__main__":
    key = jax.random.PRNGKey(0)
    pkey, xkey = jax.random.split(key)
    params = init_params(pkey, CFG)
    pixel_values = jax.random.normal(
        xkey, (CFG['batch'], CFG['channels'], CFG['image'], CFG['image']),
        dtype=jnp.float32)

    fwd = jax.jit(functools.partial(forward, cfg=CFG))
    out = fwd(params, pixel_values)
    jax.block_until_ready(out)
    assert out['logits'].shape == (CFG['batch'], CFG['num_classes'])
    assert out['embeddings'].shape == (CFG['batch'], CFG['hidden'])
    print("KERNEL_OK")
</pallas_src>

<mosaic_0001>
module attributes {stable_mosaic.version = 11 : i64} {
  func.func @kernel(%arg0: i32, %arg1: memref<16x192xf32, #tpu.memory_space<vmem>>, %arg2: memref<192x32xf32, #tpu.memory_space<vmem>>, %arg3: memref<1x32xf32, #tpu.memory_space<vmem>>, %arg4: memref<1x32xf32, #tpu.memory_space<vmem>>, %arg5: memref<17x32xf32, #tpu.memory_space<vmem>>, %arg6: memref<2x32xf32, #tpu.memory_space<vmem>>, %arg7: memref<2x32xf32, #tpu.memory_space<vmem>>, %arg8: memref<2x32x96xf32, #tpu.memory_space<vmem>>, %arg9: memref<2x96xf32, #tpu.memory_space<vmem>>, %arg10: memref<2x32x32xf32, #tpu.memory_space<vmem>>, %arg11: memref<2x32xf32, #tpu.memory_space<vmem>>, %arg12: memref<2x32xf32, #tpu.memory_space<vmem>>, %arg13: memref<2x32xf32, #tpu.memory_space<vmem>>, %arg14: memref<2x32x128xf32, #tpu.memory_space<vmem>>, %arg15: memref<2x128xf32, #tpu.memory_space<vmem>>, %arg16: memref<2x128x32xf32, #tpu.memory_space<vmem>>, %arg17: memref<2x32xf32, #tpu.memory_space<vmem>>, %arg18: memref<1x32xf32, #tpu.memory_space<vmem>>, %arg19: memref<1x32xf32, #tpu.memory_space<vmem>>, %arg20: memref<32x64xf32, #tpu.memory_space<vmem>>, %arg21: memref<1x64xf32, #tpu.memory_space<vmem>>, %arg22: memref<64x32xf32, #tpu.memory_space<vmem>>, %arg23: memref<1x32xf32, #tpu.memory_space<vmem>>, %arg24: memref<32x128xf32, #tpu.memory_space<vmem>>, %arg25: memref<1x128xf32, #tpu.memory_space<vmem>>, %arg26: memref<1x1x128xf32, #tpu.memory_space<vmem>>, %arg27: memref<1x1x32xf32, #tpu.memory_space<vmem>>, %arg28: memref<17x32xf32, #tpu.memory_space<vmem>>, %arg29: memref<17x32xf32, #tpu.memory_space<vmem>>) attributes {dimension_semantics = [#tpu.dimension_semantics<parallel>], iteration_bounds = array<i64: 2>, scalar_prefetch = 0 : i64, scratch_operands = 2 : i64, tpu.core_type = #tpu.core_type<tc>, window_params = [{transform_indices = @transform_0, window_bounds = array<i64: 16, 192>}, {pipeline_mode = #tpu.pipeline_mode<synchronous>, transform_indices = @transform_1, window_bounds = array<i64: 192, 32>}, {pipeline_mode = #tpu.pipeline_mode<synchronous>, transform_indices = @transform_2, window_bounds = array<i64: 1, 32>}, {pipeline_mode = #tpu.pipeline_mode<synchronous>, transform_indices = @transform_3, window_bounds = array<i64: 1, 32>}, {pipeline_mode = #tpu.pipeline_mode<synchronous>, transform_indices = @transform_4, window_bounds = array<i64: 17, 32>}, {pipeline_mode = #tpu.pipeline_mode<synchronous>, transform_indices = @transform_5, window_bounds = array<i64: 2, 32>}, {pipeline_mode = #tpu.pipeline_mode<synchronous>, transform_indices = @transform_6, window_bounds = array<i64: 2, 32>}, {pipeline_mode = #tpu.pipeline_mode<synchronous>, transform_indices = @transform_7, window_bounds = array<i64: 2, 32, 96>}, {pipeline_mode = #tpu.pipeline_mode<synchronous>, transform_indices = @transform_8, window_bounds = array<i64: 2, 96>}, {pipeline_mode = #tpu.pipeline_mode<synchronous>, transform_indices = @transform_9, window_bounds = array<i64: 2, 32, 32>}, {pipeline_mode = #tpu.pipeline_mode<synchronous>, transform_indices = @transform_10, window_bounds = array<i64: 2, 32>}, {pipeline_mode = #tpu.pipeline_mode<synchronous>, transform_indices = @transform_11, window_bounds = array<i64: 2, 32>}, {pipeline_mode = #tpu.pipeline_mode<synchronous>, transform_indices = @transform_12, window_bounds = array<i64: 2, 32>}, {pipeline_mode = #tpu.pipeline_mode<synchronous>, transform_indices = @transform_13, window_bounds = array<i64: 2, 32, 128>}, {pipeline_mode = #tpu.pipeline_mode<synchronous>, transform_indices = @transform_14, window_bounds = array<i64: 2, 128>}, {pipeline_mode = #tpu.pipeline_mode<synchronous>, transform_indices = @transform_15, window_bounds = array<i64: 2, 128, 32>}, {pipeline_mode = #tpu.pipeline_mode<synchronous>, transform_indices = @transform_16, window_bounds = array<i64: 2, 32>}, {pipeline_mode = #tpu.pipeline_mode<synchronous>, transform_indices = @transform_17, window_bounds = array<i64: 1, 32>}, {pipeline_mode = #tpu.pipeline_mode<synchronous>, transform_indices = @transform_18, window_bounds = array<i64: 1, 32>}, {pipeline_mode = #tpu.pipeline_mode<synchronous>, transform_indices = @transform_19, window_bounds = array<i64: 32, 64>}, {pipeline_mode = #tpu.pipeline_mode<synchronous>, transform_indices = @transform_20, window_bounds = array<i64: 1, 64>}, {pipeline_mode = #tpu.pipeline_mode<synchronous>, transform_indices = @transform_21, window_bounds = array<i64: 64, 32>}, {pipeline_mode = #tpu.pipeline_mode<synchronous>, transform_indices = @transform_22, window_bounds = array<i64: 1, 32>}, {pipeline_mode = #tpu.pipeline_mode<synchronous>, transform_indices = @transform_23, window_bounds = array<i64: 32, 128>}, {pipeline_mode = #tpu.pipeline_mode<synchronous>, transform_indices = @transform_24, window_bounds = array<i64: 1, 128>}, {transform_indices = @transform_25, window_bounds = array<i64: 1, 1, 128>}, {transform_indices = @transform_26, window_bounds = array<i64: 1, 1, 32>}]} {
    %c0 = arith.constant 0 : index
    %c0_0 = arith.constant 0 : index
    %0 = vector.load %arg1[%c0, %c0_0] : memref<16x192xf32, #tpu.memory_space<vmem>>, vector<16x192xf32>
    %c0_1 = arith.constant 0 : index
    %c0_2 = arith.constant 0 : index
    %1 = vector.load %arg2[%c0_1, %c0_2] : memref<192x32xf32, #tpu.memory_space<vmem>>, vector<192x32xf32>
    %cst = arith.constant dense<0.000000e+00> : vector<16x32xf32>
    %2 = tpu.matmul %0, %1, %cst {dimension_numbers = #tpu.dot_dimension_numbers<[1], [0], [0], [1], [0, 0, 1, 1], [], []>} : vector<16x192xf32>, vector<192x32xf32>, vector<16x32xf32> -> vector<16x32xf32>
    %c0_3 = arith.constant 0 : index
    %c0_4 = arith.constant 0 : index
    %3 = vector.load %arg3[%c0_3, %c0_4] : memref<1x32xf32, #tpu.memory_space<vmem>>, vector<1x32xf32>
    %4 = vector.broadcast %3 : vector<1x32xf32> to vector<16x32xf32>
    %5 = arith.addf %2, %4 : vector<16x32xf32>
    %c0_5 = arith.constant 0 : index
    %c0_6 = arith.constant 0 : index
    %6 = vector.load %arg4[%c0_5, %c0_6] : memref<1x32xf32, #tpu.memory_space<vmem>>, vector<1x32xf32>
    %c0_7 = arith.constant 0 : index
    %c0_8 = arith.constant 0 : index
    %7 = vector.load %arg5[%c0_7, %c0_8] : memref<17x32xf32, #tpu.memory_space<vmem>>, vector<1x32xf32>
    %8 = arith.addf %6, %7 : vector<1x32xf32>
    %c0_9 = arith.constant 0 : index
    %c0_10 = arith.constant 0 : index
    %9 = vector.load %arg28[%c0_9, %c0_10] : memref<17x32xf32, #tpu.memory_space<vmem>>, vector<1x32xf32>
    tpu.vector_store %arg28[%c0_9, %c0_10], %8 {strides = array<i32>} : memref<17x32xf32, #tpu.memory_space<vmem>>, vector<1x32xf32>,
    %c1 = arith.constant 1 : index
    %c0_11 = arith.constant 0 : index
    %10 = vector.load %arg5[%c1, %c0_11] : memref<17x32xf32, #tpu.memory_space<vmem>>, vector<16x32xf32>
    %11 = arith.addf %5, %10 : vector<16x32xf32>
    %c1_12 = arith.constant 1 : index
    %c0_13 = arith.constant 0 : index
    %12 = vector.load %arg28[%c1_12, %c0_13] : memref<17x32xf32, #tpu.memory_space<vmem>>, vector<16x32xf32>
    tpu.vector_store %arg28[%c1_12, %c0_13], %11 {strides = array<i32>} : memref<17x32xf32, #tpu.memory_space<vmem>>, vector<16x32xf32>,
    %c0_14 = arith.constant 0 : index
    %c0_15 = arith.constant 0 : index
    %13 = vector.load %arg28[%c0_14, %c0_15] : memref<17x32xf32, #tpu.memory_space<vmem>>, vector<17x32xf32>
    %c0_16 = arith.constant 0 : index
    %c0_17 = arith.constant 0 : index
    %14 = vector.load %arg6[%c0_16, %c0_17] : memref<2x32xf32, #tpu.memory_space<vmem>>, vector<1x32xf32>
    %c0_18 = arith.constant 0 : index
    %c0_19 = arith.constant 0 : index
    %15 = vector.load %arg7[%c0_18, %c0_19] : memref<2x32xf32, #tpu.memory_space<vmem>>, vector<1x32xf32>
    %cst_20 = arith.constant dense<0.000000e+00> : vector<17xf32>
    %16 = vector.multi_reduction <add>, %13, %cst_20 [1] : vector<17x32xf32> to vector<17xf32>
    %17 = vector.shape_cast %16 : vector<17xf32> to vector<17x1xf32>
    %cst_21 = arith.constant 3.200000e+01 : f32
    %18 = vector.broadcast %cst_21 : f32 to vector<17x1xf32>
    %19 = arith.divf %17, %18 : vector<17x1xf32>
    %20 = vector.broadcast %19 : vector<17x1xf32> to vector<17x32xf32>
    %21 = arith.subf %13, %20 : vector<17x32xf32>
    %22 = arith.mulf %21, %21 : vector<17x32xf32>
    %cst_22 = arith.constant dense<0.000000e+00> : vector<17xf32>
    %23 = vector.multi_reduction <add>, %22, %cst_22 [1] : vector<17x32xf32> to vector<17xf32>
    %24 = vector.shape_cast %23 : vector<17xf32> to vector<17x1xf32>
    %cst_23 = arith.constant 3.200000e+01 : f32
    %25 = vector.broadcast %cst_23 : f32 to vector<17x1xf32>
    %26 = arith.divf %24, %25 : vector<17x1xf32>
    %27 = vector.broadcast %19 : vector<17x1xf32> to vector<17x32xf32>
    %28 = arith.subf %13, %27 : vector<17x32xf32>
    %cst_24 = arith.constant 9.99999997E-7 : f32
    %29 = vector.broadcast %cst_24 : f32 to vector<17x1xf32>
    %30 = arith.addf %26, %29 : vector<17x1xf32>
    %31 = math.rsqrt %30 : vector<17x1xf32>
    %32 = vector.broadcast %31 : vector<17x1xf32> to vector<17x32xf32>
    %33 = arith.mulf %28, %32 : vector<17x32xf32>
    %34 = vector.broadcast %14 : vector<1x32xf32> to vector<17x32xf32>
    %35 = arith.mulf %33, %34 : vector<17x32xf32>
    %36 = vector.broadcast %15 : vector<1x32xf32> to vector<17x32xf32>
    %37 = arith.addf %35, %36 : vector<17x32xf32>
    %c0_25 = arith.constant 0 : index
    %c0_26 = arith.constant 0 : index
    %c0_27 = arith.constant 0 : index
    %38 = vector.load %arg8[%c0_25, %c0_26, %c0_27] : memref<2x32x96xf32, #tpu.memory_space<vmem>>, vector<1x32x96xf32>
    %39 = vector.shape_cast %38 : vector<1x32x96xf32> to vector<32x96xf32>
    %cst_28 = arith.constant dense<0.000000e+00> : vector<17x96xf32>
    %40 = tpu.matmul %37, %39, %cst_28 {dimension_numbers = #tpu.dot_dimension_numbers<[1], [0], [0], [1], [0, 0, 1, 1], [], []>} : vector<17x32xf32>, vector<32x96xf32>, vector<17x96xf32> -> vector<17x96xf32>
    %c0_29 = arith.constant 0 : index
    %c0_30 = arith.constant 0 : index
    %41 = vector.load %arg9[%c0_29, %c0_30] : memref<2x96xf32, #tpu.memory_space<vmem>>, vector<1x96xf32>
    %42 = vector.broadcast %41 : vector<1x96xf32> to vector<17x96xf32>
    %43 = arith.addf %40, %42 : vector<17x96xf32>
    %44 = vector.extract_strided_slice %43 {offsets = [0, 0], sizes = [17, 32], strides = [1, 1]} : vector<17x96xf32> to vector<17x32xf32>
    %cst_31 = arith.constant 0.353553385 : f32
    %45 = vector.broadcast %cst_31 : f32 to vector<17x32xf32>
    %46 = arith.mulf %44, %45 : vector<17x32xf32>
    %47 = vector.extract_strided_slice %43 {offsets = [0, 32], sizes = [17, 32], strides = [1, 1]} : vector<17x96xf32> to vector<17x32xf32>
    %48 = vector.extract_strided_slice %43 {offsets = [0, 64], sizes = [17, 32], strides = [1, 1]} : vector<17x96xf32> to vector<17x32xf32>
    %49 = vector.extract_strided_slice %46 {offsets = [0, 0], sizes = [17, 8], strides = [1, 1]} : vector<17x32xf32> to vector<17x8xf32>
    %50 = vector.extract_strided_slice %47 {offsets = [0, 0], sizes = [17, 8], strides = [1, 1]} : vector<17x32xf32> to vector<17x8xf32>
    %cst_32 = arith.constant dense<0.000000e+00> : vector<17x17xf32>
    %51 = tpu.matmul %49, %50, %cst_32 {dimension_numbers = #tpu.dot_dimension_numbers<[1], [1], [0], [0], [0, 0, 1, 0], [], []>} : vector<17x8xf32>, vector<17x8xf32>, vector<17x17xf32> -> vector<17x17xf32>
    %cst_33 = arith.constant dense<0xFF800000> : vector<17xf32>
    %52 = vector.multi_reduction <maximumf>, %51, %cst_33 [1] : vector<17x17xf32> to vector<17xf32>
    %53 = vector.shape_cast %52 : vector<17xf32> to vector<17x1xf32>
    %54 = vector.broadcast %53 : vector<17x1xf32> to vector<17x17xf32>
    %55 = arith.subf %51, %54 : vector<17x17xf32>
    %56 = math.exp %55 : vector<17x17xf32>
    %cst_34 = arith.constant dense<0.000000e+00> : vector<17xf32>
    %57 = vector.multi_reduction <add>, %56, %cst_34 [1] : vector<17x17xf32> to vector<17xf32>
    %58 = vector.shape_cast %57 : vector<17xf32> to vector<17x1xf32>
    %59 = tpu.reciprocal %58 {approx = true} : vector<17x1xf32> -> vector<17x1xf32>
    %60 = vector.broadcast %59 : vector<17x1xf32> to vector<17x17xf32>
    %61 = arith.mulf %56, %60 : vector<17x17xf32>
    %62 = vector.extract_strided_slice %48 {offsets = [0, 0], sizes = [17, 8], strides = [1, 1]} : vector<17x32xf32> to vector<17x8xf32>
    %cst_35 = arith.constant dense<0.000000e+00> : vector<17x8xf32>
    %63 = tpu.matmul %61, %62, %cst_35 {dimension_numbers = #tpu.dot_dimension_numbers<[1], [0], [0], [1], [0, 0, 1, 1], [], []>} : vector<17x17xf32>, vector<17x8xf32>, vector<17x8xf32> -> vector<17x8xf32>
    %c0_36 = arith.constant 0 : index
    %c0_37 = arith.constant 0 : index
    %64 = vector.load %arg29[%c0_36, %c0_37] : memref<17x32xf32, #tpu.memory_space<vmem>>, vector<17x8xf32>
    tpu.vector_store %arg29[%c0_36, %c0_37], %63 {strides = array<i32>} : memref<17x32xf32, #tpu.memory_space<vmem>>, vector<17x8xf32>,
    %65 = vector.extract_strided_slice %46 {offsets = [0, 8], sizes = [17, 8], strides = [1, 1]} : vector<17x32xf32> to vector<17x8xf32>
    %66 = vector.extract_strided_slice %47 {offsets = [0, 8], sizes = [17, 8], strides = [1, 1]} : vector<17x32xf32> to vector<17x8xf32>
    %cst_38 = arith.constant dense<0.000000e+00> : vector<17x17xf32>
    %67 = tpu.matmul %65, %66, %cst_38 {dimension_numbers = #tpu.dot_dimension_numbers<[1], [1], [0], [0], [0, 0, 1, 0], [], []>} : vector<17x8xf32>, vector<17x8xf32>, vector<17x17xf32> -> vector<17x17xf32>
    %cst_39 = arith.constant dense<0xFF800000> : vector<17xf32>
    %68 = vector.multi_reduction <maximumf>, %67, %cst_39 [1] : vector<17x17xf32> to vector<17xf32>
    %69 = vector.shape_cast %68 : vector<17xf32> to vector<17x1xf32>
    %70 = vector.broadcast %69 : vector<17x1xf32> to vector<17x17xf32>
    %71 = arith.subf %67, %70 : vector<17x17xf32>
    %72 = math.exp %71 : vector<17x17xf32>
    %cst_40 = arith.constant dense<0.000000e+00> : vector<17xf32>
    %73 = vector.multi_reduction <add>, %72, %cst_40 [1] : vector<17x17xf32> to vector<17xf32>
    %74 = vector.shape_cast %73 : vector<17xf32> to vector<17x1xf32>
    %75 = tpu.reciprocal %74 {approx = true} : vector<17x1xf32> -> vector<17x1xf32>
    %76 = vector.broadcast %75 : vector<17x1xf32> to vector<17x17xf32>
    %77 = arith.mulf %72, %76 : vector<17x17xf32>
    %78 = vector.extract_strided_slice %48 {offsets = [0, 8], sizes = [17, 8], strides = [1, 1]} : vector<17x32xf32> to vector<17x8xf32>
    %cst_41 = arith.constant dense<0.000000e+00> : vector<17x8xf32>
    %79 = tpu.matmul %77, %78, %cst_41 {dimension_numbers = #tpu.dot_dimension_numbers<[1], [0], [0], [1], [0, 0, 1, 1], [], []>} : vector<17x17xf32>, vector<17x8xf32>, vector<17x8xf32> -> vector<17x8xf32>
    %c0_42 = arith.constant 0 : index
    %c8 = arith.constant 8 : index
    %80 = vector.load %arg29[%c0_42, %c8] : memref<17x32xf32, #tpu.memory_space<vmem>>, vector<17x8xf32>
    tpu.vector_store %arg29[%c0_42, %c8], %79 {strides = array<i32>} : memref<17x32xf32, #tpu.memory_space<vmem>>, vector<17x8xf32>,
    %81 = vector.extract_strided_slice %46 {offsets = [0, 16], sizes = [17, 8], strides = [1, 1]} : vector<17x32xf32> to vector<17x8xf32>
    %82 = vector.extract_strided_slice %47 {offsets = [0, 16], sizes = [17, 8], strides = [1, 1]} : vector<17x32xf32> to vector<17x8xf32>
    %cst_43 = arith.constant dense<0.000000e+00> : vector<17x17xf32>
    %83 = tpu.matmul %81, %82, %cst_43 {dimension_numbers = #tpu.dot_dimension_numbers<[1], [1], [0], [0], [0, 0, 1, 0], [], []>} : vector<17x8xf32>, vector<17x8xf32>, vector<17x17xf32> -> vector<17x17xf32>
    %cst_44 = arith.constant dense<0xFF800000> : vector<17xf32>
    %84 = vector.multi_reduction <maximumf>, %83, %cst_44 [1] : vector<17x17xf32> to vector<17xf32>
    %85 = vector.shape_cast %84 : vector<17xf32> to vector<17x1xf32>
    %86 = vector.broadcast %85 : vector<17x1xf32> to vector<17x17xf32>
    %87 = arith.subf %83, %86 : vector<17x17xf32>
    %88 = math.exp %87 : vector<17x17xf32>
    %cst_45 = arith.constant dense<0.000000e+00> : vector<17xf32>
    %89 = vector.multi_reduction <add>, %88, %cst_45 [1] : vector<17x17xf32> to vector<17xf32>
    %90 = vector.shape_cast %89 : vector<17xf32> to vector<17x1xf32>
    %91 = tpu.reciprocal %90 {approx = true} : vector<17x1xf32> -> vector<17x1xf32>
    %92 = vector.broadcast %91 : vector<17x1xf32> to vector<17x17xf32>
    %93 = arith.mulf %88, %92 : vector<17x17xf32>
    %94 = vector.extract_strided_slice %48 {offsets = [0, 16], sizes = [17, 8], strides = [1, 1]} : vector<17x32xf32> to vector<17x8xf32>
    %cst_46 = arith.constant dense<0.000000e+00> : vector<17x8xf32>
    %95 = tpu.matmul %93, %94, %cst_46 {dimension_numbers = #tpu.dot_dimension_numbers<[1], [0], [0], [1], [0, 0, 1, 1], [], []>} : vector<17x17xf32>, vector<17x8xf32>, vector<17x8xf32> -> vector<17x8xf32>
    %c0_47 = arith.constant 0 : index
    %c16 = arith.constant 16 : index
    %96 = vector.load %arg29[%c0_47, %c16] : memref<17x32xf32, #tpu.memory_space<vmem>>, vector<17x8xf32>
    tpu.vector_store %arg29[%c0_47, %c16], %95 {strides = array<i32>} : memref<17x32xf32, #tpu.memory_space<vmem>>, vector<17x8xf32>,
    %97 = vector.extract_strided_slice %46 {offsets = [0, 24], sizes = [17, 8], strides = [1, 1]} : vector<17x32xf32> to vector<17x8xf32>
    %98 = vector.extract_strided_slice %47 {offsets = [0, 24], sizes = [17, 8], strides = [1, 1]} : vector<17x32xf32> to vector<17x8xf32>
    %cst_48 = arith.constant dense<0.000000e+00> : vector<17x17xf32>
    %99 = tpu.matmul %97, %98, %cst_48 {dimension_numbers = #tpu.dot_dimension_numbers<[1], [1], [0], [0], [0, 0, 1, 0], [], []>} : vector<17x8xf32>, vector<17x8xf32>, vector<17x17xf32> -> vector<17x17xf32>
    %cst_49 = arith.constant dense<0xFF800000> : vector<17xf32>
    %100 = vector.multi_reduction <maximumf>, %99, %cst_49 [1] : vector<17x17xf32> to vector<17xf32>
    %101 = vector.shape_cast %100 : vector<17xf32> to vector<17x1xf32>
    %102 = vector.broadcast %101 : vector<17x1xf32> to vector<17x17xf32>
    %103 = arith.subf %99, %102 : vector<17x17xf32>
    %104 = math.exp %103 : vector<17x17xf32>
    %cst_50 = arith.constant dense<0.000000e+00> : vector<17xf32>
    %105 = vector.multi_reduction <add>, %104, %cst_50 [1] : vector<17x17xf32> to vector<17xf32>
    %106 = vector.shape_cast %105 : vector<17xf32> to vector<17x1xf32>
    %107 = tpu.reciprocal %106 {approx = true} : vector<17x1xf32> -> vector<17x1xf32>
    %108 = vector.broadcast %107 : vector<17x1xf32> to vector<17x17xf32>
    %109 = arith.mulf %104, %108 : vector<17x17xf32>
    %110 = vector.extract_strided_slice %48 {offsets = [0, 24], sizes = [17, 8], strides = [1, 1]} : vector<17x32xf32> to vector<17x8xf32>
    %cst_51 = arith.constant dense<0.000000e+00> : vector<17x8xf32>
    %111 = tpu.matmul %109, %110, %cst_51 {dimension_numbers = #tpu.dot_dimension_numbers<[1], [0], [0], [1], [0, 0, 1, 1], [], []>} : vector<17x17xf32>, vector<17x8xf32>, vector<17x8xf32> -> vector<17x8xf32>
    %c0_52 = arith.constant 0 : index
    %c24 = arith.constant 24 : index
    %112 = vector.load %arg29[%c0_52, %c24] : memref<17x32xf32, #tpu.memory_space<vmem>>, vector<17x8xf32>
    tpu.vector_store %arg29[%c0_52, %c24], %111 {strides = array<i32>} : memref<17x32xf32, #tpu.memory_space<vmem>>, vector<17x8xf32>,
    %c0_53 = arith.constant 0 : index
    %c0_54 = arith.constant 0 : index
    %113 = vector.load %arg29[%c0_53, %c0_54] : memref<17x32xf32, #tpu.memory_space<vmem>>, vector<17x32xf32>
    %c0_55 = arith.constant 0 : index
    %c0_56 = arith.constant 0 : index
    %c0_57 = arith.constant 0 : index
    %114 = vector.load %arg10[%c0_55, %c0_56, %c0_57] : memref<2x32x32xf32, #tpu.memory_space<vmem>>, vector<1x32x32xf32>
    %115 = vector.shape_cast %114 : vector<1x32x32xf32> to vector<32x32xf32>
    %cst_58 = arith.constant dense<0.000000e+00> : vector<17x32xf32>
    %116 = tpu.matmul %113, %115, %cst_58 {dimension_numbers = #tpu.dot_dimension_numbers<[1], [0], [0], [1], [0, 0, 1, 1], [], []>} : vector<17x32xf32>, vector<32x32xf32>, vector<17x32xf32> -> vector<17x32xf32>
    %117 = arith.addf %13, %116 : vector<17x32xf32>
    %c0_59 = arith.constant 0 : index
    %c0_60 = arith.constant 0 : index
    %118 = vector.load %arg11[%c0_59, %c0_60] : memref<2x32xf32, #tpu.memory_space<vmem>>, vector<1x32xf32>
    %119 = vector.broadcast %118 : vector<1x32xf32> to vector<17x32xf32>
    %120 = arith.addf %117, %119 : vector<17x32xf32>
    %c0_61 = arith.constant 0 : index
    %c0_62 = arith.constant 0 : index
    %121 = vector.load %arg12[%c0_61, %c0_62] : memref<2x32xf32, #tpu.memory_space<vmem>>, vector<1x32xf32>
    %c0_63 = arith.constant 0 : index
    %c0_64 = arith.constant 0 : index
    %122 = vector.load %arg13[%c0_63, %c0_64] : memref<2x32xf32, #tpu.memory_space<vmem>>, vector<1x32xf32>
    %cst_65 = arith.constant dense<0.000000e+00> : vector<17xf32>
    %123 = vector.multi_reduction <add>, %120, %cst_65 [1] : vector<17x32xf32> to vector<17xf32>
    %124 = vector.shape_cast %123 : vector<17xf32> to vector<17x1xf32>
    %cst_66 = arith.constant 3.200000e+01 : f32
    %125 = vector.broadcast %cst_66 : f32 to vector<17x1xf32>
    %126 = arith.divf %124, %125 : vector<17x1xf32>
    %127 = vector.broadcast %126 : vector<17x1xf32> to vector<17x32xf32>
    %128 = arith.subf %120, %127 : vector<17x32xf32>
    %129 = arith.mulf %128, %128 : vector<17x32xf32>
    %cst_67 = arith.constant dense<0.000000e+00> : vector<17xf32>
    %130 = vector.multi_reduction <add>, %129, %cst_67 [1] : vector<17x32xf32> to vector<17xf32>
    %131 = vector.shape_cast %130 : vector<17xf32> to vector<17x1xf32>
    %cst_68 = arith.constant 3.200000e+01 : f32
    %132 = vector.broadcast %cst_68 : f32 to vector<17x1xf32>
    %133 = arith.divf %131, %132 : vector<17x1xf32>
    %134 = vector.broadcast %126 : vector<17x1xf32> to vector<17x32xf32>
    %135 = arith.subf %120, %134 : vector<17x32xf32>
    %cst_69 = arith.constant 9.99999997E-7 : f32
    %136 = vector.broadcast %cst_69 : f32 to vector<17x1xf32>
    %137 = arith.addf %133, %136 : vector<17x1xf32>
    %138 = math.rsqrt %137 : vector<17x1xf32>
    %139 = vector.broadcast %138 : vector<17x1xf32> to vector<17x32xf32>
    %140 = arith.mulf %135, %139 : vector<17x32xf32>
    %141 = vector.broadcast %121 : vector<1x32xf32> to vector<17x32xf32>
    %142 = arith.mulf %140, %141 : vector<17x32xf32>
    %143 = vector.broadcast %122 : vector<1x32xf32> to vector<17x32xf32>
    %144 = arith.addf %142, %143 : vector<17x32xf32>
    %c0_70 = arith.constant 0 : index
    %c0_71 = arith.constant 0 : index
    %c0_72 = arith.constant 0 : index
    %145 = vector.load %arg14[%c0_70, %c0_71, %c0_72] : memref<2x32x128xf32, #tpu.memory_space<vmem>>, vector<1x32x128xf32>
    %146 = vector.shape_cast %145 : vector<1x32x128xf32> to vector<32x128xf32>
    %cst_73 = arith.constant dense<0.000000e+00> : vector<17x128xf32>
    %147 = tpu.matmul %144, %146, %cst_73 {dimension_numbers = #tpu.dot_dimension_numbers<[1], [0], [0], [1], [0, 0, 1, 1], [], []>} : vector<17x32xf32>, vector<32x128xf32>, vector<17x128xf32> -> vector<17x128xf32>
    %c0_74 = arith.constant 0 : index
    %c0_75 = arith.constant 0 : index
    %148 = vector.load %arg15[%c0_74, %c0_75] : memref<2x128xf32, #tpu.memory_space<vmem>>, vector<1x128xf32>
    %149 = vector.broadcast %148 : vector<1x128xf32> to vector<17x128xf32>
    %150 = arith.addf %147, %149 : vector<17x128xf32>
    %151 = arith.mulf %150, %150 : vector<17x128xf32>
    %152 = arith.mulf %150, %151 : vector<17x128xf32>
    %cst_76 = arith.constant 4.471500e-02 : f32
    %153 = vector.broadcast %cst_76 : f32 to vector<17x128xf32>
    %154 = arith.mulf %153, %152 : vector<17x128xf32>
    %155 = arith.addf %150, %154 : vector<17x128xf32>
    %cst_77 = arith.constant 0.797884583 : f32
    %156 = vector.broadcast %cst_77 : f32 to vector<17x128xf32>
    %157 = arith.mulf %156, %155 : vector<17x128xf32>
    %158 = math.tanh %157 : vector<17x128xf32>
    %cst_78 = arith.constant 1.000000e+00 : f32
    %159 = vector.broadcast %cst_78 : f32 to vector<17x128xf32>
    %160 = arith.addf %159, %158 : vector<17x128xf32>
    %cst_79 = arith.constant 5.000000e-01 : f32
    %161 = vector.broadcast %cst_79 : f32 to vector<17x128xf32>
    %162 = arith.mulf %161, %160 : vector<17x128xf32>
    %163 = arith.mulf %150, %162 : vector<17x128xf32>
    %c0_80 = arith.constant 0 : index
    %c0_81 = arith.constant 0 : index
    %c0_82 = arith.constant 0 : index
    %164 = vector.load %arg16[%c0_80, %c0_81, %c0_82] : memref<2x128x32xf32, #tpu.memory_space<vmem>>, vector<1x128x32xf32>
    %165 = vector.shape_cast %164 : vector<1x128x32xf32> to vector<128x32xf32>
    %cst_83 = arith.constant dense<0.000000e+00> : vector<17x32xf32>
    %166 = tpu.matmul %163, %165, %cst_83 {dimension_numbers = #tpu.dot_dimension_numbers<[1], [0], [0], [1], [0, 0, 1, 1], [], []>} : vector<17x128xf32>, vector<128x32xf32>, vector<17x32xf32> -> vector<17x32xf32>
    %167 = arith.addf %120, %166 : vector<17x32xf32>
    %c0_84 = arith.constant 0 : index
    %c0_85 = arith.constant 0 : index
    %168 = vector.load %arg17[%c0_84, %c0_85] : memref<2x32xf32, #tpu.memory_space<vmem>>, vector<1x32xf32>
    %169 = vector.broadcast %168 : vector<1x32xf32> to vector<17x32xf32>
    %170 = arith.addf %167, %169 : vector<17x32xf32>
    %c1_86 = arith.constant 1 : index
    %c0_87 = arith.constant 0 : index
    %171 = vector.load %arg6[%c1_86, %c0_87] : memref<2x32xf32, #tpu.memory_space<vmem>>, vector<1x32xf32>
    %c1_88 = arith.constant 1 : index
    %c0_89 = arith.constant 0 : index
    %172 = vector.load %arg7[%c1_88, %c0_89] : memref<2x32xf32, #tpu.memory_space<vmem>>, vector<1x32xf32>
    %cst_90 = arith.constant dense<0.000000e+00> : vector<17xf32>
    %173 = vector.multi_reduction <add>, %170, %cst_90 [1] : vector<17x32xf32> to vector<17xf32>
    %174 = vector.shape_cast %173 : vector<17xf32> to vector<17x1xf32>
    %cst_91 = arith.constant 3.200000e+01 : f32
    %175 = vector.broadcast %cst_91 : f32 to vector<17x1xf32>
    %176 = arith.divf %174, %175 : vector<17x1xf32>
    %177 = vector.broadcast %176 : vector<17x1xf32> to vector<17x32xf32>
    %178 = arith.subf %170, %177 : vector<17x32xf32>
    %179 = arith.mulf %178, %178 : vector<17x32xf32>
    %cst_92 = arith.constant dense<0.000000e+00> : vector<17xf32>
    %180 = vector.multi_reduction <add>, %179, %cst_92 [1] : vector<17x32xf32> to vector<17xf32>
    %181 = vector.shape_cast %180 : vector<17xf32> to vector<17x1xf32>
    %cst_93 = arith.constant 3.200000e+01 : f32
    %182 = vector.broadcast %cst_93 : f32 to vector<17x1xf32>
    %183 = arith.divf %181, %182 : vector<17x1xf32>
    %184 = vector.broadcast %176 : vector<17x1xf32> to vector<17x32xf32>
    %185 = arith.subf %170, %184 : vector<17x32xf32>
    %cst_94 = arith.constant 9.99999997E-7 : f32
    %186 = vector.broadcast %cst_94 : f32 to vector<17x1xf32>
    %187 = arith.addf %183, %186 : vector<17x1xf32>
    %188 = math.rsqrt %187 : vector<17x1xf32>
    %189 = vector.broadcast %188 : vector<17x1xf32> to vector<17x32xf32>
    %190 = arith.mulf %185, %189 : vector<17x32xf32>
    %191 = vector.broadcast %171 : vector<1x32xf32> to vector<17x32xf32>
    %192 = arith.mulf %190, %191 : vector<17x32xf32>
    %193 = vector.broadcast %172 : vector<1x32xf32> to vector<17x32xf32>
    %194 = arith.addf %192, %193 : vector<17x32xf32>
    %c1_95 = arith.constant 1 : index
    %c0_96 = arith.constant 0 : index
    %c0_97 = arith.constant 0 : index
    %195 = vector.load %arg8[%c1_95, %c0_96, %c0_97] : memref<2x32x96xf32, #tpu.memory_space<vmem>>, vector<1x32x96xf32>
    %196 = vector.shape_cast %195 : vector<1x32x96xf32> to vector<32x96xf32>
    %cst_98 = arith.constant dense<0.000000e+00> : vector<17x96xf32>
    %197 = tpu.matmul %194, %196, %cst_98 {dimension_numbers = #tpu.dot_dimension_numbers<[1], [0], [0], [1], [0, 0, 1, 1], [], []>} : vector<17x32xf32>, vector<32x96xf32>, vector<17x96xf32> -> vector<17x96xf32>
    %c1_99 = arith.constant 1 : index
    %c0_100 = arith.constant 0 : index
    %198 = vector.load %arg9[%c1_99, %c0_100] : memref<2x96xf32, #tpu.memory_space<vmem>>, vector<1x96xf32>
    %199 = vector.broadcast %198 : vector<1x96xf32> to vector<17x96xf32>
    %200 = arith.addf %197, %199 : vector<17x96xf32>
    %201 = vector.extract_strided_slice %200 {offsets = [0, 0], sizes = [17, 32], strides = [1, 1]} : vector<17x96xf32> to vector<17x32xf32>
    %cst_101 = arith.constant 0.353553385 : f32
    %202 = vector.broadcast %cst_101 : f32 to vector<17x32xf32>
    %203 = arith.mulf %201, %202 : vector<17x32xf32>
    %204 = vector.extract_strided_slice %200 {offsets = [0, 32], sizes = [17, 32], strides = [1, 1]} : vector<17x96xf32> to vector<17x32xf32>
    %205 = vector.extract_strided_slice %200 {offsets = [0, 64], sizes = [17, 32], strides = [1, 1]} : vector<17x96xf32> to vector<17x32xf32>
    %206 = vector.extract_strided_slice %203 {offsets = [0, 0], sizes = [17, 8], strides = [1, 1]} : vector<17x32xf32> to vector<17x8xf32>
    %207 = vector.extract_strided_slice %204 {offsets = [0, 0], sizes = [17, 8], strides = [1, 1]} : vector<17x32xf32> to vector<17x8xf32>
    %cst_102 = arith.constant dense<0.000000e+00> : vector<17x17xf32>
    %208 = tpu.matmul %206, %207, %cst_102 {dimension_numbers = #tpu.dot_dimension_numbers<[1], [1], [0], [0], [0, 0, 1, 0], [], []>} : vector<17x8xf32>, vector<17x8xf32>, vector<17x17xf32> -> vector<17x17xf32>
    %cst_103 = arith.constant dense<0xFF800000> : vector<17xf32>
    %209 = vector.multi_reduction <maximumf>, %208, %cst_103 [1] : vector<17x17xf32> to vector<17xf32>
    %210 = vector.shape_cast %209 : vector<17xf32> to vector<17x1xf32>
    %211 = vector.broadcast %210 : vector<17x1xf32> to vector<17x17xf32>
    %212 = arith.subf %208, %211 : vector<17x17xf32>
    %213 = math.exp %212 : vector<17x17xf32>
    %cst_104 = arith.constant dense<0.000000e+00> : vector<17xf32>
    %214 = vector.multi_reduction <add>, %213, %cst_104 [1] : vector<17x17xf32> to vector<17xf32>
    %215 = vector.shape_cast %214 : vector<17xf32> to vector<17x1xf32>
    %216 = tpu.reciprocal %215 {approx = true} : vector<17x1xf32> -> vector<17x1xf32>
    %217 = vector.broadcast %216 : vector<17x1xf32> to vector<17x17xf32>
    %218 = arith.mulf %213, %217 : vector<17x17xf32>
    %219 = vector.extract_strided_slice %205 {offsets = [0, 0], sizes = [17, 8], strides = [1, 1]} : vector<17x32xf32> to vector<17x8xf32>
    %cst_105 = arith.constant dense<0.000000e+00> : vector<17x8xf32>
    %220 = tpu.matmul %218, %219, %cst_105 {dimension_numbers = #tpu.dot_dimension_numbers<[1], [0], [0], [1], [0, 0, 1, 1], [], []>} : vector<17x17xf32>, vector<17x8xf32>, vector<17x8xf32> -> vector<17x8xf32>
    %c0_106 = arith.constant 0 : index
    %c0_107 = arith.constant 0 : index
    %221 = vector.load %arg29[%c0_106, %c0_107] : memref<17x32xf32, #tpu.memory_space<vmem>>, vector<17x8xf32>
    tpu.vector_store %arg29[%c0_106, %c0_107], %220 {strides = array<i32>} : memref<17x32xf32, #tpu.memory_space<vmem>>, vector<17x8xf32>,
    %222 = vector.extract_strided_slice %203 {offsets = [0, 8], sizes = [17, 8], strides = [1, 1]} : vector<17x32xf32> to vector<17x8xf32>
    %223 = vector.extract_strided_slice %204 {offsets = [0, 8], sizes = [17, 8], strides = [1, 1]} : vector<17x32xf32> to vector<17x8xf32>
    %cst_108 = arith.constant dense<0.000000e+00> : vector<17x17xf32>
    %224 = tpu.matmul %222, %223, %cst_108 {dimension_numbers = #tpu.dot_dimension_numbers<[1], [1], [0], [0], [0, 0, 1, 0], [], []>} : vector<17x8xf32>, vector<17x8xf32>, vector<17x17xf32> -> vector<17x17xf32>
    %cst_109 = arith.constant dense<0xFF800000> : vector<17xf32>
    %225 = vector.multi_reduction <maximumf>, %224, %cst_109 [1] : vector<17x17xf32> to vector<17xf32>
    %226 = vector.shape_cast %225 : vector<17xf32> to vector<17x1xf32>
    %227 = vector.broadcast %226 : vector<17x1xf32> to vector<17x17xf32>
    %228 = arith.subf %224, %227 : vector<17x17xf32>
    %229 = math.exp %228 : vector<17x17xf32>
    %cst_110 = arith.constant dense<0.000000e+00> : vector<17xf32>
    %230 = vector.multi_reduction <add>, %229, %cst_110 [1] : vector<17x17xf32> to vector<17xf32>
    %231 = vector.shape_cast %230 : vector<17xf32> to vector<17x1xf32>
    %232 = tpu.reciprocal %231 {approx = true} : vector<17x1xf32> -> vector<17x1xf32>
    %233 = vector.broadcast %232 : vector<17x1xf32> to vector<17x17xf32>
    %234 = arith.mulf %229, %233 : vector<17x17xf32>
    %235 = vector.extract_strided_slice %205 {offsets = [0, 8], sizes = [17, 8], strides = [1, 1]} : vector<17x32xf32> to vector<17x8xf32>
    %cst_111 = arith.constant dense<0.000000e+00> : vector<17x8xf32>
    %236 = tpu.matmul %234, %235, %cst_111 {dimension_numbers = #tpu.dot_dimension_numbers<[1], [0], [0], [1], [0, 0, 1, 1], [], []>} : vector<17x17xf32>, vector<17x8xf32>, vector<17x8xf32> -> vector<17x8xf32>
    %c0_112 = arith.constant 0 : index
    %c8_113 = arith.constant 8 : index
    %237 = vector.load %arg29[%c0_112, %c8_113] : memref<17x32xf32, #tpu.memory_space<vmem>>, vector<17x8xf32>
    tpu.vector_store %arg29[%c0_112, %c8_113], %236 {strides = array<i32>} : memref<17x32xf32, #tpu.memory_space<vmem>>, vector<17x8xf32>,
    %238 = vector.extract_strided_slice %203 {offsets = [0, 16], sizes = [17, 8], strides = [1, 1]} : vector<17x32xf32> to vector<17x8xf32>
    %239 = vector.extract_strided_slice %204 {offsets = [0, 16], sizes = [17, 8], strides = [1, 1]} : vector<17x32xf32> to vector<17x8xf32>
    %cst_114 = arith.constant dense<0.000000e+00> : vector<17x17xf32>
    %240 = tpu.matmul %238, %239, %cst_114 {dimension_numbers = #tpu.dot_dimension_numbers<[1], [1], [0], [0], [0, 0, 1, 0], [], []>} : vector<17x8xf32>, vector<17x8xf32>, vector<17x17xf32> -> vector<17x17xf32>
    %cst_115 = arith.constant dense<0xFF800000> : vector<17xf32>
    %241 = vector.multi_reduction <maximumf>, %240, %cst_115 [1] : vector<17x17xf32> to vector<17xf32>
    %242 = vector.shape_cast %241 : vector<17xf32> to vector<17x1xf32>
    %243 = vector.broadcast %242 : vector<17x1xf32> to vector<17x17xf32>
    %244 = arith.subf %240, %243 : vector<17x17xf32>
    %245 = math.exp %244 : vector<17x17xf32>
    %cst_116 = arith.constant dense<0.000000e+00> : vector<17xf32>
    %246 = vector.multi_reduction <add>, %245, %cst_116 [1] : vector<17x17xf32> to vector<17xf32>
    %247 = vector.shape_cast %246 : vector<17xf32> to vector<17x1xf32>
    %248 = tpu.reciprocal %247 {approx = true} : vector<17x1xf32> -> vector<17x1xf32>
    %249 = vector.broadcast %248 : vector<17x1xf32> to vector<17x17xf32>
    %250 = arith.mulf %245, %249 : vector<17x17xf32>
    %251 = vector.extract_strided_slice %205 {offsets = [0, 16], sizes = [17, 8], strides = [1, 1]} : vector<17x32xf32> to vector<17x8xf32>
    %cst_117 = arith.constant dense<0.000000e+00> : vector<17x8xf32>
    %252 = tpu.matmul %250, %251, %cst_117 {dimension_numbers = #tpu.dot_dimension_numbers<[1], [0], [0], [1], [0, 0, 1, 1], [], []>} : vector<17x17xf32>, vector<17x8xf32>, vector<17x8xf32> -> vector<17x8xf32>
    %c0_118 = arith.constant 0 : index
    %c16_119 = arith.constant 16 : index
    %253 = vector.load %arg29[%c0_118, %c16_119] : memref<17x32xf32, #tpu.memory_space<vmem>>, vector<17x8xf32>
    tpu.vector_store %arg29[%c0_118, %c16_119], %252 {strides = array<i32>} : memref<17x32xf32, #tpu.memory_space<vmem>>, vector<17x8xf32>,
    %254 = vector.extract_strided_slice %203 {offsets = [0, 24], sizes = [17, 8], strides = [1, 1]} : vector<17x32xf32> to vector<17x8xf32>
    %255 = vector.extract_strided_slice %204 {offsets = [0, 24], sizes = [17, 8], strides = [1, 1]} : vector<17x32xf32> to vector<17x8xf32>
    %cst_120 = arith.constant dense<0.000000e+00> : vector<17x17xf32>
    %256 = tpu.matmul %254, %255, %cst_120 {dimension_numbers = #tpu.dot_dimension_numbers<[1], [1], [0], [0], [0, 0, 1, 0], [], []>} : vector<17x8xf32>, vector<17x8xf32>, vector<17x17xf32> -> vector<17x17xf32>
    %cst_121 = arith.constant dense<0xFF800000> : vector<17xf32>
    %257 = vector.multi_reduction <maximumf>, %256, %cst_121 [1] : vector<17x17xf32> to vector<17xf32>
    %258 = vector.shape_cast %257 : vector<17xf32> to vector<17x1xf32>
    %259 = vector.broadcast %258 : vector<17x1xf32> to vector<17x17xf32>
    %260 = arith.subf %256, %259 : vector<17x17xf32>
    %261 = math.exp %260 : vector<17x17xf32>
    %cst_122 = arith.constant dense<0.000000e+00> : vector<17xf32>
    %262 = vector.multi_reduction <add>, %261, %cst_122 [1] : vector<17x17xf32> to vector<17xf32>
    %263 = vector.shape_cast %262 : vector<17xf32> to vector<17x1xf32>
    %264 = tpu.reciprocal %263 {approx = true} : vector<17x1xf32> -> vector<17x1xf32>
    %265 = vector.broadcast %264 : vector<17x1xf32> to vector<17x17xf32>
    %266 = arith.mulf %261, %265 : vector<17x17xf32>
    %267 = vector.extract_strided_slice %205 {offsets = [0, 24], sizes = [17, 8], strides = [1, 1]} : vector<17x32xf32> to vector<17x8xf32>
    %cst_123 = arith.constant dense<0.000000e+00> : vector<17x8xf32>
    %268 = tpu.matmul %266, %267, %cst_123 {dimension_numbers = #tpu.dot_dimension_numbers<[1], [0], [0], [1], [0, 0, 1, 1], [], []>} : vector<17x17xf32>, vector<17x8xf32>, vector<17x8xf32> -> vector<17x8xf32>
    %c0_124 = arith.constant 0 : index
    %c24_125 = arith.constant 24 : index
    %269 = vector.load %arg29[%c0_124, %c24_125] : memref<17x32xf32, #tpu.memory_space<vmem>>, vector<17x8xf32>
    tpu.vector_store %arg29[%c0_124, %c24_125], %268 {strides = array<i32>} : memref<17x32xf32, #tpu.memory_space<vmem>>, vector<17x8xf32>,
    %c0_126 = arith.constant 0 : index
    %c0_127 = arith.constant 0 : index
    %270 = vector.load %arg29[%c0_126, %c0_127] : memref<17x32xf32, #tpu.memory_space<vmem>>, vector<17x32xf32>
    %c1_128 = arith.constant 1 : index
    %c0_129 = arith.constant 0 : index
    %c0_130 = arith.constant 0 : index
    %271 = vector.load %arg10[%c1_128, %c0_129, %c0_130] : memref<2x32x32xf32, #tpu.memory_space<vmem>>, vector<1x32x32xf32>
    %272 = vector.shape_cast %271 : vector<1x32x32xf32> to vector<32x32xf32>
    %cst_131 = arith.constant dense<0.000000e+00> : vector<17x32xf32>
    %273 = tpu.matmul %270, %272, %cst_131 {dimension_numbers = #tpu.dot_dimension_numbers<[1], [0], [0], [1], [0, 0, 1, 1], [], []>} : vector<17x32xf32>, vector<32x32xf32>, vector<17x32xf32> -> vector<17x32xf32>
    %274 = arith.addf %170, %273 : vector<17x32xf32>
    %c1_132 = arith.constant 1 : index
    %c0_133 = arith.constant 0 : index
    %275 = vector.load %arg11[%c1_132, %c0_133] : memref<2x32xf32, #tpu.memory_space<vmem>>, vector<1x32xf32>
    %276 = vector.broadcast %275 : vector<1x32xf32> to vector<17x32xf32>
    %277 = arith.addf %274, %276 : vector<17x32xf32>
    %c1_134 = arith.constant 1 : index
    %c0_135 = arith.constant 0 : index
    %278 = vector.load %arg12[%c1_134, %c0_135] : memref<2x32xf32, #tpu.memory_space<vmem>>, vector<1x32xf32>
    %c1_136 = arith.constant 1 : index
    %c0_137 = arith.constant 0 : index
    %279 = vector.load %arg13[%c1_136, %c0_137] : memref<2x32xf32, #tpu.memory_space<vmem>>, vector<1x32xf32>
    %cst_138 = arith.constant dense<0.000000e+00> : vector<17xf32>
    %280 = vector.multi_reduction <add>, %277, %cst_138 [1] : vector<17x32xf32> to vector<17xf32>
    %281 = vector.shape_cast %280 : vector<17xf32> to vector<17x1xf32>
    %cst_139 = arith.constant 3.200000e+01 : f32
    %282 = vector.broadcast %cst_139 : f32 to vector<17x1xf32>
    %283 = arith.divf %281, %282 : vector<17x1xf32>
    %284 = vector.broadcast %283 : vector<17x1xf32> to vector<17x32xf32>
    %285 = arith.subf %277, %284 : vector<17x32xf32>
    %286 = arith.mulf %285, %285 : vector<17x32xf32>
    %cst_140 = arith.constant dense<0.000000e+00> : vector<17xf32>
    %287 = vector.multi_reduction <add>, %286, %cst_140 [1] : vector<17x32xf32> to vector<17xf32>
    %288 = vector.shape_cast %287 : vector<17xf32> to vector<17x1xf32>
    %cst_141 = arith.constant 3.200000e+01 : f32
    %289 = vector.broadcast %cst_141 : f32 to vector<17x1xf32>
    %290 = arith.divf %288, %289 : vector<17x1xf32>
    %291 = vector.broadcast %283 : vector<17x1xf32> to vector<17x32xf32>
    %292 = arith.subf %277, %291 : vector<17x32xf32>
    %cst_142 = arith.constant 9.99999997E-7 : f32
    %293 = vector.broadcast %cst_142 : f32 to vector<17x1xf32>
    %294 = arith.addf %290, %293 : vector<17x1xf32>
    %295 = math.rsqrt %294 : vector<17x1xf32>
    %296 = vector.broadcast %295 : vector<17x1xf32> to vector<17x32xf32>
    %297 = arith.mulf %292, %296 : vector<17x32xf32>
    %298 = vector.broadcast %278 : vector<1x32xf32> to vector<17x32xf32>
    %299 = arith.mulf %297, %298 : vector<17x32xf32>
    %300 = vector.broadcast %279 : vector<1x32xf32> to vector<17x32xf32>
    %301 = arith.addf %299, %300 : vector<17x32xf32>
    %c1_143 = arith.constant 1 : index
    %c0_144 = arith.constant 0 : index
    %c0_145 = arith.constant 0 : index
    %302 = vector.load %arg14[%c1_143, %c0_144, %c0_145] : memref<2x32x128xf32, #tpu.memory_space<vmem>>, vector<1x32x128xf32>
    %303 = vector.shape_cast %302 : vector<1x32x128xf32> to vector<32x128xf32>
    %cst_146 = arith.constant dense<0.000000e+00> : vector<17x128xf32>
    %304 = tpu.matmul %301, %303, %cst_146 {dimension_numbers = #tpu.dot_dimension_numbers<[1], [0], [0], [1], [0, 0, 1, 1], [], []>} : vector<17x32xf32>, vector<32x128xf32>, vector<17x128xf32> -> vector<17x128xf32>
    %c1_147 = arith.constant 1 : index
    %c0_148 = arith.constant 0 : index
    %305 = vector.load %arg15[%c1_147, %c0_148] : memref<2x128xf32, #tpu.memory_space<vmem>>, vector<1x128xf32>
    %306 = vector.broadcast %305 : vector<1x128xf32> to vector<17x128xf32>
    %307 = arith.addf %304, %306 : vector<17x128xf32>
    %308 = arith.mulf %307, %307 : vector<17x128xf32>
    %309 = arith.mulf %307, %308 : vector<17x128xf32>
    %cst_149 = arith.constant 4.471500e-02 : f32
    %310 = vector.broadcast %cst_149 : f32 to vector<17x128xf32>
    %311 = arith.mulf %310, %309 : vector<17x128xf32>
    %312 = arith.addf %307, %311 : vector<17x128xf32>
    %cst_150 = arith.constant 0.797884583 : f32
    %313 = vector.broadcast %cst_150 : f32 to vector<17x128xf32>
    %314 = arith.mulf %313, %312 : vector<17x128xf32>
    %315 = math.tanh %314 : vector<17x128xf32>
    %cst_151 = arith.constant 1.000000e+00 : f32
    %316 = vector.broadcast %cst_151 : f32 to vector<17x128xf32>
    %317 = arith.addf %316, %315 : vector<17x128xf32>
    %cst_152 = arith.constant 5.000000e-01 : f32
    %318 = vector.broadcast %cst_152 : f32 to vector<17x128xf32>
    %319 = arith.mulf %318, %317 : vector<17x128xf32>
    %320 = arith.mulf %307, %319 : vector<17x128xf32>
    %c1_153 = arith.constant 1 : index
    %c0_154 = arith.constant 0 : index
    %c0_155 = arith.constant 0 : index
    %321 = vector.load %arg16[%c1_153, %c0_154, %c0_155] : memref<2x128x32xf32, #tpu.memory_space<vmem>>, vector<1x128x32xf32>
    %322 = vector.shape_cast %321 : vector<1x128x32xf32> to vector<128x32xf32>
    %cst_156 = arith.constant dense<0.000000e+00> : vector<17x32xf32>
    %323 = tpu.matmul %320, %322, %cst_156 {dimension_numbers = #tpu.dot_dimension_numbers<[1], [0], [0], [1], [0, 0, 1, 1], [], []>} : vector<17x128xf32>, vector<128x32xf32>, vector<17x32xf32> -> vector<17x32xf32>
    %324 = arith.addf %277, %323 : vector<17x32xf32>
    %c1_157 = arith.constant 1 : index
    %c0_158 = arith.constant 0 : index
    %325 = vector.load %arg17[%c1_157, %c0_158] : memref<2x32xf32, #tpu.memory_space<vmem>>, vector<1x32xf32>
    %326 = vector.broadcast %325 : vector<1x32xf32> to vector<17x32xf32>
    %327 = arith.addf %324, %326 : vector<17x32xf32>
    %c0_159 = arith.constant 0 : index
    %c0_160 = arith.constant 0 : index
    %328 = vector.load %arg18[%c0_159, %c0_160] : memref<1x32xf32, #tpu.memory_space<vmem>>, vector<1x32xf32>
    %c0_161 = arith.constant 0 : index
    %c0_162 = arith.constant 0 : index
    %329 = vector.load %arg19[%c0_161, %c0_162] : memref<1x32xf32, #tpu.memory_space<vmem>>, vector<1x32xf32>
    %cst_163 = arith.constant dense<0.000000e+00> : vector<17xf32>
    %330 = vector.multi_reduction <add>, %327, %cst_163 [1] : vector<17x32xf32> to vector<17xf32>
    %331 = vector.shape_cast %330 : vector<17xf32> to vector<17x1xf32>
    %cst_164 = arith.constant 3.200000e+01 : f32
    %332 = vector.broadcast %cst_164 : f32 to vector<17x1xf32>
    %333 = arith.divf %331, %332 : vector<17x1xf32>
    %334 = vector.broadcast %333 : vector<17x1xf32> to vector<17x32xf32>
    %335 = arith.subf %327, %334 : vector<17x32xf32>
    %336 = arith.mulf %335, %335 : vector<17x32xf32>
    %cst_165 = arith.constant dense<0.000000e+00> : vector<17xf32>
    %337 = vector.multi_reduction <add>, %336, %cst_165 [1] : vector<17x32xf32> to vector<17xf32>
    %338 = vector.shape_cast %337 : vector<17xf32> to vector<17x1xf32>
    %cst_166 = arith.constant 3.200000e+01 : f32
    %339 = vector.broadcast %cst_166 : f32 to vector<17x1xf32>
    %340 = arith.divf %338, %339 : vector<17x1xf32>
    %341 = vector.broadcast %333 : vector<17x1xf32> to vector<17x32xf32>
    %342 = arith.subf %327, %341 : vector<17x32xf32>
    %cst_167 = arith.constant 9.99999997E-7 : f32
    %343 = vector.broadcast %cst_167 : f32 to vector<17x1xf32>
    %344 = arith.addf %340, %343 : vector<17x1xf32>
    %345 = math.rsqrt %344 : vector<17x1xf32>
    %346 = vector.broadcast %345 : vector<17x1xf32> to vector<17x32xf32>
    %347 = arith.mulf %342, %346 : vector<17x32xf32>
    %348 = vector.broadcast %328 : vector<1x32xf32> to vector<17x32xf32>
    %349 = arith.mulf %347, %348 : vector<17x32xf32>
    %350 = vector.broadcast %329 : vector<1x32xf32> to vector<17x32xf32>
    %351 = arith.addf %349, %350 : vector<17x32xf32>
    %cst_168 = arith.constant dense<0.000000e+00> : vector<32xf32>
    %352 = vector.multi_reduction <add>, %351, %cst_168 [0] : vector<17x32xf32> to vector<32xf32>
    %353 = vector.shape_cast %352 : vector<32xf32> to vector<1x32xf32>
    %cst_169 = arith.constant 1.700000e+01 : f32
    %354 = vector.broadcast %cst_169 : f32 to vector<1x32xf32>
    %355 = arith.divf %353, %354 : vector<1x32xf32>
    %356 = vector.shape_cast %355 : vector<1x32xf32> to vector<1x1x32xf32>
    %c0_170 = arith.constant 0 : index
    %c0_171 = arith.constant 0 : index
    %c0_172 = arith.constant 0 : index
    %357 = vector.load %arg27[%c0_170, %c0_171, %c0_172] : memref<1x1x32xf32, #tpu.memory_space<vmem>>, vector<1x1x32xf32>
    tpu.vector_store %arg27[%c0_170, %c0_171, %c0_172], %356 {strides = array<i32>} : memref<1x1x32xf32, #tpu.memory_space<vmem>>, vector<1x1x32xf32>,
    %c0_173 = arith.constant 0 : index
    %c0_174 = arith.constant 0 : index
    %358 = vector.load %arg20[%c0_173, %c0_174] : memref<32x64xf32, #tpu.memory_space<vmem>>, vector<32x64xf32>
    %cst_175 = arith.constant dense<0.000000e+00> : vector<1x64xf32>
    %359 = tpu.matmul %355, %358, %cst_175 {dimension_numbers = #tpu.dot_dimension_numbers<[1], [0], [0], [1], [0, 0, 1, 1], [], []>} : vector<1x32xf32>, vector<32x64xf32>, vector<1x64xf32> -> vector<1x64xf32>
    %c0_176 = arith.constant 0 : index
    %c0_177 = arith.constant 0 : index
    %360 = vector.load %arg21[%c0_176, %c0_177] : memref<1x64xf32, #tpu.memory_space<vmem>>, vector<1x64xf32>
    %361 = arith.addf %359, %360 : vector<1x64xf32>
    %362 = arith.mulf %361, %361 : vector<1x64xf32>
    %363 = arith.mulf %361, %362 : vector<1x64xf32>
    %cst_178 = arith.constant 4.471500e-02 : f32
    %364 = vector.broadcast %cst_178 : f32 to vector<1x64xf32>
    %365 = arith.mulf %364, %363 : vector<1x64xf32>
    %366 = arith.addf %361, %365 : vector<1x64xf32>
    %cst_179 = arith.constant 0.797884583 : f32
    %367 = vector.broadcast %cst_179 : f32 to vector<1x64xf32>
    %368 = arith.mulf %367, %366 : vector<1x64xf32>
    %369 = math.tanh %368 : vector<1x64xf32>
    %cst_180 = arith.constant 1.000000e+00 : f32
    %370 = vector.broadcast %cst_180 : f32 to vector<1x64xf32>
    %371 = arith.addf %370, %369 : vector<1x64xf32>
    %cst_181 = arith.constant 5.000000e-01 : f32
    %372 = vector.broadcast %cst_181 : f32 to vector<1x64xf32>
    %373 = arith.mulf %372, %371 : vector<1x64xf32>
    %374 = arith.mulf %361, %373 : vector<1x64xf32>
    %c0_182 = arith.constant 0 : index
    %c0_183 = arith.constant 0 : index
    %375 = vector.load %arg22[%c0_182, %c0_183] : memref<64x32xf32, #tpu.memory_space<vmem>>, vector<64x32xf32>
    %cst_184 = arith.constant dense<0.000000e+00> : vector<1x32xf32>
    %376 = tpu.matmul %374, %375, %cst_184 {dimension_numbers = #tpu.dot_dimension_numbers<[1], [0], [0], [1], [0, 0, 1, 1], [], []>} : vector<1x64xf32>, vector<64x32xf32>, vector<1x32xf32> -> vector<1x32xf32>
    %c0_185 = arith.constant 0 : index
    %c0_186 = arith.constant 0 : index
    %377 = vector.load %arg23[%c0_185, %c0_186] : memref<1x32xf32, #tpu.memory_space<vmem>>, vector<1x32xf32>
    %378 = arith.addf %376, %377 : vector<1x32xf32>
    %379 = arith.mulf %378, %378 : vector<1x32xf32>
    %380 = arith.mulf %378, %379 : vector<1x32xf32>
    %cst_187 = arith.constant 4.471500e-02 : f32
    %381 = vector.broadcast %cst_187 : f32 to vector<1x32xf32>
    %382 = arith.mulf %381, %380 : vector<1x32xf32>
    %383 = arith.addf %378, %382 : vector<1x32xf32>
    %cst_188 = arith.constant 0.797884583 : f32
    %384 = vector.broadcast %cst_188 : f32 to vector<1x32xf32>
    %385 = arith.mulf %384, %383 : vector<1x32xf32>
    %386 = math.tanh %385 : vector<1x32xf32>
    %cst_189 = arith.constant 1.000000e+00 : f32
    %387 = vector.broadcast %cst_189 : f32 to vector<1x32xf32>
    %388 = arith.addf %387, %386 : vector<1x32xf32>
    %cst_190 = arith.constant 5.000000e-01 : f32
    %389 = vector.broadcast %cst_190 : f32 to vector<1x32xf32>
    %390 = arith.mulf %389, %388 : vector<1x32xf32>
    %391 = arith.mulf %378, %390 : vector<1x32xf32>
    %c0_191 = arith.constant 0 : index
    %c0_192 = arith.constant 0 : index
    %392 = vector.load %arg24[%c0_191, %c0_192] : memref<32x128xf32, #tpu.memory_space<vmem>>, vector<32x128xf32>
    %cst_193 = arith.constant dense<0.000000e+00> : vector<1x128xf32>
    %393 = tpu.matmul %391, %392, %cst_193 {dimension_numbers = #tpu.dot_dimension_numbers<[1], [0], [0], [1], [0, 0, 1, 1], [], []>} : vector<1x32xf32>, vector<32x128xf32>, vector<1x128xf32> -> vector<1x128xf32>
    %c0_194 = arith.constant 0 : index
    %c0_195 = arith.constant 0 : index
    %394 = vector.load %arg25[%c0_194, %c0_195] : memref<1x128xf32, #tpu.memory_space<vmem>>, vector<1x128xf32>
    %395 = arith.addf %393, %394 : vector<1x128xf32>
    %396 = vector.shape_cast %395 : vector<1x128xf32> to vector<1x1x128xf32>
    %c0_196 = arith.constant 0 : index
    %c0_197 = arith.constant 0 : index
    %c0_198 = arith.constant 0 : index
    %397 = vector.load %arg26[%c0_196, %c0_197, %c0_198] : memref<1x1x128xf32, #tpu.memory_space<vmem>>, vector<1x1x128xf32>
    tpu.vector_store %arg26[%c0_196, %c0_197, %c0_198], %396 {strides = array<i32>} : memref<1x1x128xf32, #tpu.memory_space<vmem>>, vector<1x1x128xf32>,
    return
  }
  func.func @transform_0(%arg0: i32) -> (i32, i32) {
    %c0_i32 = arith.constant 0 : i32
    %c0_i32_0 = arith.constant 0 : i32
    return %arg0, %c0_i32 : i32, i32
  }
  func.func @transform_1(%arg0: i32) -> (i32, i32) {
    %c0_i32 = arith.constant 0 : i32
    %c0_i32_0 = arith.constant 0 : i32
    %c0_i32_1 = arith.constant 0 : i32
    return %c0_i32, %c0_i32_0 : i32, i32
  }
  func.func @transform_2(%arg0: i32) -> (i32, i32) {
    %c0_i32 = arith.constant 0 : i32
    %c0_i32_0 = arith.constant 0 : i32
    %c0_i32_1 = arith.constant 0 : i32
    return %c0_i32, %c0_i32_0 : i32, i32
  }
  func.func @transform_3(%arg0: i32) -> (i32, i32) {
    %c0_i32 = arith.constant 0 : i32
    %c0_i32_0 = arith.constant 0 : i32
    %c0_i32_1 = arith.constant 0 : i32
    return %c0_i32, %c0_i32_0 : i32, i32
  }
  func.func @transform_4(%arg0: i32) -> (i32, i32) {
    %c0_i32 = arith.constant 0 : i32
    %c0_i32_0 = arith.constant 0 : i32
    %c0_i32_1 = arith.constant 0 : i32
    return %c0_i32, %c0_i32_0 : i32, i32
  }
  func.func @transform_5(%arg0: i32) -> (i32, i32) {
    %c0_i32 = arith.constant 0 : i32
    %c0_i32_0 = arith.constant 0 : i32
    %c0_i32_1 = arith.constant 0 : i32
    return %c0_i32, %c0_i32_0 : i32, i32
  }
  func.func @transform_6(%arg0: i32) -> (i32, i32) {
    %c0_i32 = arith.constant 0 : i32
    %c0_i32_0 = arith.constant 0 : i32
    %c0_i32_1 = arith.constant 0 : i32
    return %c0_i32, %c0_i32_0 : i32, i32
  }
  func.func @transform_7(%arg0: i32) -> (i32, i32, i32) {
    %c0_i32 = arith.constant 0 : i32
    %c0_i32_0 = arith.constant 0 : i32
    %c0_i32_1 = arith.constant 0 : i32
    %c0_i32_2 = arith.constant 0 : i32
    return %c0_i32, %c0_i32_0, %c0_i32_1 : i32, i32, i32
  }
  func.func @transform_8(%arg0: i32) -> (i32, i32) {
    %c0_i32 = arith.constant 0 : i32
    %c0_i32_0 = arith.constant 0 : i32
    %c0_i32_1 = arith.constant 0 : i32
    return %c0_i32, %c0_i32_0 : i32, i32
  }
  func.func @transform_9(%arg0: i32) -> (i32, i32, i32) {
    %c0_i32 = arith.constant 0 : i32
    %c0_i32_0 = arith.constant 0 : i32
    %c0_i32_1 = arith.constant 0 : i32
    %c0_i32_2 = arith.constant 0 : i32
    return %c0_i32, %c0_i32_0, %c0_i32_1 : i32, i32, i32
  }
  func.func @transform_10(%arg0: i32) -> (i32, i32) {
    %c0_i32 = arith.constant 0 : i32
    %c0_i32_0 = arith.constant 0 : i32
    %c0_i32_1 = arith.constant 0 : i32
    return %c0_i32, %c0_i32_0 : i32, i32
  }
  func.func @transform_11(%arg0: i32) -> (i32, i32) {
    %c0_i32 = arith.constant 0 : i32
    %c0_i32_0 = arith.constant 0 : i32
    %c0_i32_1 = arith.constant 0 : i32
    return %c0_i32, %c0_i32_0 : i32, i32
  }
  func.func @transform_12(%arg0: i32) -> (i32, i32) {
    %c0_i32 = arith.constant 0 : i32
    %c0_i32_0 = arith.constant 0 : i32
    %c0_i32_1 = arith.constant 0 : i32
    return %c0_i32, %c0_i32_0 : i32, i32
  }
  func.func @transform_13(%arg0: i32) -> (i32, i32, i32) {
    %c0_i32 = arith.constant 0 : i32
    %c0_i32_0 = arith.constant 0 : i32
    %c0_i32_1 = arith.constant 0 : i32
    %c0_i32_2 = arith.constant 0 : i32
    return %c0_i32, %c0_i32_0, %c0_i32_1 : i32, i32, i32
  }
  func.func @transform_14(%arg0: i32) -> (i32, i32) {
    %c0_i32 = arith.constant 0 : i32
    %c0_i32_0 = arith.constant 0 : i32
    %c0_i32_1 = arith.constant 0 : i32
    return %c0_i32, %c0_i32_0 : i32, i32
  }
  func.func @transform_15(%arg0: i32) -> (i32, i32, i32) {
    %c0_i32 = arith.constant 0 : i32
    %c0_i32_0 = arith.constant 0 : i32
    %c0_i32_1 = arith.constant 0 : i32
    %c0_i32_2 = arith.constant 0 : i32
    return %c0_i32, %c0_i32_0, %c0_i32_1 : i32, i32, i32
  }
  func.func @transform_16(%arg0: i32) -> (i32, i32) {
    %c0_i32 = arith.constant 0 : i32
    %c0_i32_0 = arith.constant 0 : i32
    %c0_i32_1 = arith.constant 0 : i32
    return %c0_i32, %c0_i32_0 : i32, i32
  }
  func.func @transform_17(%arg0: i32) -> (i32, i32) {
    %c0_i32 = arith.constant 0 : i32
    %c0_i32_0 = arith.constant 0 : i32
    %c0_i32_1 = arith.constant 0 : i32
    return %c0_i32, %c0_i32_0 : i32, i32
  }
  func.func @transform_18(%arg0: i32) -> (i32, i32) {
    %c0_i32 = arith.constant 0 : i32
    %c0_i32_0 = arith.constant 0 : i32
    %c0_i32_1 = arith.constant 0 : i32
    return %c0_i32, %c0_i32_0 : i32, i32
  }
  func.func @transform_19(%arg0: i32) -> (i32, i32) {
    %c0_i32 = arith.constant 0 : i32
    %c0_i32_0 = arith.constant 0 : i32
    %c0_i32_1 = arith.constant 0 : i32
    return %c0_i32, %c0_i32_0 : i32, i32
  }
  func.func @transform_20(%arg0: i32) -> (i32, i32) {
    %c0_i32 = arith.constant 0 : i32
    %c0_i32_0 = arith.constant 0 : i32
    %c0_i32_1 = arith.constant 0 : i32
    return %c0_i32, %c0_i32_0 : i32, i32
  }
  func.func @transform_21(%arg0: i32) -> (i32, i32) {
    %c0_i32 = arith.constant 0 : i32
    %c0_i32_0 = arith.constant 0 : i32
    %c0_i32_1 = arith.constant 0 : i32
    return %c0_i32, %c0_i32_0 : i32, i32
  }
  func.func @transform_22(%arg0: i32) -> (i32, i32) {
    %c0_i32 = arith.constant 0 : i32
    %c0_i32_0 = arith.constant 0 : i32
    %c0_i32_1 = arith.constant 0 : i32
    return %c0_i32, %c0_i32_0 : i32, i32
  }
  func.func @transform_23(%arg0: i32) -> (i32, i32) {
    %c0_i32 = arith.constant 0 : i32
    %c0_i32_0 = arith.constant 0 : i32
    %c0_i32_1 = arith.constant 0 : i32
    return %c0_i32, %c0_i32_0 : i32, i32
  }
  func.func @transform_24(%arg0: i32) -> (i32, i32) {
    %c0_i32 = arith.constant 0 : i32
    %c0_i32_0 = arith.constant 0 : i32
    %c0_i32_1 = arith.constant 0 : i32
    return %c0_i32, %c0_i32_0 : i32, i32
  }
  func.func @transform_25(%arg0: i32) -> (i32, i32, i32) {
    %c0_i32 = arith.constant 0 : i32
    %c0_i32_0 = arith.constant 0 : i32
    %c0_i32_1 = arith.constant 0 : i32
    return %arg0, %c0_i32, %c0_i32_0 : i32, i32, i32
  }
  func.func @transform_26(%arg0: i32) -> (i32, i32, i32) {
    %c0_i32 = arith.constant 0 : i32
    %c0_i32_0 = arith.constant 0 : i32
    %c0_i32_1 = arith.constant 0 : i32
    return %arg0, %c0_i32, %c0_i32_0 : i32, i32, i32
  }
}

</mosaic_0001>

<bundles_post_ra>
// kernel: forward.1
= control target key start
LH: loop header
LB: loop body
LE: loop exit
PB: predicated region body
PF: predicated region fallthrough
CT: control target
= control target key end

     0   :  { %s7292_s0 = inlined_call_operand.vmem [shape: f32[32,192], index: 0, kind: input, shape index: {}]   ;;  %s7293_s1 = inlined_call_operand.vmem [shape: f32[192,32], index: 1, kind: input, shape index: {}]   ;;  %s7294_s2 = inlined_call_operand.vmem [shape: f32[1,32], index: 2, kind: input, shape index: {}]   ;;  %s7295_s3 = inlined_call_operand.vmem [shape: f32[1,32], index: 3, kind: input, shape index: {}]   ;;  %s7296_s4 = inlined_call_operand.vmem [shape: f32[17,32], index: 4, kind: input, shape index: {}]   ;;  %s7297_s5 = inlined_call_operand.vmem [shape: f32[2,32], index: 5, kind: input, shape index: {}]   ;;  %s7298_s6 = inlined_call_operand.vmem [shape: f32[2,32], index: 6, kind: input, shape index: {}]   ;;  %s7299_s7 = inlined_call_operand.vmem [shape: f32[2,32,96], index: 7, kind: input, shape index: {}]   ;;  %s7300_s8 = inlined_call_operand.vmem [shape: f32[2,96], index: 8, kind: input, shape index: {}]   ;;  %s7301_s9 = inlined_call_operand.vmem [shape: f32[2,32,32], index: 9, kind: input, shape index: {}]   ;;  %s7302_s10 = inlined_call_operand.vmem [shape: f32[2,32], index: 10, kind: input, shape index: {}]   ;;  %s7303_s11 = inlined_call_operand.vmem [shape: f32[2,32], index: 11, kind: input, shape index: {}]   ;;  %s7304_s12 = inlined_call_operand.vmem [shape: f32[2,32], index: 12, kind: input, shape index: {}]   ;;  %s7305_s13 = inlined_call_operand.vmem [shape: f32[2,32,128], index: 13, kind: input, shape index: {}]   ;;  %s7306_s14 = inlined_call_operand.vmem [shape: f32[2,128], index: 14, kind: input, shape index: {}]   ;;  %s7307_s15 = inlined_call_operand.vmem [shape: f32[2,128,32], index: 15, kind: input, shape index: {}]   ;;  %s7308_s16 = inlined_call_operand.vmem [shape: f32[2,32], index: 16, kind: input, shape index: {}]   ;;  %s7309_s17 = inlined_call_operand.vmem [shape: f32[1,32], index: 17, kind: input, shape index: {}]   ;;  %s7310_s18 = inlined_call_operand.vmem [shape: f32[1,32], index: 18, kind: input, shape index: {}]   ;;  %s7311_s19 = inlined_call_operand.vmem [shape: f32[32,64], index: 19, kind: input, shape index: {}]   ;;  %s7312_s20 = inlined_call_operand.vmem [shape: f32[1,64], index: 20, kind: input, shape index: {}]   ;;  %s7313_s21 = inlined_call_operand.vmem [shape: f32[64,32], index: 21, kind: input, shape index: {}]   ;;  %s7314_s22 = inlined_call_operand.vmem [shape: f32[1,32], index: 22, kind: input, shape index: {}]   ;;  %s7315_s23 = inlined_call_operand.vmem [shape: f32[32,128], index: 23, kind: input, shape index: {}]   ;;  %s7316_s24 = inlined_call_operand.vmem [shape: f32[1,128], index: 24, kind: input, shape index: {}]   ;;  %s7317_s25 = inlined_call_operand.hbm [shape: f32[2,1,128], index: 25, kind: output, shape index: {0}]   ;;  %s7318_s26 = inlined_call_operand.hbm [shape: f32[2,1,32], index: 26, kind: output, shape index: {1}]  }
   0x1   :  { %7372 = sst [smem:[#allocation16_spill]] %s7292_s0 }
   0x2   :  { %7373 = sst [smem:[#allocation17_spill]] %s7293_s1 }
   0x3   :  { %7374 = sst [smem:[#allocation18_spill]] %s7294_s2 }
   0x4   :  { %7375 = sst [smem:[#allocation19_spill]] %s7295_s3 }
   0x5   :  { %7376 = sst [smem:[#allocation20_spill]] %s7296_s4 }
   0x6   :  { %7377 = sst [smem:[#allocation21_spill]] %s7297_s5 }
   0x7   :  { %7378 = sst [smem:[#allocation22_spill]] %s7298_s6 }
   0x8   :  { %7379 = sst [smem:[#allocation23_spill]] %s7299_s7 }
   0x9   :  { %7380 = sst [smem:[#allocation24_spill]] %s7300_s8 }
   0xa   :  { %7381 = sst [smem:[#allocation25_spill]] %s7301_s9 }
   0xb   :  { %7382 = sst [smem:[#allocation26_spill]] %s7302_s10 }
   0xc   :  { %7383 = sst [smem:[#allocation27_spill]] %s7316_s24 }
   0xd   :  { %7384 = sst [smem:[#allocation28_spill]] %s7317_s25 }
   0xe   :  { %7385 = sst [smem:[#allocation29_spill]] %s7318_s26 }
   0xf   :  { %32 = vsyncpa [#allocation5], 0 }
  0x10   :  { %34 = vsyncpa [#allocation5 + $0x1], 0 }
  0x11   :  { %35 = vsyncpa [#allocation7], 0 }
  0x12   :  { %37 = vsyncpa [#allocation7 + $0x1], 0  ;;  %s6041_s27 = smov 0   ;;  %s6043_s3 = smov 0  }
  0x13   :  { %s6045_s7 = smov 0   ;;  %s6047_s28 = smov 0  }
  0x14 LB: > { %7386 = sst [smem:[#allocation10_spill]] %s5873_s27  ;;  %s6062_s8 = sadd.s32 4294967295, %s5885_s28   ;;  %s5885_s28 = sphi %s6047_s28, %s7430_s28   ;;  %s5881_s7 = sphi %s6045_s7, %s7432_s7   ;;  %s5877_s3 = sphi %s6043_s3, %s7434_s3   ;;  %s5873_s27 = sphi %s6041_s27, %s7433_s27  }
  0x15   : > { %7387 = sst [smem:[#allocation11_spill]] %s5881_s7  ;;  %s4479_s4 = sadd.s32 4294967294, %s5885_s28  }
  0x16   : > { %7388 = sst [smem:[#allocation12_spill]] %s5885_s28  ;;  %s6066_s29 = sadd.s32 1, %s5885_s28  }
  0x17   : > { %7389 = sst [smem:[#allocation13_spill]] %s6066_s29  ;;  %s580_s0 = sadd.s32 1, %s5881_s7 }
  0x18   : > { %s577_s9 = ssub.s32 %s5885_s28, %s6066_s29  ;;  %p590_p0 = scmp.ne.s32.totalorder %s5881_s7, %s5877_s3 }
  0x19   : > { %p578_p1 = scmp.eq.s32.totalorder %s577_s9, 0  ;;  %p591_p2 = scmp.eq.s32.totalorder %s6062_s8, 1 }
  0x1a   : > { %p596_p3 = scmp.ne.s32.totalorder %s5877_s3, %s5873_s27  ;;  %p597_p4 = scmp.eq.s32.totalorder %s4479_s4, 1 }
  0x1b   : > { %s6077_s30 = scalar_select %p578_p1, %s5881_s7, %s580_s0  }
  0x1c   : > { %p6079_p5 = por %p591_p2, %p590_p0  ;;  %p6083_p6 = por %p597_p4, %p596_p3 }
  0x1d   : > { %7390 = sst [smem:[#allocation14_spill]] %s6077_s30  ;;  %p4482_p7 = scmp.ge.s32.totalorder %s5885_s28, 1 }
  0x1e   : > { %s7392_s5 = scalar_select %p6083_p6, 1, 0 }
  0x1f   : > { %p723_p8 = scmp.lt.s32.totalorder %s5885_s28, 3 }
  0x20   : > { %7393 = sst [smem:[#allocation15_spill]] %s7392_s5 }
  0x21   : > { %p724_p9 = pnand %p4482_p7, %p723_p8 }
  0x22   : > { %s7394_s1 = sld [smem:[#allocation17_spill]] (!%p724_p9)  ;;  %s4483_s7 = sshll.u32 (!%p724_p9), %s6062_s8, 1  ;;  %v5887_v3 = vmov (!%p724_p9), 0.0|0.0   ;;  %vm839_vm0 = vcmask (!%p724_p9), 523264   ;;  %vm924_vm1 = vcmask (!%p724_p9), 253952   ;;  %vm930_vm2 = vcmask (!%p724_p9), 261120  }
  0x23   : > { %727 = sbr.rel (%p724_p9) target bundleno = 7636 (0x1dd4), region = 120  ;;  %5301 = vmatprep.subr.bf16.mxu0 (!%p724_p9), %v5887_v3  ;;  %p798_p10 = scmp.lt.s32.totalorder (!%p724_p9), %s4483_s7, 3  ;;  %5337 = vmatprep.subr.bf16.mxu1 (!%p724_p9), %v5887_v3  ;;  %vm5888_vm3 = vmmov (!%p724_p9), 0   ;;  %vm1102_vm4 = vcmask (!%p724_p9), 64512   ;;  %vm1198_vm6 = vcmask (!%p724_p9), 138240   ;;  %vm1205_vm7 = vcmask (!%p724_p9), 131072  }
  0x24   : > { %s7395_s5 = sld [smem:[#allocation16_spill]] (!%p724_p9)  ;;  %s7396_s6 = sld [smem:[#allocation19_spill]] (!%p724_p9)  ;;  %vm6257_vm5 = vmpackc.low (!%p724_p9), %vm1102_vm4, %vm1102_vm4  ;;  %vm1250_vm8 = vcmask (!%p724_p9), 1040384   ;;  %vm1335_vm9 = vcmask (!%p724_p9), 57344   ;;  %vm1585_vm10 = vcmask (!%p724_p9), 130112   ;;  %vm1838_vm11 = vcmask (!%p724_p9), 195712  }
  0x25   : > { %s7397_s25 = sld [smem:[#allocation20_spill]] (!%p724_p9)  ;;  %s7398_s29 = sld [smem:[#allocation18_spill]] (!%p724_p9)  ;;  %vm2091_vm12 = vcmask (!%p724_p9), 261312   ;;  %vm1588_vm13 = vcmask (!%p724_p9), 122944   ;;  %vm1841_vm14 = vcmask (!%p724_p9), 188544   ;;  %vm2094_vm15 = vcmask (!%p724_p9), 254144  }
  0x26   : > { %s7399_s4 = sld [smem:[#allocation23_spill]] (!%p724_p9)  ;;  %s7402_s9 = sld [smem:[#allocation22_spill]] (!%p724_p9) }
  0x27   : > { %s7354_s30 = smov (!%p724_p9), 96   ;;  %s7352_s28 = smov (!%p724_p9), 80  }
  0x28   : > { %v808_v0 = vld [vmem:[%s7394_s1] sm:$0xff] (!%p724_p9)  ;;  %v809_v1 = vld [vmem:[%s7394_s1 + $0x8] sm:$0xff] (!%p724_p9)  ;;  %v810_v2 = vld [vmem:[%s7394_s1 + $0x10] sm:$0xff] (!%p724_p9)  ;;  %s7416_s24 = smov (!%p724_p9), 56   ;;  %s7417_s26 = smov (!%p724_p9), 48  }
  0x29   : > { %v5302_v4 = vpack.c.bf16 (!%p724_p9), %v809_v1, %v808_v0  ;;  %v811_v5 = vld [vmem:[%s7394_s1 + $0x18] sm:$0xff] (!%p724_p9)  ;;  %v812_v7 = vld [vmem:[%s7394_s1 + $0x20] sm:$0xff] (!%p724_p9)  ;;  %v813_v8 = vld [vmem:[%s7394_s1 + $0x28] sm:$0xff] (!%p724_p9) }
  0x2a   : > { %v5305_v6 = vpack.c.bf16 %v811_v5, %v810_v2  ;;  %s7436_s7 = smov (!%p798_p10, %s4483_s7), 3  ;;  %v5308_v9 = vpack.c.bf16 %v813_v8, %v812_v7  ;;  %v814_v10 = vld [vmem:[%s7394_s1 + $0x30] sm:$0xff]  ;;  %v815_v11 = vld [vmem:[%s7394_s1 + $0x38] sm:$0xff]  ;;  %v816_v14 = vld [vmem:[%s7394_s1 + $0x40] sm:$0xff] }
  0x2b   : > { %5303 = vmatpush1.bf16.msra.mxu0 %v5302_v4  ;;  %s4640_s0 = sshll.u32 %s7436_s7, 4  ;;  %v5311_v13 = vpack.c.bf16 %v815_v11, %v814_v10  ;;  %v817_v15 = vld [vmem:[%s7394_s1 + $0x48] sm:$0xff]  ;;  %v818_v17 = vld [vmem:[%s7394_s1 + $0x50] sm:$0xff]  ;;  %v819_v18 = vld [vmem:[%s7394_s1 + $0x58] sm:$0xff]  ;;  %s7400_s7 = sld [smem:[#allocation21_spill]] }
  0x2c   : > { %5304 = vmatprep.subr.bf16.mxu0 %v5887_v3  ;;  %s6114_s27 = scalar_lea.vmem %s7395_s5, %s4640_s0  ;;  %v5314_v16 = vpack.c.bf16 %v817_v15, %v816_v14  ;;  %v5317_v19 = vpack.c.bf16 %v819_v18, %v818_v17  ;;  %v820_v20 = vld [vmem:[%s7394_s1 + $0x60] sm:$0xff]  ;;  %v821_v21 = vld [vmem:[%s7394_s1 + $0x68] sm:$0xff]  ;;  %v822_v23 = vld [vmem:[%s7394_s1 + $0x70] sm:$0xff]  ;;  %v5889_v18 = vmov 0.0   ;;  %s7346_s0 = smov 88  }
  0x2d   : > { %v805_v12 = vld [vmem:[%s6114_s27 + $0x8] sm:$0xff]  ;;  %v5320_v22 = vpack.c.bf16 %v821_v21, %v820_v20  ;;  %v823_v24 = vld [vmem:[%s7394_s1 + $0x78] sm:$0xff]  ;;  %v824_v26 = vld [vmem:[%s7394_s1 + $0x80] sm:$0xff]  ;;  %4844 = vmatprep.mubr.msk.f32.mxu1 %vm5888_vm3, %v5889_v18  ;;  %s7348_s5 = smov 112  }
  0x2e   : > { %4487 = vmatprep.mubr.msk.f32.mxu0 %vm839_vm0, %v805_v12  ;;  %v5323_v25 = vpack.c.bf16 %v823_v24, %v822_v23  ;;  %v825_v27 = vld [vmem:[%s7394_s1 + $0x88] sm:$0xff]  ;;  %v826_v29 = vld [vmem:[%s7394_s1 + $0x90] sm:$0xff]  ;;  %v827_v30 = vld [vmem:[%s7394_s1 + $0x98] sm:$0xff] }
  0x2f   : > { %5306 = vmatpush1.bf16.msra.mxu0 %v5305_v6  ;;  %v5326_v28 = vpack.c.bf16 %v825_v27, %v824_v26  ;;  %v5329_v31 = vpack.c.bf16 %v827_v30, %v826_v29  ;;  %v828_v32 = vld [vmem:[%s7394_s1 + $0xa0] sm:$0xff]  ;;  %v829_v33 = vld [vmem:[%s7394_s1 + $0xa8] sm:$0xff]  ;;  %v830_v35 = vld [vmem:[%s7394_s1 + $0xb0] sm:$0xff] }
  0x30   : > { %5307 = vmatprep.subr.bf16.mxu0 %v5887_v3  ;;  %v5332_v34 = vpack.c.bf16 %v829_v33, %v828_v32  ;;  %v831_v36 = vld [vmem:[%s7394_s1 + $0xb8] sm:$0xff]  ;;  %v804_v38 = vld [vmem:[%s6114_s27] sm:$0xff]  ;;  %v806_v40 = vld [vmem:[%s6114_s27 + $0x10] sm:$0xff]  ;;  %s7408_s1 = smov 8  }
  0x31   : > { %v5335_v37 = vpack.c.bf16 %v831_v36, %v830_v35  ;;  %v807_v39 = vld [vmem:[%s6114_s27 + $0x18] sm:$0xff]  ;;  %v921_v41 = vld [vmem:[%s7396_s6] sm:$0x1]  ;;  %v926_v46 = vld [vmem:[%s7397_s25 + $0x1] sm:$0xff]  ;;  %s7401_s6 = smov %s7400_s7  ;;  %s7403_s27 = sld [smem:[#allocation24_spill]] }
  0x32   : > { %v922_v42 = vld [vmem:[%s7397_s25] sm:$0x1]  ;;  %v927_v51 = vld [vmem:[%s7397_s25 + $0x9] sm:$0xff]  ;;  %v995_v17 = vld [vmem:[%s7399_s4 + $0x18] sm:$0xff]  ;;  %s7410_s25 = smov 96  }
  0x33   : > { %5309 = vmatpush1.bf16.msra.mxu0 %v5308_v9  ;;  %v923_v43 = vadd.f32 %v922_v42, %v921_v41  ;;  %v4486_v44 = vld [vmem:[%s7398_s29] ss:$0 sm:$0xff]  ;;  %v993_v14 = vld [vmem:[%s7399_s4 + $0x8] sm:$0xff]  ;;  %v994_v15 = vld [vmem:[%s7399_s4 + $0x10] sm:$0xff]  ;;  %s7350_s29 = smov 120  }
  0x34   : > { %5310 = vmatprep.subr.bf16.mxu0 %v5887_v3  ;;  %v4489_v30 = vld [vmem:[%s7400_s7] ss:$0 sm:$0xff]  ;;  %s7334_s7 = smov 64  }
  0x35   : > { %925 = vst.msk [vmem:[#allocation2] sm:$0x1] %vm924_vm1, %v923_v43  ;;  %v4490_v32 = vld [vmem:[%s7402_s9] ss:$0 sm:$0xff] }
  0x37   : > { %5312 = vmatpush1.bf16.msra.mxu0 %v5311_v13  ;;  %v992_v13 = vld [vmem:[%s7399_s4] sm:$0xff]  ;;  %s7404_s10 = smov %s7403_s27 }
  0x38   : > { %5313 = vmatprep.subr.bf16.mxu0 %v5887_v3 }
  0x3b   : > { %5315 = vmatpush1.bf16.msra.mxu0 %v5314_v16  ;;  %v5338_v16 = vpack.c.bf16 %v993_v14, %v992_v13 }
  0x3c   : > { %5316 = vmatprep.subr.bf16.mxu0 %v5887_v3 }
  0x3d   : > { %5339 = vmatpush3.bf16.msra.mxu1 %v5338_v16 }
  0x3e   : > { %5340 = vmatprep.subr.bf16.mxu1 %v5887_v3 }
  0x3f   : > { %5318 = vmatpush1.bf16.msra.mxu0 %v5317_v19  ;;  %v5341_v19 = vpack.c.bf16 %v995_v17, %v994_v15 }
  0x40   : > { %5319 = vmatprep.subr.bf16.mxu0 %v5887_v3 }
  0x41   : > { %5342 = vmatpush3.bf16.msra.mxu1 %v5341_v19 }
  0x42   : > { %5343 = vmatprep.subr.bf16.mxu1 %v5887_v3 }
  0x43   : > { %5321 = vmatpush1.bf16.msra.mxu0 %v5320_v22 }
  0x44   : > { %5322 = vmatprep.subr.bf16.mxu0 %v5887_v3 }
  0x47   : > { %5324 = vmatpush1.bf16.msra.mxu0 %v5323_v25 }
  0x48   : > { %5325 = vmatprep.subr.bf16.mxu0 %v5887_v3 }
  0x4b   : > { %5327 = vmatpush1.bf16.msra.mxu0 %v5326_v28 }
  0x4c   : > { %5328 = vmatprep.subr.bf16.mxu0 %v5887_v3 }
  0x4f   : > { %5330 = vmatpush1.bf16.msra.mxu0 %v5329_v31 }
  0x50   : > { %5331 = vmatprep.subr.bf16.mxu0 %v5887_v3 }
  0x53   : > { %5333 = vmatpush1.bf16.msra.mxu0 %v5332_v34 }
  0x54   : > { %5334 = vmatprep.subr.bf16.mxu0 %v5887_v3 }
  0x57   : > { %5336 = vmatpush1.bf16.msra.mxu0 %v5335_v37 }
  0x58   : > { %5354 = vmatprep.subr.bf16.mxu0 %v5887_v3 }
  0x5a   : > { %911 = vmatmul.mubr.f32.vlgmr.msra.gmra.mrb[0].mxu0 %v804_v38 }
  0x5b   : > { %4488 = vmatprep.mubr.msk.f32.mxu0 %vm839_vm0, %v807_v39 }
  0x5e   : > { %916 = vmatmul.mubr.f32.gmra.mrb[2].mxu0 %v806_v40 }
  0x5f   : > { %4904 = vmatprep.mubr.msk.f32.mxu0 %vm5888_vm3, %v5889_v18 }
 0x12d   : > { %v912_v45 = vpop.f32.mrb[0].mxu0 }
 0x12e   : > { %v913_v47 = vadd.f32 %v4486_v44, %v912_v45  ;;  %v914_v48 = vpop.f32.mrb[1].mxu0  ;;  %v4491_v45 = vld [vmem:[%s7403_s27] ss:$0 sm:$0xff]  ;;  %s7336_s27 = smov 104  }
 0x130   : > { %v928_v49 = vadd.f32 %v926_v46, %v913_v47 }
 0x131   : > { %v917_v50 = vpop.f32.mrb[2].mxu0 }
 0x132   : > { %931 = vst.msk [vmem:[#allocation2 + $0x1] sm:$0xff] %vm930_vm2, %v928_v49  ;;  %v918_v52 = vadd.f32 %v4486_v44, %v917_v50  ;;  %v919_v53 = vpop.f32.mrb[3].mxu0 }
 0x134   : > { %v929_v54 = vadd.f32 %v927_v51, %v918_v52 }
 0x136   : > { %932 = vst.msk [vmem:[#allocation2 + $0x9] sm:$0xff] %vm930_vm2, %v929_v54 }
 0x139   : > { %v933_v55 = vld [vmem:[#allocation2] sm:$0xff] }
 0x13a   : > { %v938_v56 = vsel %vm930_vm2, %v933_v55, 0.0 }
 0x13b   : > { %939 = vadd.xlane.f32.xlu0 %v938_v56 }
 0x13d   : > { %v935_v57 = vld [vmem:[#allocation2 + $0x10] sm:$0x1]  ;;  %v934_v58 = vld [vmem:[#allocation2 + $0x8] sm:$0xff] }
 0x13e   : > { %v944_v59 = vsel %vm924_vm1, %v935_v57, 0.0  ;;  %v941_v60 = vsel %vm930_vm2, %v934_v58, 0.0 }
 0x13f   : > { %945 = vadd.xlane.f32.xlu1 %v944_v59  ;;  %942 = vadd.xlane.f32.xlu0 %v941_v60 }
 0x1c8   : > { %v940_v61 = vpop.xlane.xlu0 %939 }
 0x1c9   : > { %v948_v62 = vmul.f32 0.03125, %v940_v61 }
 0x1cb   : > { %v951_v63 = vsub.f32 %v933_v55, %v948_v62 }
 0x1cc   : > { %v946_v0 = vpop.xlane.xlu1 %945  ;;  %v943_v1 = vpop.xlane.xlu0 %942 }
 0x1cd   : > { %v950_v2 = vmul.f32 0.03125, %v946_v0  ;;  %v949_v4 = vmul.f32 0.03125, %v943_v1  ;;  %v954_v5 = vmul.f32 %v951_v63, %v951_v63 }
 0x1cf   : > { %v953_v6 = vsub.f32 %v935_v57, %v950_v2  ;;  %v952_v7 = vsub.f32 %v934_v58, %v949_v4  ;;  %v957_v8 = vsel %vm930_vm2, %v954_v5, 0.0 }
 0x1d0   : > { %958 = vadd.xlane.f32.xlu1 %v957_v8 }
 0x1d1   : > { %v956_v9 = vmul.f32 %v953_v6, %v953_v6  ;;  %v955_v10 = vmul.f32 %v952_v7, %v952_v7 }
 0x1d3   : > { %v963_v11 = vsel %vm924_vm1, %v956_v9, 0.0  ;;  %v960_v12 = vsel %vm930_vm2, %v955_v10, 0.0 }
 0x1d4   : > { %964 = vadd.xlane.f32.xlu1 %v963_v11  ;;  %961 = vadd.xlane.f32.xlu0 %v960_v12 }
 0x25d   : > { %v959_v20 = vpop.xlane.xlu1 %958 }
 0x25e   : > { %v966_v21 = vmul.f32 0.03125, %v959_v20 }
 0x260   : > { %v969_v22 = vadd.f32 1e-06, %v966_v21 }
 0x261   : > { %v965_v23 = vpop.xlane.xlu1 %964  ;;  %v962_v24 = vpop.xlane.xlu0 %961 }
 0x262   : > { %5646 = vrsqrt.f32 %v969_v22  ;;  %v968_v25 = vmul.f32 0.03125, %v965_v23  ;;  %v967_v26 = vmul.f32 0.03125, %v962_v24 }
 0x264   : > { %v971_v27 = vadd.f32 1e-06, %v968_v25  ;;  %v970_v28 = vadd.f32 1e-06, %v967_v26 }
 0x266   : > { %5648 = vrsqrt.f32 %v971_v27 }
 0x267   : > { %5650 = vrsqrt.f32 %v970_v28 }
 0x26c   : > { %v5647_v29 = vpop.eup %5646 }
 0x26d   : > { %v975_v31 = vmul.f32 %v5647_v29, %v951_v63 }
 0x26f   : > { %v982_v33 = vmul.f32 %v4489_v30, %v975_v31 }
 0x270   : > { %v5649_v34 = vpop.eup %5648 }
 0x271   : > { %v5651_v35 = vpop.eup %5650  ;;  %v989_v36 = vadd.f32 %v4490_v32, %v982_v33  ;;  %v977_v38 = vmul.f32 %v5649_v34, %v953_v6 }
 0x272   : > { %v976_v37 = vmul.f32 %v5651_v35, %v952_v7 }
 0x273   : > { %4845 = vmatmul.mubr.msk.f32.vlgmr.msra.gmra.mrb[0].mxu1 %vm930_vm2, %v989_v36  ;;  %v984_v41 = vmul.f32 %v4489_v30, %v977_v38 }
 0x274   : > { %4847 = vmatprep.mubr.msk.f32.mxu1 %vm5888_vm3, %v5889_v18  ;;  %v983_v39 = vmul.f32 %v4489_v30, %v976_v37 }
 0x275   : > { %v991_v42 = vadd.f32 %v4490_v32, %v984_v41 }
 0x276   : > { %v990_v40 = vadd.f32 %v4490_v32, %v983_v39 }
 0x278   : > { %4848 = vmatmul.mubr.msk.f32.gmra.mrb[2].mxu1 %vm930_vm2, %v990_v40 }
 0x279   : > { %4850 = vmatprep.mubr.msk.f32.mxu1 %vm5888_vm3, %v5889_v18 }
 0x27c   : > { %4851 = vmatmul.mubr.msk.f32.gmra.mrb[4].mxu1 %vm930_vm2, %v991_v42 }
 0x27d   : > { %4859 = vmatprep.mubr.msk.f32.mxu1 %vm5888_vm3, %v5889_v18 }
 0x346   : > { %v1076_v43 = vpop.f32.mrb[0].mxu1 }
 0x347   : > { %v4846_v44 = vpop.f32.mrb[1].mxu1  ;;  %v1077_v47 = vadd.f32 %v4491_v45, %v1076_v43 }
 0x349   : > { %v1090_v60 = vmul.f32 0.35355338, %v1077_v47 }
 0x34b   : > { %v1081_v46 = vpop.f32.mrb[2].mxu1 }
 0x34c   : > { %v1082_v48 = vadd.f32 %v4491_v45, %v1081_v46  ;;  %v4849_v49 = vpop.f32.mrb[3].mxu1 }
 0x34e   : > { %v6247_v50 = vpack.i.bf16 %v1082_v48, %v1077_v47  ;;  %v6269_v61 = vmul.f32 0.35355338, %v1082_v48 }
 0x34f   : > { %v1086_v51 = vpop.f32.mrb[4].mxu1 }
 0x350   : > { %v6249_v52 = vadd.f32 %v4491_v45, %v1086_v51  ;;  %5567 = vrot.lane.b32.xlu0 %v6247_v50, %s7354_s30  ;;  %v4852_v53 = vpop.f32.mrb[5].mxu1 }
 0x352   : > { %1100 = vrot.lane.b32.xlu1 %v6249_v52, %s7354_s30  ;;  %v1092_v62 = vmul.f32 0.35355338, %v6249_v52  ;;  %s7362_s30 = smov 16  }
 0x3c2   : > { %v5568_v54 = vpop.permute.xlu0 %5567 }
 0x3c3   : > { %v5570_v55 = vunpack.i.h.bf16 %v5568_v54  ;;  %v5569_v56 = vunpack.i.l.bf16 %v5568_v54 }
 0x3c4   : > { %v1101_v59 = vpop.permute.xlu1 %1100 }
 0x3c5   : > { %v5344_v58 = vpack.c.bf16 %v5570_v55, %v5569_v56 }
 0x3c7   : > { %5346 = vmatpush3.bf16.xpose.msk.msra.mxu1 %vm6257_vm5, %v5344_v58 }
 0x3c8   : > { %4857 = vmatprep.subr.mxu1 %v5889_v18 }
 0x3cf   : > { %4858 = vmatpush3.xpose.msk.msra.mxu1 %vm1102_vm4, %v1101_v59 }
 0x3d0   : > { %5347 = vmatprep.subr.bf16.mxu1 %v5887_v3 }
 0x3d2   : > { %4860 = vmatmul.mubr.msk.f32.vlgmr.msra.gmra.mrb[6].mxu1 %vm1102_vm4, %v1090_v60 }
 0x3d3   : > { %4862 = vmatprep.mubr.msk.f32.mxu1 %vm5888_vm3, %v5889_v18 }
 0x3d6   : > { %4863 = vmatmul.mubr.msk.f32.gmra.mrb[8].mxu1 %vm1102_vm4, %v6269_v61 }
 0x3d7   : > { %4865 = vmatprep.mubr.msk.f32.mxu1 %vm5888_vm3, %v5889_v18 }
 0x3da   : > { %4866 = vmatmul.mubr.msk.f32.gmra.mrb[10].mxu1 %vm1102_vm4, %v1092_v62 }
 0x3db   : > { %4874 = vmatprep.mubr.msk.f32.mxu1 %vm5888_vm3, %v5889_v18 }
 0x4a5   : > { %v1184_v63 = vpop.f32.mrb[6].mxu1 }
 0x4a6   : > { %v4861_v0 = vpop.f32.mrb[7].mxu1  ;;  %v1199_v1 = vsel %vm1198_vm6, %v1184_v63, -inf }
 0x4a7   : > { %1200 = vmax.xlane.f32.xlu1 %v1199_v1 }
 0x4a9   : > { %v1189_v2 = vpop.f32.mrb[8].mxu1 }
 0x4aa   : > { %v4864_v4 = vpop.f32.mrb[9].mxu1  ;;  %v1202_v5 = vsel %vm1198_vm6, %v1189_v2, -inf }
 0x4ab   : > { %1203 = vmax.xlane.f32.xlu0 %v1202_v5 }
 0x4ad   : > { %v1194_v6 = vpop.f32.mrb[10].mxu1 }
 0x4ae   : > { %v4867_v7 = vpop.f32.mrb[11].mxu1  ;;  %v1206_v8 = vsel %vm1205_vm7, %v1194_v6, -inf }
 0x4af   : > { %1207 = vmax.xlane.f32.xlu0 %v1206_v8 }
 0x534   : > { %v1201_v9 = vpop.xlane.xlu1 %1200 }
 0x535   : > { %v1209_v10 = vsub.f32 %v1184_v63, %v1201_v9 }
 0x537   : > { %v1212_v11 = vmul.f32 1.442695, %v1209_v10 }
 0x538   : > { %v1204_v12 = vpop.xlane.xlu0 %1203 }
 0x539   : > { %5652 = vpow2.f32 %v1212_v11  ;;  %v1210_v13 = vsub.f32 %v1189_v2, %v1204_v12 }
 0x53b   : > { %v1214_v14 = vmul.f32 1.442695, %v1210_v13 }
 0x53c   : > { %v1208_v20 = vpop.xlane.xlu0 %1207 }
 0x53d   : > { %5654 = vpow2.f32 %v1214_v14  ;;  %v1211_v21 = vsub.f32 %v1194_v6, %v1208_v20 }
 0x53f   : > { %v1216_v22 = vmul.f32 1.442695, %v1211_v21 }
 0x541   : > { %5656 = vpow2.f32 %v1216_v22 }
 0x543   : > { %v5653_v15 = vpop.eup %5652 }
 0x544   : > { %v1218_v16 = vsel %vm1198_vm6, %v5653_v15, 0.0 }
 0x545   : > { %1219 = vadd.xlane.f32.xlu1 %v1218_v16 }
 0x547   : > { %v5655_v17 = vpop.eup %5654 }
 0x548   : > { %v1221_v19 = vsel %vm1198_vm6, %v5655_v17, 0.0 }
 0x549   : > { %1222 = vadd.xlane.f32.xlu0 %v1221_v19 }
 0x54b   : > { %v5657_v23 = vpop.eup %5656 }
 0x54c   : > { %v1224_v24 = vsel %vm1205_vm7, %v5657_v23, 0.0 }
 0x556   : > { %1237 = vrot.lane.b32.xlu1 %v6249_v52, %s7334_s7 }
 0x55a   : > { %5577 = vrot.lane.b32.xlu1 %v6247_v50, %s7346_s0 }
 0x55e   : > { %1347 = vrot.lane.b32.xlu1 %v6249_v52, %s7346_s0  ;;  %s7360_s0 = smov 24  }
 0x55f   : > { %5572 = vrot.lane.b32.xlu0 %v6247_v50, %s7334_s7  ;;  %s7338_s7 = smov 72  }
 0x563   : > { %5582 = vrot.lane.b32.xlu0 %v6247_v50, %s7352_s28 }
 0x567   : > { %1339 = vrot.lane.b32.xlu0 %v6269_v61, %s7350_s29 }
 0x56b   : > { %1600 = vrot.lane.b32.xlu0 %v6249_v52, %s7352_s28  ;;  %s7411_s28 = smov 80  }
 0x56f   : > { %1590 = vrot.lane.b32.xlu0 %v1090_v60, %s7348_s5 }
 0x573   : > { %1594 = vrot.lane.b32.xlu0 %v1092_v62, %s7348_s5 }
 0x577   : > { %1843 = vrot.lane.b32.xlu0 %v1090_v60, %s7336_s27 }
 0x57b   : > { %1847 = vrot.lane.b32.xlu0 %v1092_v62, %s7336_s27 }
 0x582   : > { %1225 = vadd.xlane.f32.xlu1 %v1224_v24 }
 0x593   : > { %1337 = vrot.lane.b32.xlu1 %v1090_v60, %s7350_s29 }
 0x597   : > { %1341 = vrot.lane.b32.xlu1 %v1092_v62, %s7350_s29  ;;  %s7409_s29 = sld [smem:[#allocation26_spill]] }
 0x59b   : > { %5587 = vrot.lane.b32.xlu1 %v6247_v50, %s7338_s7 }
 0x59f   : > { %1592 = vrot.lane.b32.xlu1 %v6269_v61, %s7348_s5  ;;  %s7407_s5 = sld [smem:[#allocation25_spill]] }
 0x5a3   : > { %1853 = vrot.lane.b32.xlu1 %v6249_v52, %s7338_s7  ;;  %s7344_s7 = smov 48  }
 0x5a7   : > { %1845 = vrot.lane.b32.xlu1 %v6269_v61, %s7336_s27  ;;  %s7340_s27 = smov 56  }
 0x5d2   : > { %v1220_v25 = vpop.xlane.xlu1 %1219 }
 0x5d3   : > { %5658 = vrcp.f32 %v1220_v25 }
 0x5d6   : > { %v1223_v26 = vpop.xlane.xlu0 %1222  ;;  %v1238_v28 = vpop.permute.xlu1 %1237 }
 0x5d7   : > { %5660 = vrcp.f32 %v1223_v26 }
 0x5da   : > { %v5573_v27 = vpop.permute.xlu0 %5572  ;;  %v5578_v33 = vpop.permute.xlu1 %5577 }
 0x5db   : > { %v5575_v29 = vunpack.i.h.bf16 %v5573_v27  ;;  %v5574_v30 = vunpack.i.l.bf16 %v5573_v27  ;;  %v5580_v36 = vunpack.i.h.bf16 %v5578_v33  ;;  %v5579_v37 = vunpack.i.l.bf16 %v5578_v33 }
 0x5dd   : > { %v5348_v31 = vpack.c.bf16 %v5575_v29, %v5574_v30  ;;  %v5659_v32 = vpop.eup %5658  ;;  %v5351_v39 = vpack.c.bf16 %v5580_v36, %v5579_v37 }
 0x5de   : > { %v1230_v34 = vmul.f32 %v5659_v32, %v5653_v15  ;;  %v1348_v40 = vpop.permute.xlu1 %1347  ;;  %v5583_v42 = vpop.permute.xlu0 %5582 }
 0x5df   : > { %5349 = vmatpush3.bf16.msra.mxu1 %v5348_v31  ;;  %v5585_v46 = vunpack.i.h.bf16 %v5583_v42  ;;  %v5584_v47 = vunpack.i.l.bf16 %v5583_v42 }
 0x5e0   : > { %4872 = vmatprep.subr.mxu1 %v5889_v18 }
 0x5e1   : > { %v5661_v35 = vpop.eup %5660  ;;  %v5358_v49 = vpack.c.bf16 %v5585_v46, %v5584_v47 }
 0x5e2   : > { %v1231_v38 = vmul.f32 %v5661_v35, %v5655_v17  ;;  %v1340_v51 = vpop.permute.xlu0 %1339 }
 0x5e3   : > { %4873 = vmatpush3.msk.msra.mxu1 %vm1250_vm8, %v1238_v28 }
 0x5e4   : > { %4875 = vmatmul.mubr.msk.f32.vlgmr.msra.gmra.mrb[12].mxu1 %vm1198_vm6, %v1230_v34  ;;  %5350 = vmatprep.subr.bf16.mxu1 %v5887_v3 }
 0x5e5   : > { %4877 = vmatprep.mubr.msk.f32.mxu1 %vm5888_vm3, %v5889_v18 }
 0x5e6   : > { %v1601_v54 = vpop.permute.xlu0 %1600 }
 0x5e8   : > { %4878 = vmatmul.mubr.msk.f32.gmra.mrb[14].mxu1 %vm1198_vm6, %v1231_v38 }
 0x5e9   : > { %4880 = vmatprep.mubr.msk.f32.mxu1 %vm5888_vm3, %v5889_v18 }
 0x5ea   : > { %5353 = vmatpush3.bf16.xpose.msk.msra.mxu1 %vm6257_vm5, %v5351_v39  ;;  %v1591_v58 = vpop.permute.xlu0 %1590 }
 0x5eb   : > { %4887 = vmatprep.subr.mxu1 %v5889_v18 }
 0x5ee   : > { %v1595_v61 = vpop.permute.xlu0 %1594 }
 0x5f2   : > { %4888 = vmatpush3.xpose.msk.msra.mxu1 %vm1102_vm4, %v1348_v40  ;;  %v1844_v63 = vpop.permute.xlu0 %1843 }
 0x5f3   : > { %5357 = vmatprep.subr.bf16.mxu1 %v5887_v3 }
 0x5f6   : > { %v1848_v1 = vpop.permute.xlu0 %1847 }
 0x60f   : > { %v1226_v41 = vpop.xlane.xlu1 %1225 }
 0x610   : > { %5662 = vrcp.f32 %v1226_v41 }
 0x613   : > { %v1338_v43 = vpop.permute.xlu1 %1337 }
 0x617   : > { %v1342_v48 = vpop.permute.xlu1 %1341 }
 0x61a   : > { %v5663_v44 = vpop.eup %5662 }
 0x61b   : > { %v1232_v45 = vmul.f32 %v5663_v44, %v5657_v23  ;;  %v5588_v53 = vpop.permute.xlu1 %5587 }
 0x61c   : > { %v5590_v55 = vunpack.i.h.bf16 %v5588_v53  ;;  %v5589_v56 = vunpack.i.l.bf16 %v5588_v53 }
 0x61d   : > { %4881 = vmatmul.mubr.msk.f32.gmra.mrb[16].mxu1 %vm1198_vm6, %v1232_v45 }
 0x61e   : > { %4889 = vmatprep.mubr.msk.f32.mxu1 %vm5888_vm3, %v5889_v18  ;;  %v5365_v59 = vpack.c.bf16 %v5590_v55, %v5589_v56 }
 0x61f   : > { %v1593_v60 = vpop.permute.xlu1 %1592 }
 0x621   : > { %4890 = vmatmul.mubr.msk.f32.vlgmr.msra.gmra.mrb[18].mxu1 %vm1102_vm4, %v1338_v43 }
 0x622   : > { %5360 = vmatpush3.bf16.xpose.msk.msra.mxu1 %vm6257_vm5, %v5358_v49  ;;  %4892 = vmatprep.mubr.msk.f32.mxu1 %vm5888_vm3, %v5889_v18 }
 0x623   : > { %4917 = vmatprep.subr.mxu1 %v5889_v18  ;;  %v1854_v62 = vpop.permute.xlu1 %1853 }
 0x625   : > { %4893 = vmatmul.mubr.msk.f32.gmra.mrb[20].mxu1 %vm1102_vm4, %v1340_v51 }
 0x626   : > { %4895 = vmatprep.mubr.msk.f32.mxu1 %vm5888_vm3, %v5889_v18 }
 0x627   : > { %v1846_v0 = vpop.permute.xlu1 %1845 }
 0x629   : > { %4896 = vmatmul.mubr.msk.f32.gmra.mrb[22].mxu1 %vm1102_vm4, %v1342_v48 }
 0x62a   : > { %4918 = vmatpush3.xpose.msk.msra.mxu1 %vm1102_vm4, %v1601_v54  ;;  %4919 = vmatprep.mubr.msk.f32.mxu1 %vm5888_vm3, %v5889_v18 }
 0x62b   : > { %5364 = vmatprep.subr.bf16.mxu1 %v5887_v3 }
 0x62d   : > { %4920 = vmatmul.mubr.msk.f32.vlgmr.msra.gmra.mrb[24].mxu1 %vm1102_vm4, %v1591_v58 }
 0x62e   : > { %5367 = vmatpush3.bf16.xpose.msk.msra.mxu1 %vm6257_vm5, %v5365_v59  ;;  %4922 = vmatprep.mubr.msk.f32.mxu1 %vm5888_vm3, %v5889_v18 }
 0x62f   : > { %4947 = vmatprep.subr.mxu1 %v5889_v18 }
 0x631   : > { %4923 = vmatmul.mubr.msk.f32.gmra.mrb[26].mxu1 %vm1102_vm4, %v1593_v60 }
 0x632   : > { %4925 = vmatprep.mubr.msk.f32.mxu1 %vm5888_vm3, %v5889_v18 }
 0x635   : > { %4926 = vmatmul.mubr.msk.f32.gmra.mrb[28].mxu1 %vm1102_vm4, %v1595_v61 }
 0x636   : > { %4948 = vmatpush3.xpose.msk.msra.mxu1 %vm1102_vm4, %v1854_v62  ;;  %4949 = vmatprep.mubr.msk.f32.mxu1 %vm5888_vm3, %v5889_v18 }
 0x637   : > { %5371 = vmatprep.subr.bf16.mxu1 %v5887_v3 }
 0x639   : > { %4950 = vmatmul.mubr.msk.f32.vlgmr.msra.gmra.mrb[30].mxu1 %vm1102_vm4, %v1844_v63 }
 0x63a   : > { %4952 = vmatprep.mubr.msk.f32.mxu1 %vm5888_vm3, %v5889_v18 }
 0x63d   : > { %4953 = vmatmul.mubr.msk.f32.gmra.mrb[32].mxu1 %vm1102_vm4, %v1846_v0 }
 0x63e   : > { %4955 = vmatprep.mubr.msk.f32.mxu1 %vm5888_vm3, %v5889_v18 }
 0x641   : > { %4956 = vmatmul.mubr.msk.f32.gmra.mrb[34].mxu1 %vm1102_vm4, %v1848_v1 }
 0x642   : > { %4981 = vmatprep.mubr.msk.f32.mxu1 %vm5888_vm3, %v5889_v18 }
 0x6b7   : > { %v1319_v2 = vpop.f32.mrb[12].mxu1 }
 0x6b8   : > { %1333 = vst.msk [vmem:[#allocation3] sm:$0xff] %vm1102_vm4, %v1319_v2  ;;  %v4876_v4 = vpop.f32.mrb[13].mxu1 }
 0x6bb   : > { %v1324_v5 = vpop.f32.mrb[14].mxu1 }
 0x6bc   : > { %1334 = vst.msk [vmem:[#allocation3 + $0x8] sm:$0xff] %vm1102_vm4, %v1324_v5  ;;  %v4879_v6 = vpop.f32.mrb[15].mxu1 }
 0x6f0   : > { %v1329_v7 = vpop.f32.mrb[16].mxu1 }
 0x6f1   : > { %1336 = vst.msk [vmem:[#allocation3 + $0x10] sm:$0x1] %vm1335_vm9, %v1329_v7  ;;  %v4882_v8 = vpop.f32.mrb[17].mxu1 }
 0x6f4   : > { %v1427_v9 = vpop.f32.mrb[18].mxu1 }
 0x6f5   : > { %v4891_v10 = vpop.f32.mrb[19].mxu1  ;;  %v1441_v11 = vsel %vm1198_vm6, %v1427_v9, -inf }
 0x6f6   : > { %1442 = vmax.xlane.f32.xlu1 %v1441_v11 }
 0x6f8   : > { %v1432_v12 = vpop.f32.mrb[20].mxu1 }
 0x6f9   : > { %v4894_v13 = vpop.f32.mrb[21].mxu1  ;;  %v1444_v14 = vsel %vm1198_vm6, %v1432_v12, -inf }
 0x6fa   : > { %1445 = vmax.xlane.f32.xlu0 %v1444_v14 }
 0x6fc   : > { %v1437_v15 = vpop.f32.mrb[22].mxu1 }
 0x6fd   : > { %v4897_v16 = vpop.f32.mrb[23].mxu1  ;;  %v1447_v17 = vsel %vm1205_vm7, %v1437_v15, -inf }
 0x6fe   : > { %1448 = vmax.xlane.f32.xlu0 %v1447_v17 }
 0x700   : > { %v1680_v19 = vpop.f32.mrb[24].mxu1 }
 0x701   : > { %v4921_v20 = vpop.f32.mrb[25].mxu1  ;;  %v1694_v21 = vsel %vm1198_vm6, %v1680_v19, -inf }
 0x702   : > { %1695 = vmax.xlane.f32.xlu0 %v1694_v21 }
 0x704   : > { %v1685_v22 = vpop.f32.mrb[26].mxu1 }
 0x705   : > { %v4924_v23 = vpop.f32.mrb[27].mxu1  ;;  %v1697_v24 = vsel %vm1198_vm6, %v1685_v22, -inf }
 0x706   : > { %1698 = vmax.xlane.f32.xlu1 %v1697_v24 }
 0x708   : > { %v1690_v25 = vpop.f32.mrb[28].mxu1 }
 0x709   : > { %v4927_v26 = vpop.f32.mrb[29].mxu1  ;;  %v1700_v27 = vsel %vm1205_vm7, %v1690_v25, -inf }
 0x70a   : > { %1701 = vmax.xlane.f32.xlu0 %v1700_v27 }
 0x70c   : > { %v1933_v28 = vpop.f32.mrb[30].mxu1 }
 0x70d   : > { %v4951_v29 = vpop.f32.mrb[31].mxu1  ;;  %v1947_v30 = vsel %vm1198_vm6, %v1933_v28, -inf }
 0x70e   : > { %1948 = vmax.xlane.f32.xlu1 %v1947_v30 }
 0x710   : > { %v1938_v31 = vpop.f32.mrb[32].mxu1 }
 0x711   : > { %v4954_v32 = vpop.f32.mrb[33].mxu1  ;;  %v1950_v33 = vsel %vm1198_vm6, %v1938_v31, -inf }
 0x712   : > { %1951 = vmax.xlane.f32.xlu0 %v1950_v33 }
 0x714   : > { %v6378_v34 = vpop.f32.mrb[34].mxu1 }
 0x715   : > { %v4957_v35 = vpop.f32.mrb[35].mxu1  ;;  %v1953_v36 = vsel %vm1205_vm7, %v6378_v34, -inf }
 0x716   : > { %1954 = vmax.xlane.f32.xlu1 %v1953_v36 }
 0x727   : > { %5592 = vrot.lane.b32.xlu1 %v6247_v50, %s7340_s27 }
 0x728   : > { %1478 = vrot.lane.b32.xlu0 %v6249_v52, %s7340_s27  ;;  %s7342_s27 = smov 40  }
 0x72c   : > { %5597 = vrot.lane.b32.xlu0 %v6247_v50, %s7344_s7 }
 0x783   : > { %v1443_v37 = vpop.xlane.xlu1 %1442 }
 0x784   : > { %v1450_v38 = vsub.f32 %v1427_v9, %v1443_v37 }
 0x786   : > { %v1453_v39 = vmul.f32 1.442695, %v1450_v38 }
 0x787   : > { %v1446_v40 = vpop.xlane.xlu0 %1445 }
 0x788   : > { %5664 = vpow2.f32 %v1453_v39  ;;  %v1451_v41 = vsub.f32 %v1432_v12, %v1446_v40 }
 0x78a   : > { %v1455_v42 = vmul.f32 1.442695, %v1451_v41 }
 0x78b   : > { %v1449_v43 = vpop.xlane.xlu0 %1448 }
 0x78c   : > { %5666 = vpow2.f32 %v1455_v42  ;;  %v1452_v44 = vsub.f32 %v1437_v15, %v1449_v43 }
 0x78e   : > { %v1457_v45 = vmul.f32 1.442695, %v1452_v44 }
 0x78f   : > { %v1696_v46 = vpop.xlane.xlu0 %1695 }
 0x790   : > { %5668 = vpow2.f32 %v1457_v45  ;;  %v1703_v47 = vsub.f32 %v1680_v19, %v1696_v46 }
 0x792   : > { %v6388_v48 = vpop.eup %5664  ;;  %v1706_v49 = vmul.f32 1.442695, %v1703_v47 }
 0x793   : > { %v1699_v51 = vpop.xlane.xlu1 %1698  ;;  %v1459_v53 = vsel %vm1198_vm6, %v6388_v48, 0.0 }
 0x794   : > { %5670 = vpow2.f32 %v1706_v49  ;;  %v1704_v54 = vsub.f32 %v1685_v22, %v1699_v51  ;;  %1460 = vadd.xlane.f32.xlu0 %v1459_v53 }
 0x796   : > { %v6392_v55 = vpop.eup %5666  ;;  %v1708_v56 = vmul.f32 1.442695, %v1704_v54 }
 0x797   : > { %v1702_v58 = vpop.xlane.xlu0 %1701  ;;  %v1462_v59 = vsel %vm1198_vm6, %v6392_v55, 0.0 }
 0x798   : > { %5672 = vpow2.f32 %v1708_v56  ;;  %v1705_v60 = vsub.f32 %v1690_v25, %v1702_v58  ;;  %1463 = vadd.xlane.f32.xlu1 %v1462_v59 }
 0x79a   : > { %v6396_v61 = vpop.eup %5668  ;;  %v1710_v62 = vmul.f32 1.442695, %v1705_v60 }
 0x79b   : > { %v1949_v63 = vpop.xlane.xlu1 %1948  ;;  %v1465_v0 = vsel %vm1205_vm7, %v6396_v61, 0.0 }
 0x79c   : > { %5674 = vpow2.f32 %v1710_v62  ;;  %v1956_v1 = vsub.f32 %v1933_v28, %v1949_v63  ;;  %1466 = vadd.xlane.f32.xlu0 %v1465_v0 }
 0x79e   : > { %v6400_v2 = vpop.eup %5670  ;;  %v1959_v4 = vmul.f32 1.442695, %v1956_v1 }
 0x79f   : > { %v1952_v5 = vpop.xlane.xlu0 %1951  ;;  %v1712_v6 = vsel %vm1198_vm6, %v6400_v2, 0.0 }
 0x7a0   : > { %5676 = vpow2.f32 %v1959_v4  ;;  %v1957_v7 = vsub.f32 %v1938_v31, %v1952_v5  ;;  %1713 = vadd.xlane.f32.xlu1 %v1712_v6 }
 0x7a2   : > { %v6404_v8 = vpop.eup %5672  ;;  %v1961_v9 = vmul.f32 1.442695, %v1957_v7 }
 0x7a3   : > { %v1955_v10 = vpop.xlane.xlu1 %1954  ;;  %v1715_v11 = vsel %vm1198_vm6, %v6404_v8, 0.0  ;;  %v1479_v23 = vpop.permute.xlu0 %1478 }
 0x7a4   : > { %5678 = vpow2.f32 %v1961_v9  ;;  %1716 = vadd.xlane.f32.xlu0 %v1715_v11  ;;  %v1958_v24 = vsub.f32 %v6378_v34, %v1955_v10  ;;  %v2099_v10 = vld [vmem:[%s7407_s5] sm:$0xff]  ;;  %v2100_v11 = vld [vmem:[%s7407_s5 + $0x8] sm:$0xff] }
 0x7a6   : > { %v6408_v12 = vpop.eup %5674  ;;  %v1963_v25 = vmul.f32 1.442695, %v1958_v24 }
 0x7a7   : > { %v5593_v13 = vpop.permute.xlu1 %5592  ;;  %v1718_v14 = vsel %vm1205_vm7, %v6408_v12, 0.0  ;;  %v5598_v28 = vpop.permute.xlu0 %5597 }
 0x7a8   : > { %v5595_v15 = vunpack.i.h.bf16 %v5593_v13  ;;  %1719 = vadd.xlane.f32.xlu0 %v1718_v14  ;;  %v5594_v16 = vunpack.i.l.bf16 %v5593_v13  ;;  %5680 = vpow2.f32 %v1963_v25  ;;  %v5600_v31 = vunpack.i.h.bf16 %v5598_v28 }
 0x7a9   : > { %v5599_v32 = vunpack.i.l.bf16 %v5598_v28  ;;  %v5372_v13 = vpack.c.bf16 %v2100_v11, %v2099_v10  ;;  %v2260_v10 = vld [vmem:[%s7305_s13 + $0x10] sm:$0xff]  ;;  %v2261_v11 = vld [vmem:[%s7305_s13 + $0x18] sm:$0xff] }
 0x7aa   : > { %v6412_v17 = vpop.eup %5676  ;;  %v5355_v19 = vpack.c.bf16 %v5595_v15, %v5594_v16  ;;  %v2101_v15 = vld [vmem:[%s7407_s5 + $0x10] sm:$0xff]  ;;  %v2102_v16 = vld [vmem:[%s7407_s5 + $0x18] sm:$0xff] }
 0x7ab   : > { %v1965_v20 = vsel %vm1198_vm6, %v6412_v17, 0.0  ;;  %v5362_v35 = vpack.c.bf16 %v5600_v31, %v5599_v32  ;;  %5373 = vmatpush3.bf16.msra.mxu1 %v5372_v13 }
 0x7ac   : > { %1966 = vadd.xlane.f32.xlu0 %v1965_v20  ;;  %5356 = vmatpush3.bf16.msra.mxu0 %v5355_v19  ;;  %v5375_v19 = vpack.c.bf16 %v2102_v16, %v2101_v15 }
 0x7ad   : > { %4902 = vmatprep.subr.mxu0 %v5889_v18  ;;  %5374 = vmatprep.subr.bf16.mxu1 %v5887_v3 }
 0x7ae   : > { %v6416_v21 = vpop.eup %5678 }
 0x7af   : > { %v1968_v22 = vsel %vm1198_vm6, %v6416_v21, 0.0  ;;  %5376 = vmatpush3.bf16.msra.mxu1 %v5375_v19  ;;  %v2383_v19 = vld [vmem:[%s7307_s15] sm:$0xff] }
 0x7b0   : > { %1969 = vadd.xlane.f32.xlu1 %v1968_v22  ;;  %4903 = vmatpush3.msk.msra.mxu0 %vm1250_vm8, %v1479_v23 }
 0x7b1   : > { %5361 = vmatprep.subr.bf16.mxu0 %v5887_v3  ;;  %5383 = vmatprep.subr.bf16.mxu1 %v5887_v3 }
 0x7b2   : > { %v6430_v26 = vpop.eup %5680 }
 0x7b3   : > { %v1971_v27 = vsel %vm1205_vm7, %v6430_v26, 0.0 }
 0x7c1   : > { %5602 = vrot.lane.b32.xlu1 %v6247_v50, %s7342_s27 }
 0x7c2   : > { %1731 = vrot.lane.b32.xlu0 %v6249_v52, %s7344_s7  ;;  %s7413_s7 = smov 112  }
 0x7c5   : > { %1984 = vrot.lane.b32.xlu1 %v6249_v52, %s7342_s27  ;;  %s7356_s27 = smov 8  }
 0x7e1   : > { %1972 = vadd.xlane.f32.xlu0 %v1971_v27 }
 0x821   : > { %v1461_v29 = vpop.xlane.xlu0 %1460 }
 0x822   : > { %5682 = vrcp.f32 %v1461_v29 }
 0x825   : > { %v1464_v50 = vpop.xlane.xlu1 %1463 }
 0x826   : > { %5684 = vrcp.f32 %v1464_v50 }
 0x829   : > { %v1467_v30 = vpop.xlane.xlu0 %1466 }
 0x82a   : > { %5686 = vrcp.f32 %v1467_v30 }
 0x82c   : > { %v5683_v52 = vpop.eup %5682 }
 0x82d   : > { %v1471_v33 = vmul.f32 %v5683_v52, %v6388_v48  ;;  %v1714_v34 = vpop.xlane.xlu1 %1713 }
 0x82e   : > { %5688 = vrcp.f32 %v1714_v34 }
 0x82f   : > { %4905 = vmatmul.mubr.msk.f32.vlgmr.msra.gmra.mrb[4].mxu0 %vm1198_vm6, %v1471_v33 }
 0x830   : > { %v5685_v36 = vpop.eup %5684  ;;  %5363 = vmatpush3.bf16.msra.mxu0 %v5362_v35  ;;  %4907 = vmatprep.mubr.msk.f32.mxu0 %vm5888_vm3, %v5889_v18 }
 0x831   : > { %v1717_v37 = vpop.xlane.xlu0 %1716  ;;  %v1472_v38 = vmul.f32 %v5685_v36, %v6392_v55  ;;  %4932 = vmatprep.subr.mxu0 %v5889_v18 }
 0x832   : > { %5690 = vrcp.f32 %v1717_v37 }
 0x833   : > { %4908 = vmatmul.mubr.msk.f32.gmra.mrb[6].mxu0 %vm1198_vm6, %v1472_v38 }
 0x834   : > { %v5687_v39 = vpop.eup %5686  ;;  %4910 = vmatprep.mubr.msk.f32.mxu0 %vm5888_vm3, %v5889_v18 }
 0x835   : > { %v1720_v40 = vpop.xlane.xlu0 %1719  ;;  %v1473_v41 = vmul.f32 %v5687_v39, %v6396_v61  ;;  %v4538_v39 = vld [vmem:[%s7409_s29] ss:$0 sm:$0xff] }
 0x836   : > { %5692 = vrcp.f32 %v1720_v40  ;;  %v5788_v40 = vld [vmem:[#allocation2] sm:$0xff] }
 0x837   : > { %4911 = vmatmul.mubr.msk.f32.gmra.mrb[8].mxu0 %vm1198_vm6, %v1473_v41 }
 0x838   : > { %4934 = vmatprep.mubr.msk.f32.mxu0 %vm5888_vm3, %v5889_v18  ;;  %v5689_v43 = vpop.eup %5688 }
 0x839   : > { %v1967_v42 = vpop.xlane.xlu0 %1966  ;;  %v1724_v44 = vmul.f32 %v5689_v43, %v6400_v2 }
 0x83a   : > { %5694 = vrcp.f32 %v1967_v42 }
 0x83c   : > { %v5691_v47 = vpop.eup %5690 }
 0x83d   : > { %v1732_v45 = vpop.permute.xlu0 %1731  ;;  %v1970_v46 = vpop.xlane.xlu1 %1969  ;;  %v1725_v49 = vmul.f32 %v5691_v47, %v6404_v8 }
 0x83e   : > { %4933 = vmatpush3.msk.msra.mxu0 %vm1250_vm8, %v1732_v45  ;;  %5696 = vrcp.f32 %v1970_v46  ;;  %v5789_v45 = vld [vmem:[#allocation2 + $0x8] sm:$0xff] }
 0x83f   : > { %4935 = vmatmul.mubr.msk.f32.vlgmr.msra.gmra.mrb[10].mxu0 %vm1198_vm6, %v1724_v44  ;;  %5368 = vmatprep.subr.bf16.mxu0 %v5887_v3 }
 0x840   : > { %4937 = vmatprep.mubr.msk.f32.mxu0 %vm5888_vm3, %v5889_v18  ;;  %v5693_v51 = vpop.eup %5692 }
 0x841   : > { %v5603_v48 = vpop.permute.xlu1 %5602  ;;  %v1726_v56 = vmul.f32 %v5693_v51, %v6408_v12 }
 0x842   : > { %v5605_v53 = vunpack.i.h.bf16 %v5603_v48  ;;  %v5604_v54 = vunpack.i.l.bf16 %v5603_v48 }
 0x843   : > { %4938 = vmatmul.mubr.msk.f32.gmra.mrb[12].mxu0 %vm1198_vm6, %v1725_v49 }
 0x844   : > { %v5369_v55 = vpack.c.bf16 %v5605_v53, %v5604_v54  ;;  %4940 = vmatprep.mubr.msk.f32.mxu0 %vm5888_vm3, %v5889_v18  ;;  %v5695_v58 = vpop.eup %5694  ;;  %v5790_v54 = vld [vmem:[#allocation2 + $0x10] sm:$0x1] }
 0x845   : > { %v1977_v59 = vmul.f32 %v5695_v58, %v6412_v17  ;;  %v1985_v60 = vpop.permute.xlu1 %1984 }
 0x846   : > { %5370 = vmatpush3.bf16.msra.mxu0 %v5369_v55 }
 0x847   : > { %4941 = vmatmul.mubr.msk.f32.gmra.mrb[14].mxu0 %vm1198_vm6, %v1726_v56  ;;  %4962 = vmatprep.subr.mxu0 %v5889_v18 }
 0x848   : > { %4964 = vmatprep.mubr.msk.f32.mxu0 %vm5888_vm3, %v5889_v18  ;;  %v5697_v61 = vpop.eup %5696 }
 0x849   : > { %v1978_v62 = vmul.f32 %v5697_v61, %v6416_v21 }
 0x84a   : > { %4963 = vmatpush3.msk.msra.mxu0 %vm1250_vm8, %v1985_v60 }
 0x84b   : > { %4965 = vmatmul.mubr.msk.f32.vlgmr.msra.gmra.mrb[16].mxu0 %vm1198_vm6, %v1977_v59  ;;  %5377 = vmatprep.subr.bf16.mxu0 %v5887_v3 }
 0x84c   : > { %4967 = vmatprep.mubr.msk.f32.mxu0 %vm5888_vm3, %v5889_v18 }
 0x84f   : > { %4968 = vmatmul.mubr.msk.f32.gmra.mrb[18].mxu0 %vm1198_vm6, %v1978_v62 }
 0x850   : > { %4970 = vmatprep.mubr.msk.f32.mxu0 %vm5888_vm3, %v5889_v18 }
 0x86e   : > { %v1973_v63 = vpop.xlane.xlu0 %1972 }
 0x86f   : > { %5698 = vrcp.f32 %v1973_v63 }
 0x879   : > { %v5699_v0 = vpop.eup %5698 }
 0x87a   : > { %v1979_v1 = vmul.f32 %v5699_v0, %v6430_v26 }
 0x87c   : > { %4971 = vmatmul.mubr.msk.f32.gmra.mrb[20].mxu0 %vm1198_vm6, %v1979_v1 }
 0x87d   : > { %4998 = vmatprep.mubr.msk.f32.mxu0 %vm5888_vm3, %v5889_v18 }
 0x902   : > { %v1559_v2 = vpop.f32.mrb[4].mxu0 }
 0x903   : > { %1576 = vrot.lane.b32.xlu0 %v1559_v2, %s7356_s27  ;;  %v4906_v4 = vpop.f32.mrb[5].mxu0 }
 0x906   : > { %v1564_v5 = vpop.f32.mrb[6].mxu0 }
 0x907   : > { %1578 = vrot.lane.b32.xlu1 %v1564_v5, %s7356_s27  ;;  %v4909_v6 = vpop.f32.mrb[7].mxu0  ;;  %s7412_s27 = smov 120  }
 0x90a   : > { %v1569_v7 = vpop.f32.mrb[8].mxu0 }
 0x90b   : > { %v4912_v8 = vpop.f32.mrb[9].mxu0 }
 0x90c   : > { %v2259_v8 = vld [vmem:[%s7305_s13 + $0x8] sm:$0xff] }
 0x912   : > { %v1812_v9 = vpop.f32.mrb[10].mxu0 }
 0x913   : > { %1829 = vrot.lane.b32.xlu1 %v1812_v9, %s7362_s30  ;;  %v4936_v12 = vpop.f32.mrb[11].mxu0 }
 0x914   : > { %v5381_v12 = vpack.c.bf16 %v2261_v11, %v2260_v10 }
 0x916   : > { %v1817_v14 = vpop.f32.mrb[12].mxu0 }
 0x917   : > { %1831 = vrot.lane.b32.xlu1 %v1817_v14, %s7362_s30  ;;  %v4939_v17 = vpop.f32.mrb[13].mxu0 }
 0x91a   : > { %v1822_v20 = vpop.f32.mrb[14].mxu0 }
 0x91b   : > { %1833 = vrot.lane.b32.xlu0 %v1822_v20, %s7362_s30  ;;  %v4942_v21 = vpop.f32.mrb[15].mxu0  ;;  %v2384_v20 = vld [vmem:[%s7307_s15 + $0x8] sm:$0xff]  ;;  %s7414_s30 = smov 88  }
 0x91c   : > { %v5384_v21 = vpack.c.bf16 %v2384_v20, %v2383_v19 }
 0x91e   : > { %v2065_v22 = vpop.f32.mrb[16].mxu0 }
 0x91f   : > { %2082 = vrot.lane.b32.xlu1 %v2065_v22, %s7360_s0  ;;  %v4966_v23 = vpop.f32.mrb[17].mxu0 }
 0x922   : > { %v2070_v24 = vpop.f32.mrb[18].mxu0 }
 0x923   : > { %2084 = vrot.lane.b32.xlu1 %v2070_v24, %s7360_s0  ;;  %v4969_v25 = vpop.f32.mrb[19].mxu0 }
 0x927   : > { %1580 = vrot.lane.b32.xlu1 %v1569_v7, %s7408_s1  ;;  %v2258_v7 = vld [vmem:[%s7305_s13] sm:$0xff] }
 0x928   : > { %v5378_v9 = vpack.c.bf16 %v2259_v8, %v2258_v7  ;;  %v4541_v7 = vld [vmem:[%s7306_s14] ss:$0 sm:$0xff] }
 0x92a   : > { %5379 = vmatpush3.bf16.msra.mxu0 %v5378_v9 }
 0x92b   : > { %5380 = vmatprep.subr.bf16.mxu0 %v5887_v3 }
 0x92e   : > { %5382 = vmatpush3.bf16.msra.mxu0 %v5381_v12 }
 0x92f   : > { %5407 = vmatprep.subr.bf16.mxu0 %v5887_v3 }
 0x94f   : > { %v2075_v26 = vpop.f32.mrb[20].mxu0 }
 0x950   : > { %2086 = vrot.lane.b32.xlu1 %v2075_v26, %s7360_s0  ;;  %v4972_v27 = vpop.f32.mrb[21].mxu0  ;;  %s7415_s0 = smov 64  }
 0x975   : > { %v1577_v28 = vpop.permute.xlu0 %1576 }
 0x976   : > { %1586 = vst.msk [vmem:[#allocation3] sm:$0xff] %vm1585_vm10, %v1577_v28 }
 0x979   : > { %v1579_v29 = vpop.permute.xlu1 %1578 }
 0x97a   : > { %1587 = vst.msk [vmem:[#allocation3 + $0x8] sm:$0xff] %vm1585_vm10, %v1579_v29  ;;  %v4539_v29 = vld [vmem:[%s7303_s11] ss:$0 sm:$0xff] }
 0x985   : > { %v1830_v50 = vpop.permute.xlu1 %1829 }
 0x986   : > { %1839 = vst.msk [vmem:[#allocation3] sm:$0xff] %vm1838_vm11, %v1830_v50 }
 0x989   : > { %v1832_v30 = vpop.permute.xlu1 %1831 }
 0x98a   : > { %1840 = vst.msk [vmem:[#allocation3 + $0x8] sm:$0xff] %vm1838_vm11, %v1832_v30  ;;  %v4540_v30 = vld [vmem:[%s7304_s12] ss:$0 sm:$0xff] }
 0x98d   : > { %v1834_v34 = vpop.permute.xlu0 %1833 }
 0x991   : > { %v2083_v31 = vpop.permute.xlu1 %2082 }
 0x992   : > { %2092 = vst.msk [vmem:[#allocation3] sm:$0xff] %vm2091_vm12, %v2083_v31 }
 0x995   : > { %v2085_v32 = vpop.permute.xlu1 %2084 }
 0x996   : > { %2093 = vst.msk [vmem:[#allocation3 + $0x8] sm:$0xff] %vm2091_vm12, %v2085_v32 }
 0x999   : > { %v1581_v52 = vpop.permute.xlu1 %1580  ;;  %v2096_v33 = vld [vmem:[#allocation3] sm:$0xff] }
 0x99a   : > { %1589 = vst.msk [vmem:[#allocation3 + $0x10] sm:$0x1] %vm1588_vm13, %v1581_v52  ;;  %4982 = vmatmul.mubr.msk.f32.vlgmr.msra.gmra.mrb[36].mxu1 %vm930_vm2, %v2096_v33 }
 0x99b   : > { %4984 = vmatprep.mubr.msk.f32.mxu1 %vm5888_vm3, %v5889_v18  ;;  %1842 = vst.msk [vmem:[#allocation3 + $0x10] sm:$0x1] %vm1841_vm14, %v1834_v34  ;;  %5385 = vmatpush3.bf16.msra.mxu1 %v5384_v21 }
 0x99c   : > { %5386 = vmatprep.subr.bf16.mxu1 %v5887_v3 }
 0x99d   : > { %v2097_v35 = vld [vmem:[#allocation3 + $0x8] sm:$0xff] }
 0x99e   : > { %4985 = vmatmul.mubr.msk.f32.gmra.mrb[38].mxu1 %vm930_vm2, %v2097_v35 }
 0x99f   : > { %4987 = vmatprep.mubr.msk.f32.mxu1 %vm5888_vm3, %v5889_v18 }
 0x9c2   : > { %v2087_v36 = vpop.permute.xlu1 %2086 }
 0x9c3   : > { %2095 = vst.msk [vmem:[#allocation3 + $0x10] sm:$0x1] %vm2094_vm15, %v2087_v36 }
 0x9ca   : > { %v2098_v37 = vld [vmem:[#allocation3 + $0x10] sm:$0x1] }
 0x9cb   : > { %4988 = vmatmul.mubr.msk.f32.gmra.mrb[40].mxu1 %vm930_vm2, %v2098_v37 }
 0x9cc   : > { %5039 = vmatprep.mubr.msk.f32.mxu1 %vm5888_vm3, %v5889_v18 }
 0xa6d   : > { %v2178_v38 = vpop.f32.mrb[36].mxu1 }
 0xa6e   : > { %v2192_v41 = vadd.f32 %v5788_v40, %v2178_v38  ;;  %v4983_v42 = vpop.f32.mrb[37].mxu1 }
 0xa70   : > { %v6520_v43 = vadd.f32 %v4538_v39, %v2192_v41 }
 0xa71   : > { %v2183_v44 = vpop.f32.mrb[38].mxu1 }
 0xa72   : > { %v2193_v46 = vadd.f32 %v5789_v45, %v2183_v44  ;;  %v4986_v47 = vpop.f32.mrb[39].mxu1  ;;  %v2205_v48 = vsel %vm930_vm2, %v6520_v43, 0.0  ;;  %v2385_v44 = vld [vmem:[%s7307_s15 + $0x10] sm:$0xff]  ;;  %v2386_v45 = vld [vmem:[%s7307_s15 + $0x18] sm:$0xff] }
 0xa73   : > { %2206 = vadd.xlane.f32.xlu0 %v2205_v48  ;;  %v2387_v47 = vld [vmem:[%s7307_s15 + $0x20] sm:$0xff]  ;;  %v2388_v48 = vld [vmem:[%s7307_s15 + $0x28] sm:$0xff] }
 0xa74   : > { %v6524_v49 = vadd.f32 %v4538_v39, %v2193_v46  ;;  %v5387_v46 = vpack.c.bf16 %v2386_v45, %v2385_v44  ;;  %v4545_v45 = vld [vmem:[%s7308_s16] ss:$0 sm:$0xff] }
 0xa76   : > { %v2208_v51 = vsel %vm930_vm2, %v6524_v49, 0.0  ;;  %5388 = vmatpush3.bf16.msra.mxu1 %v5387_v46 }
 0xa77   : > { %2209 = vadd.xlane.f32.xlu1 %v2208_v51  ;;  %5389 = vmatprep.subr.bf16.mxu1 %v5887_v3  ;;  %v5390_v51 = vpack.c.bf16 %v2388_v48, %v2387_v47 }
 0xa7a   : > { %5391 = vmatpush3.bf16.msra.mxu1 %v5390_v51 }
 0xa7b   : > { %5392 = vmatprep.subr.bf16.mxu1 %v5887_v3 }
 0xa9e   : > { %v2188_v53 = vpop.f32.mrb[40].mxu1 }
 0xa9f   : > { %v2194_v55 = vadd.f32 %v5790_v54, %v2188_v53  ;;  %v4989_v56 = vpop.f32.mrb[41].mxu1  ;;  %v2389_v53 = vld [vmem:[%s7307_s15 + $0x30] sm:$0xff]  ;;  %v2390_v54 = vld [vmem:[%s7307_s15 + $0x38] sm:$0xff] }
 0xaa0   : > { %v2391_v56 = vld [vmem:[%s7307_s15 + $0x40] sm:$0xff] }
 0xaa1   : > { %v6528_v58 = vadd.f32 %v4538_v39, %v2194_v55  ;;  %v5393_v55 = vpack.c.bf16 %v2390_v54, %v2389_v53 }
 0xaa3   : > { %v2211_v59 = vsel %vm924_vm1, %v6528_v58, 0.0  ;;  %5394 = vmatpush3.bf16.msra.mxu1 %v5393_v55 }
 0xaa4   : > { %2212 = vadd.xlane.f32.xlu0 %v2211_v59  ;;  %5395 = vmatprep.subr.bf16.mxu1 %v5887_v3  ;;  %v2392_v59 = vld [vmem:[%s7307_s15 + $0x48] sm:$0xff] }
 0xb00   : > { %v2207_v60 = vpop.xlane.xlu0 %2206 }
 0xb01   : > { %v2214_v61 = vmul.f32 0.03125, %v2207_v60  ;;  %v5396_v60 = vpack.c.bf16 %v2392_v59, %v2391_v56 }
 0xb03   : > { %v2217_v62 = vsub.f32 %v6520_v43, %v2214_v61  ;;  %5397 = vmatpush3.bf16.msra.mxu1 %v5396_v60  ;;  %v2393_v61 = vld [vmem:[%s7307_s15 + $0x50] sm:$0xff] }
 0xb04   : > { %v2210_v63 = vpop.xlane.xlu1 %2209  ;;  %5398 = vmatprep.subr.bf16.mxu1 %v5887_v3 }
 0xb05   : > { %v2215_v0 = vmul.f32 0.03125, %v2210_v63  ;;  %v2220_v1 = vmul.f32 %v2217_v62, %v2217_v62 }
 0xb07   : > { %v2218_v2 = vsub.f32 %v6524_v49, %v2215_v0  ;;  %v2223_v4 = vsel %vm930_vm2, %v2220_v1, 0.0  ;;  %v2395_v0 = vld [vmem:[%s7307_s15 + $0x60] sm:$0xff]  ;;  %v2396_v1 = vld [vmem:[%s7307_s15 + $0x68] sm:$0xff] }
 0xb08   : > { %2224 = vadd.xlane.f32.xlu0 %v2223_v4  ;;  %v2397_v4 = vld [vmem:[%s7307_s15 + $0x70] sm:$0xff] }
 0xb09   : > { %v2221_v5 = vmul.f32 %v2218_v2, %v2218_v2 }
 0xb0b   : > { %v2226_v6 = vsel %vm930_vm2, %v2221_v5, 0.0  ;;  %v2398_v5 = vld [vmem:[%s7307_s15 + $0x78] sm:$0xff] }
 0xb0c   : > { %2227 = vadd.xlane.f32.xlu0 %v2226_v6  ;;  %v5405_v6 = vpack.c.bf16 %v2398_v5, %v2397_v4 }
 0xb31   : > { %v2213_v13 = vpop.xlane.xlu0 %2212 }
 0xb32   : > { %v2216_v14 = vmul.f32 0.03125, %v2213_v13 }
 0xb34   : > { %v2219_v15 = vsub.f32 %v6528_v58, %v2216_v14 }
 0xb36   : > { %v2222_v16 = vmul.f32 %v2219_v15, %v2219_v15 }
 0xb38   : > { %v2229_v17 = vsel %vm924_vm1, %v2222_v16, 0.0 }
 0xb39   : > { %2230 = vadd.xlane.f32.xlu1 %v2229_v17 }
 0xb95   : > { %v2225_v22 = vpop.xlane.xlu0 %2224 }
 0xb96   : > { %v2232_v23 = vmul.f32 0.03125, %v2225_v22 }
 0xb98   : > { %v2235_v24 = vadd.f32 1e-06, %v2232_v23 }
 0xb99   : > { %v2228_v25 = vpop.xlane.xlu0 %2227 }
 0xb9a   : > { %5700 = vrsqrt.f32 %v2235_v24  ;;  %v2233_v26 = vmul.f32 0.03125, %v2228_v25 }
 0xb9c   : > { %v2236_v27 = vadd.f32 1e-06, %v2233_v26 }
 0xb9e   : > { %5702 = vrsqrt.f32 %v2236_v27 }
 0xba4   : > { %v5701_v28 = vpop.eup %5700 }
 0xba5   : > { %v2241_v50 = vmul.f32 %v5701_v28, %v2217_v62  ;;  %v2394_v62 = vld [vmem:[%s7307_s15 + $0x58] sm:$0xff] }
 0xba6   : > { %v5399_v63 = vpack.c.bf16 %v2394_v62, %v2393_v61 }
 0xba7   : > { %v2248_v31 = vmul.f32 %v4539_v29, %v2241_v50 }
 0xba8   : > { %v5703_v32 = vpop.eup %5702  ;;  %5400 = vmatpush3.bf16.msra.mxu1 %v5399_v63 }
 0xba9   : > { %v2255_v52 = vadd.f32 %v4540_v30, %v2248_v31  ;;  %v2242_v33 = vmul.f32 %v5703_v32, %v2218_v2  ;;  %5401 = vmatprep.subr.bf16.mxu1 %v5887_v3  ;;  %v5402_v2 = vpack.c.bf16 %v2396_v1, %v2395_v0 }
 0xbab   : > { %4999 = vmatmul.mubr.msk.f32.vlgmr.msra.gmra.mrb[22].mxu0 %vm930_vm2, %v2255_v52  ;;  %v2249_v34 = vmul.f32 %v4539_v29, %v2242_v33 }
 0xbac   : > { %5001 = vmatprep.mubr.msk.f32.mxu0 %vm5888_vm3, %v5889_v18  ;;  %5403 = vmatpush3.bf16.msra.mxu1 %v5402_v2 }
 0xbad   : > { %v2256_v35 = vadd.f32 %v4540_v30, %v2249_v34  ;;  %5404 = vmatprep.subr.bf16.mxu1 %v5887_v3 }
 0xbaf   : > { %5002 = vmatmul.mubr.msk.f32.gmra.mrb[24].mxu0 %vm930_vm2, %v2256_v35 }
 0xbb0   : > { %5004 = vmatprep.mubr.msk.f32.mxu0 %vm5888_vm3, %v5889_v18  ;;  %5406 = vmatpush3.bf16.msra.mxu1 %v5405_v6 }
 0xbb1   : > { %5417 = vmatprep.subr.bf16.mxu1 %v5887_v3 }
 0xbc6   : > { %v2231_v36 = vpop.xlane.xlu1 %2230 }
 0xbc7   : > { %v2234_v37 = vmul.f32 0.03125, %v2231_v36 }
 0xbc9   : > { %v2237_v38 = vadd.f32 1e-06, %v2234_v37 }
 0xbcb   : > { %5704 = vrsqrt.f32 %v2237_v38 }
 0xbd5   : > { %v5705_v39 = vpop.eup %5704 }
 0xbd6   : > { %v2243_v40 = vmul.f32 %v5705_v39, %v2219_v15 }
 0xbd8   : > { %v2250_v41 = vmul.f32 %v4539_v29, %v2243_v40 }
 0xbda   : > { %v2257_v42 = vadd.f32 %v4540_v30, %v2250_v41 }
 0xbdc   : > { %5005 = vmatmul.mubr.msk.f32.gmra.mrb[26].mxu0 %vm930_vm2, %v2257_v42 }
 0xbdd   : > { %5056 = vmatprep.mubr.msk.f32.mxu0 %vm5888_vm3, %v5889_v18 }
 0xc7e   : > { %v2342_v8 = vpop.f32.mrb[22].mxu0 }
 0xc7f   : > { %v2343_v9 = vadd.f32 %v4541_v7, %v2342_v8  ;;  %v5000_v10 = vpop.f32.mrb[23].mxu0 }
 0xc80   : > { %v4549_v10 = vld [vmem:[%s7399_s4 + $0x28] sm:$0xff] }
 0xc81   : > { %v2356_v11 = vmul.f32 %v2343_v9, %v2343_v9 }
 0xc82   : > { %v2347_v12 = vpop.f32.mrb[24].mxu0 }
 0xc83   : > { %v2359_v13 = vmul.f32 %v2356_v11, %v2343_v9  ;;  %v2348_v14 = vadd.f32 %v4541_v7, %v2347_v12  ;;  %v5003_v15 = vpop.f32.mrb[25].mxu0  ;;  %v4550_v12 = vld [vmem:[%s7399_s4 + $0x30] sm:$0xff] }
 0xc85   : > { %v2362_v16 = vmul.f32 0.044715, %v2359_v13  ;;  %v2357_v17 = vmul.f32 %v2348_v14, %v2348_v14  ;;  %v4551_v13 = vld [vmem:[%s7399_s4 + $0x38] sm:$0xff] }
 0xc87   : > { %v2365_v19 = vadd.f32 %v2362_v16, %v2343_v9  ;;  %v2360_v20 = vmul.f32 %v2357_v17, %v2348_v14 }
 0xc89   : > { %v2368_v21 = vmul.f32 0.7978846, %v2365_v19  ;;  %v2363_v22 = vmul.f32 0.044715, %v2360_v20 }
 0xc8b   : > { %5706 = vtanh.f32 %v2368_v21  ;;  %v2366_v23 = vadd.f32 %v2363_v22, %v2348_v14 }
 0xc8d   : > { %v2369_v24 = vmul.f32 0.7978846, %v2366_v23 }
 0xc8f   : > { %5708 = vtanh.f32 %v2369_v24 }
 0xc95   : > { %v5707_v25 = vpop.eup %5706 }
 0xc96   : > { %v2374_v26 = vadd.f32 1.0, %v5707_v25 }
 0xc98   : > { %v2377_v27 = vmul.f32 0.5, %v2374_v26 }
 0xc99   : > { %v5709_v28 = vpop.eup %5708 }
 0xc9a   : > { %v2380_v29 = vmul.f32 %v2377_v27, %v2343_v9  ;;  %v2375_v50 = vadd.f32 1.0, %v5709_v28  ;;  %v4548_v9 = vld [vmem:[%s7399_s4 + $0x20] sm:$0xff] }
 0xc9b   : > { %v5408_v11 = vpack.c.bf16 %v4549_v10, %v4548_v9  ;;  %v4546_v28 = vld [vmem:[%s7401_s6 + $0x1] ss:$0 sm:$0xff] }
 0xc9c   : > { %5040 = vmatmul.mubr.f32.vlgmr.msra.gmra.mrb[42].mxu1 %v2380_v29  ;;  %v2378_v30 = vmul.f32 0.5, %v2375_v50  ;;  %v4547_v50 = vld [vmem:[%s7402_s9 + $0x1] ss:$0 sm:$0xff] }
 0xc9d   : > { %5042 = vmatprep.mubr.msk.f32.mxu1 %vm5888_vm3, %v5889_v18  ;;  %5409 = vmatpush3.bf16.msra.mxu0 %v5408_v11 }
 0xc9e   : > { %v2381_v31 = vmul.f32 %v2378_v30, %v2348_v14  ;;  %5410 = vmatprep.subr.bf16.mxu0 %v5887_v3  ;;  %v5411_v14 = vpack.c.bf16 %v4551_v13, %v4550_v12 }
 0xca0   : > { %5043 = vmatmul.mubr.f32.gmra.mrb[44].mxu1 %v2381_v31 }
 0xca1   : > { %5045 = vmatprep.mubr.msk.f32.mxu1 %vm5888_vm3, %v5889_v18  ;;  %5412 = vmatpush3.bf16.msra.mxu0 %v5411_v14 }
 0xca2   : > { %5413 = vmatprep.subr.bf16.mxu0 %v5887_v3 }
 0xcaf   : > { %v2352_v32 = vpop.f32.mrb[26].mxu0 }
 0xcb0   : > { %v2353_v52 = vadd.f32 %v4541_v7, %v2352_v32  ;;  %v5006_v33 = vpop.f32.mrb[27].mxu0 }
 0xcb2   : > { %v2358_v34 = vmul.f32 %v2353_v52, %v2353_v52 }
 0xcb4   : > { %v2361_v35 = vmul.f32 %v2358_v34, %v2353_v52 }
 0xcb6   : > { %v2364_v36 = vmul.f32 0.044715, %v2361_v35 }
 0xcb8   : > { %v2367_v37 = vadd.f32 %v2364_v36, %v2353_v52 }
 0xcba   : > { %v2370_v38 = vmul.f32 0.7978846, %v2367_v37 }
 0xcbc   : > { %5710 = vtanh.f32 %v2370_v38 }
 0xcc6   : > { %v5711_v39 = vpop.eup %5710 }
 0xcc7   : > { %v2376_v40 = vadd.f32 1.0, %v5711_v39 }
 0xcc9   : > { %v2379_v41 = vmul.f32 0.5, %v2376_v40 }
 0xccb   : > { %v2382_v42 = vmul.f32 %v2379_v41, %v2353_v52 }
 0xccd   : > { %5046 = vmatmul.mubr.f32.gmra.mrb[46].mxu1 %v2382_v42 }
 0xcce   : > { %5086 = vmatprep.mubr.msk.f32.mxu1 %vm5888_vm3, %v5889_v18 }
 0xd6f   : > { %v2465_v44 = vpop.f32.mrb[42].mxu1 }
 0xd70   : > { %v2479_v46 = vadd.f32 %v2465_v44, %v6520_v43  ;;  %v5041_v47 = vpop.f32.mrb[43].mxu1 }
 0xd72   : > { %v6636_v48 = vadd.f32 %v4545_v45, %v2479_v46 }
 0xd73   : > { %v2470_v51 = vpop.f32.mrb[44].mxu1 }
 0xd74   : > { %v2480_v53 = vadd.f32 %v2470_v51, %v6524_v49  ;;  %v5044_v54 = vpop.f32.mrb[45].mxu1  ;;  %v2492_v55 = vsel %vm930_vm2, %v6636_v48, 0.0 }
 0xd75   : > { %2493 = vadd.xlane.f32.xlu0 %v2492_v55 }
 0xd76   : > { %v6641_v56 = vadd.f32 %v4545_v45, %v2480_v53 }
 0xd78   : > { %v2495_v59 = vsel %vm930_vm2, %v6641_v56, 0.0 }
 0xd79   : > { %2496 = vadd.xlane.f32.xlu1 %v2495_v59 }
 0xda0   : > { %v2475_v60 = vpop.f32.mrb[46].mxu1 }
 0xda1   : > { %v2481_v43 = vadd.f32 %v2475_v60, %v6528_v58  ;;  %v5047_v61 = vpop.f32.mrb[47].mxu1 }
 0xda3   : > { %v6646_v62 = vadd.f32 %v4545_v45, %v2481_v43  ;;  %v4552_v45 = vld [vmem:[%s7404_s10 + $0x1] ss:$0 sm:$0xff] }
 0xda5   : > { %v2498_v49 = vsel %vm924_vm1, %v6646_v62, 0.0 }
 0xda6   : > { %2499 = vadd.xlane.f32.xlu0 %v2498_v49 }
 0xe02   : > { %v2494_v63 = vpop.xlane.xlu0 %2493 }
 0xe03   : > { %v2501_v0 = vmul.f32 0.03125, %v2494_v63 }
 0xe05   : > { %v2504_v1 = vsub.f32 %v6636_v48, %v2501_v0 }
 0xe06   : > { %v2497_v2 = vpop.xlane.xlu1 %2496 }
 0xe07   : > { %v2502_v4 = vmul.f32 0.03125, %v2497_v2  ;;  %v2507_v5 = vmul.f32 %v2504_v1, %v2504_v1 }
 0xe09   : > { %v2505_v6 = vsub.f32 %v6641_v56, %v2502_v4  ;;  %v2510_v7 = vsel %vm930_vm2, %v2507_v5, 0.0 }
 0xe0a   : > { %2511 = vadd.xlane.f32.xlu1 %v2510_v7 }
 0xe0b   : > { %v2508_v58 = vmul.f32 %v2505_v6, %v2505_v6 }
 0xe0d   : > { %v2513_v8 = vsel %vm930_vm2, %v2508_v58, 0.0 }
 0xe0e   : > { %2514 = vadd.xlane.f32.xlu0 %v2513_v8 }
 0xe33   : > { %v2500_v15 = vpop.xlane.xlu0 %2499 }
 0xe34   : > { %v2503_v16 = vmul.f32 0.03125, %v2500_v15 }
 0xe36   : > { %v2506_v17 = vsub.f32 %v6646_v62, %v2503_v16 }
 0xe38   : > { %v2509_v19 = vmul.f32 %v2506_v17, %v2506_v17 }
 0xe3a   : > { %v2516_v20 = vsel %vm924_vm1, %v2509_v19, 0.0 }
 0xe3b   : > { %2517 = vadd.xlane.f32.xlu1 %v2516_v20 }
 0xe97   : > { %v2512_v21 = vpop.xlane.xlu1 %2511 }
 0xe98   : > { %v2519_v22 = vmul.f32 0.03125, %v2512_v21 }
 0xe9a   : > { %v2522_v23 = vadd.f32 1e-06, %v2519_v22 }
 0xe9b   : > { %v2515_v24 = vpop.xlane.xlu0 %2514 }
 0xe9c   : > { %5712 = vrsqrt.f32 %v2522_v23  ;;  %v2520_v25 = vmul.f32 0.03125, %v2515_v24 }
 0xe9e   : > { %v2523_v26 = vadd.f32 1e-06, %v2520_v25 }
 0xea0   : > { %5714 = vrsqrt.f32 %v2523_v26 }
 0xea6   : > { %v5713_v27 = vpop.eup %5712 }
 0xea7   : > { %v2528_v29 = vmul.f32 %v5713_v27, %v2504_v1 }
 0xea9   : > { %v2535_v30 = vmul.f32 %v4546_v28, %v2528_v29 }
 0xeaa   : > { %v5715_v31 = vpop.eup %5714 }
 0xeab   : > { %v2542_v32 = vadd.f32 %v4547_v50, %v2535_v30  ;;  %v2529_v52 = vmul.f32 %v5715_v31, %v2505_v6 }
 0xead   : > { %5057 = vmatmul.mubr.msk.f32.vlgmr.msra.gmra.mrb[28].mxu0 %vm930_vm2, %v2542_v32  ;;  %v2536_v33 = vmul.f32 %v4546_v28, %v2529_v52 }
 0xeae   : > { %5059 = vmatprep.mubr.msk.f32.mxu0 %vm5888_vm3, %v5889_v18 }
 0xeaf   : > { %v2543_v34 = vadd.f32 %v4547_v50, %v2536_v33 }
 0xeb1   : > { %5060 = vmatmul.mubr.msk.f32.gmra.mrb[30].mxu0 %vm930_vm2, %v2543_v34 }
 0xeb2   : > { %5062 = vmatprep.mubr.msk.f32.mxu0 %vm5888_vm3, %v5889_v18 }
 0xec8   : > { %v2518_v35 = vpop.xlane.xlu1 %2517 }
 0xec9   : > { %v2521_v36 = vmul.f32 0.03125, %v2518_v35 }
 0xecb   : > { %v2524_v37 = vadd.f32 1e-06, %v2521_v36 }
 0xecd   : > { %5716 = vrsqrt.f32 %v2524_v37 }
 0xed7   : > { %v5717_v38 = vpop.eup %5716 }
 0xed8   : > { %v2530_v39 = vmul.f32 %v5717_v38, %v2506_v17 }
 0xeda   : > { %v2537_v40 = vmul.f32 %v4546_v28, %v2530_v39 }
 0xedc   : > { %v2544_v41 = vadd.f32 %v4547_v50, %v2537_v40 }
 0xede   : > { %5063 = vmatmul.mubr.msk.f32.gmra.mrb[32].mxu0 %vm930_vm2, %v2544_v41 }
 0xedf   : > { %5071 = vmatprep.mubr.msk.f32.mxu0 %vm5888_vm3, %v5889_v18 }
 0xf80   : > { %v2630_v42 = vpop.f32.mrb[28].mxu0 }
 0xf81   : > { %v5058_v44 = vpop.f32.mrb[29].mxu0  ;;  %v2631_v47 = vadd.f32 %v4552_v45, %v2630_v42 }
 0xf83   : > { %v6712_v61 = vmul.f32 0.35355338, %v2631_v47 }
 0xf84   : > { %v2635_v46 = vpop.f32.mrb[30].mxu0 }
 0xf85   : > { %v2636_v51 = vadd.f32 %v4552_v45, %v2635_v46  ;;  %v5061_v53 = vpop.f32.mrb[31].mxu0 }
 0xf87   : > { %v6688_v54 = vpack.i.bf16 %v2636_v51, %v2631_v47  ;;  %v6694_v55 = vmul.f32 0.35355338, %v2636_v51 }
 0xf89   : > { %5607 = vrot.lane.b32.xlu0 %v6688_v54, %s7410_s25 }
 0xf8d   : > { %5617 = vrot.lane.b32.xlu0 %v6688_v54, %s7411_s28 }
 0xf91   : > { %2888 = vrot.lane.b32.xlu0 %v6694_v55, %s7412_s27 }
 0xfb1   : > { %v2640_v59 = vpop.f32.mrb[32].mxu0 }
 0xfb2   : > { %v6698_v60 = vadd.f32 %v4552_v45, %v2640_v59  ;;  %v5064_v43 = vpop.f32.mrb[33].mxu0 }
 0xfb4   : > { %3147 = vrot.lane.b32.xlu0 %v6698_v60, %s7411_s28  ;;  %2654 = vrot.lane.b32.xlu1 %v6698_v60, %s7410_s25  ;;  %v6719_v49 = vmul.f32 0.35355338, %v6698_v60  ;;  %s7418_s25 = smov 72   ;;  %s7419_s28 = smov 104  }
 0xfb8   : > { %3139 = vrot.lane.b32.xlu0 %v6694_v55, %s7413_s7  ;;  %5612 = vrot.lane.b32.xlu1 %v6688_v54, %s7414_s30 }
 0xfbc   : > { %5622 = vrot.lane.b32.xlu0 %v6688_v54, %s7415_s0  ;;  %2896 = vrot.lane.b32.xlu1 %v6698_v60, %s7414_s30  ;;  %s7422_s30 = smov 24  }
 0xfc0   : > { %3027 = vrot.lane.b32.xlu0 %v6698_v60, %s7416_s24  ;;  %2886 = vrot.lane.b32.xlu1 %v6712_v61, %s7412_s27 }
 0xfc4   : > { %2890 = vrot.lane.b32.xlu1 %v6719_v49, %s7412_s27  ;;  %s7420_s27 = smov 40  }
 0xfc8   : > { %3137 = vrot.lane.b32.xlu1 %v6712_v61, %s7413_s7 }
 0xfcc   : > { %3141 = vrot.lane.b32.xlu1 %v6719_v49, %s7413_s7  ;;  %s7421_s7 = smov 16  }
 0xfd0   : > { %2788 = vrot.lane.b32.xlu1 %v6698_v60, %s7415_s0 }
 0xfd4   : > { %5627 = vrot.lane.b32.xlu1 %v6688_v54, %s7416_s24 }
 0xffb   : > { %v5608_v63 = vpop.permute.xlu0 %5607 }
 0xffc   : > { %v5610_v0 = vunpack.i.h.bf16 %v5608_v63  ;;  %v5609_v1 = vunpack.i.l.bf16 %v5608_v63 }
 0xffe   : > { %v5414_v2 = vpack.c.bf16 %v5610_v0, %v5609_v1 }
 0xfff   : > { %v5618_v4 = vpop.permute.xlu0 %5617 }
0x1000   : > { %5416 = vmatpush3.bf16.xpose.msk.msra.mxu0 %vm6257_vm5, %v5414_v2  ;;  %v5620_v19 = vunpack.i.h.bf16 %v5618_v4  ;;  %v5619_v20 = vunpack.i.l.bf16 %v5618_v4 }
0x1001   : > { %5069 = vmatprep.subr.mxu0 %v5889_v18 }
0x1002   : > { %v5428_v22 = vpack.c.bf16 %v5620_v19, %v5619_v20 }
0x1003   : > { %v2889_v5 = vpop.permute.xlu0 %2888 }
0x1026   : > { %v3148_v6 = vpop.permute.xlu0 %3147  ;;  %v2655_v7 = vpop.permute.xlu1 %2654 }
0x1027   : > { %5070 = vmatpush3.xpose.msk.msra.mxu0 %vm1102_vm4, %v2655_v7 }
0x1028   : > { %5420 = vmatprep.subr.bf16.mxu0 %v5887_v3 }
0x102a   : > { %v3140_v58 = vpop.permute.xlu0 %3139  ;;  %5072 = vmatmul.mubr.msk.f32.vlgmr.msra.gmra.mrb[34].mxu0 %vm1102_vm4, %v6712_v61  ;;  %v5613_v8 = vpop.permute.xlu1 %5612 }
0x102b   : > { %v5615_v9 = vunpack.i.h.bf16 %v5613_v8  ;;  %v5614_v10 = vunpack.i.l.bf16 %v5613_v8  ;;  %5074 = vmatprep.mubr.msk.f32.mxu0 %vm5888_vm3, %v5889_v18 }
0x102d   : > { %v5421_v11 = vpack.c.bf16 %v5615_v9, %v5614_v10 }
0x102e   : > { %v5623_v12 = vpop.permute.xlu0 %5622  ;;  %5075 = vmatmul.mubr.msk.f32.gmra.mrb[36].mxu0 %vm1102_vm4, %v6694_v55  ;;  %v2897_v13 = vpop.permute.xlu1 %2896 }
0x102f   : > { %v5625_v14 = vunpack.i.h.bf16 %v5623_v12  ;;  %v5624_v15 = vunpack.i.l.bf16 %v5623_v12  ;;  %5423 = vmatpush3.bf16.xpose.msk.msra.mxu0 %vm6257_vm5, %v5421_v11  ;;  %5077 = vmatprep.mubr.msk.f32.mxu0 %vm5888_vm3, %v5889_v18 }
0x1030   : > { %5099 = vmatprep.subr.mxu0 %v5889_v18 }
0x1031   : > { %v5418_v16 = vpack.c.bf16 %v5625_v14, %v5624_v15 }
0x1032   : > { %v2887_v17 = vpop.permute.xlu1 %2886  ;;  %5078 = vmatmul.mubr.msk.f32.gmra.mrb[38].mxu0 %vm1102_vm4, %v6719_v49  ;;  %v6801_v63 = vpop.permute.xlu0 %3027 }
0x1033   : > { %5419 = vmatpush3.bf16.msra.mxu1 %v5418_v16  ;;  %5101 = vmatprep.mubr.msk.f32.mxu0 %vm5888_vm3, %v5889_v18 }
0x1034   : > { %5084 = vmatprep.subr.mxu1 %v5889_v18 }
0x1036   : > { %v2891_v21 = vpop.permute.xlu1 %2890 }
0x1037   : > { %5100 = vmatpush3.xpose.msk.msra.mxu0 %vm1102_vm4, %v2897_v13 }
0x1038   : > { %5427 = vmatprep.subr.bf16.mxu0 %v5887_v3 }
0x103a   : > { %v3138_v23 = vpop.permute.xlu1 %3137  ;;  %5102 = vmatmul.mubr.msk.f32.vlgmr.msra.gmra.mrb[40].mxu0 %vm1102_vm4, %v2887_v17 }
0x103b   : > { %5430 = vmatpush3.bf16.xpose.msk.msra.mxu0 %vm6257_vm5, %v5428_v22  ;;  %5104 = vmatprep.mubr.msk.f32.mxu0 %vm5888_vm3, %v5889_v18 }
0x103c   : > { %5129 = vmatprep.subr.mxu0 %v5889_v18 }
0x103e   : > { %v3142_v24 = vpop.permute.xlu1 %3141  ;;  %5105 = vmatmul.mubr.msk.f32.gmra.mrb[42].mxu0 %vm1102_vm4, %v2889_v5 }
0x103f   : > { %5107 = vmatprep.mubr.msk.f32.mxu0 %vm5888_vm3, %v5889_v18 }
0x1042   : > { %v2789_v25 = vpop.permute.xlu1 %2788  ;;  %5108 = vmatmul.mubr.msk.f32.gmra.mrb[44].mxu0 %vm1102_vm4, %v2891_v21 }
0x1043   : > { %5085 = vmatpush3.msk.msra.mxu1 %vm1250_vm8, %v2789_v25  ;;  %5130 = vmatpush3.xpose.msk.msra.mxu0 %vm1102_vm4, %v3148_v6 }
0x1044   : > { %5131 = vmatprep.mubr.msk.f32.mxu0 %vm5888_vm3, %v5889_v18  ;;  %5434 = vmatprep.subr.bf16.mxu0 %v5887_v3 }
0x1045   : > { %5424 = vmatprep.subr.bf16.mxu1 %v5887_v3 }
0x1046   : > { %5132 = vmatmul.mubr.msk.f32.vlgmr.msra.gmra.mrb[46].mxu0 %vm1102_vm4, %v3138_v23  ;;  %v6803_v0 = vpop.permute.xlu1 %5627 }
0x1047   : > { %5134 = vmatprep.mubr.msk.f32.mxu0 %vm5888_vm3, %v5889_v18 }
0x104a   : > { %5135 = vmatmul.mubr.msk.f32.gmra.mrb[48].mxu0 %vm1102_vm4, %v3140_v58 }
0x104b   : > { %5137 = vmatprep.mubr.msk.f32.mxu0 %vm5888_vm3, %v5889_v18 }
0x104e   : > { %5138 = vmatmul.mubr.msk.f32.gmra.mrb[50].mxu0 %vm1102_vm4, %v3142_v24 }
0x104f   : > { %5161 = vmatprep.mubr.msk.f32.mxu0 %vm5888_vm3, %v5889_v18 }
0x10fd   : > { %v2737_v26 = vpop.f32.mrb[34].mxu0 }
0x10fe   : > { %v5073_v27 = vpop.f32.mrb[35].mxu0  ;;  %v2751_v28 = vsel %vm1198_vm6, %v2737_v26, -inf }
0x10ff   : > { %2752 = vmax.xlane.f32.xlu0 %v2751_v28 }
0x1101   : > { %v2742_v29 = vpop.f32.mrb[36].mxu0 }
0x1102   : > { %v5076_v50 = vpop.f32.mrb[37].mxu0  ;;  %v2754_v30 = vsel %vm1198_vm6, %v2742_v29, -inf }
0x1103   : > { %2755 = vmax.xlane.f32.xlu1 %v2754_v30 }
0x1105   : > { %v2747_v31 = vpop.f32.mrb[38].mxu0 }
0x1106   : > { %v5079_v32 = vpop.f32.mrb[39].mxu0  ;;  %v2757_v52 = vsel %vm1205_vm7, %v2747_v31, -inf }
0x1107   : > { %2758 = vmax.xlane.f32.xlu0 %v2757_v52 }
0x110d   : > { %v2976_v33 = vpop.f32.mrb[40].mxu0 }
0x110e   : > { %v5103_v34 = vpop.f32.mrb[41].mxu0  ;;  %v2990_v35 = vsel %vm1198_vm6, %v2976_v33, -inf }
0x110f   : > { %2991 = vmax.xlane.f32.xlu0 %v2990_v35 }
0x1111   : > { %v6783_v36 = vpop.f32.mrb[42].mxu0 }
0x1112   : > { %v5106_v37 = vpop.f32.mrb[43].mxu0  ;;  %v2993_v38 = vsel %vm1198_vm6, %v6783_v36, -inf }
0x1113   : > { %2994 = vmax.xlane.f32.xlu0 %v2993_v38 }
0x1115   : > { %v6787_v39 = vpop.f32.mrb[44].mxu0 }
0x1116   : > { %v5109_v40 = vpop.f32.mrb[45].mxu0  ;;  %v2996_v41 = vsel %vm1205_vm7, %v6787_v39, -inf }
0x1117   : > { %2997 = vmax.xlane.f32.xlu1 %v2996_v41 }
0x1119   : > { %v6791_v42 = vpop.f32.mrb[46].mxu0 }
0x111a   : > { %v5133_v44 = vpop.f32.mrb[47].mxu0  ;;  %v3241_v45 = vsel %vm1198_vm6, %v6791_v42, -inf }
0x111b   : > { %3242 = vmax.xlane.f32.xlu0 %v3241_v45 }
0x111d   : > { %v3232_v46 = vpop.f32.mrb[48].mxu0 }
0x111e   : > { %v5136_v47 = vpop.f32.mrb[49].mxu0  ;;  %v3244_v51 = vsel %vm1198_vm6, %v3232_v46, -inf }
0x111f   : > { %3245 = vmax.xlane.f32.xlu1 %v3244_v51 }
0x1121   : > { %v3237_v53 = vpop.f32.mrb[50].mxu0 }
0x1122   : > { %v5139_v59 = vpop.f32.mrb[51].mxu0  ;;  %v3247_v43 = vsel %vm1205_vm7, %v3237_v53, -inf }
0x1123   : > { %3248 = vmax.xlane.f32.xlu0 %v3247_v43 }
0x1130   : > { %5632 = vrot.lane.b32.xlu1 %v6688_v54, %s7417_s26 }
0x1139   : > { %5637 = vrot.lane.b32.xlu0 %v6688_v54, %s7418_s25 }
0x118c   : > { %v2753_v1 = vpop.xlane.xlu0 %2752 }
0x118d   : > { %v2760_v2 = vsub.f32 %v2737_v26, %v2753_v1 }
0x118f   : > { %v2763_v4 = vmul.f32 1.442695, %v2760_v2 }
0x1190   : > { %v2756_v5 = vpop.xlane.xlu1 %2755 }
0x1191   : > { %5718 = vpow2.f32 %v2763_v4  ;;  %v2761_v6 = vsub.f32 %v2742_v29, %v2756_v5  ;;  %v5630_v4 = vunpack.i.h.bf16 %v6803_v0  ;;  %v5629_v5 = vunpack.i.l.bf16 %v6803_v0 }
0x1193   : > { %v2765_v7 = vmul.f32 1.442695, %v2761_v6 }
0x1194   : > { %v2759_v58 = vpop.xlane.xlu0 %2758 }
0x1195   : > { %5720 = vpow2.f32 %v2765_v7  ;;  %v2762_v8 = vsub.f32 %v2747_v31, %v2759_v58 }
0x1197   : > { %v2767_v9 = vmul.f32 1.442695, %v2762_v8 }
0x1199   : > { %5722 = vpow2.f32 %v2767_v9 }
0x119b   : > { %v6805_v10 = vpop.eup %5718 }
0x119c   : > { %v2992_v11 = vpop.xlane.xlu0 %2991  ;;  %v2769_v12 = vsel %vm1198_vm6, %v6805_v10, 0.0 }
0x119d   : > { %v2999_v13 = vsub.f32 %v2976_v33, %v2992_v11  ;;  %2770 = vadd.xlane.f32.xlu1 %v2769_v12 }
0x119f   : > { %v6809_v14 = vpop.eup %5720  ;;  %v3002_v15 = vmul.f32 1.442695, %v2999_v13 }
0x11a0   : > { %v2772_v16 = vsel %vm1198_vm6, %v6809_v14, 0.0  ;;  %v2995_v20 = vpop.xlane.xlu0 %2994 }
0x11a1   : > { %5724 = vpow2.f32 %v3002_v15  ;;  %2773 = vadd.xlane.f32.xlu0 %v2772_v16  ;;  %v3000_v29 = vsub.f32 %v6783_v36, %v2995_v20 }
0x11a3   : > { %v6813_v17 = vpop.eup %5722  ;;  %v3004_v30 = vmul.f32 1.442695, %v3000_v29 }
0x11a4   : > { %v2775_v19 = vsel %vm1205_vm7, %v6813_v17, 0.0  ;;  %v2998_v50 = vpop.xlane.xlu1 %2997 }
0x11a5   : > { %2776 = vadd.xlane.f32.xlu1 %v2775_v19  ;;  %v3001_v31 = vsub.f32 %v6787_v39, %v2998_v50  ;;  %5726 = vpow2.f32 %v3004_v30 }
0x11a7   : > { %v3006_v33 = vmul.f32 1.442695, %v3001_v31 }
0x11a8   : > { %v3243_v22 = vpop.xlane.xlu0 %3242 }
0x11a9   : > { %v3250_v52 = vsub.f32 %v6791_v42, %v3243_v22  ;;  %5728 = vpow2.f32 %v3006_v33 }
0x11ab   : > { %v6817_v21 = vpop.eup %5724  ;;  %v3253_v35 = vmul.f32 1.442695, %v3250_v52 }
0x11ac   : > { %v3008_v23 = vsel %vm1198_vm6, %v6817_v21, 0.0  ;;  %v3246_v32 = vpop.xlane.xlu1 %3245 }
0x11ad   : > { %3009 = vadd.xlane.f32.xlu0 %v3008_v23  ;;  %v3251_v34 = vsub.f32 %v3232_v46, %v3246_v32  ;;  %5730 = vpow2.f32 %v3253_v35 }
0x11af   : > { %v3255_v37 = vmul.f32 1.442695, %v3251_v34  ;;  %v6834_v41 = vpop.eup %5726 }
0x11b0   : > { %v3249_v24 = vpop.xlane.xlu0 %3248  ;;  %v3011_v36 = vsel %vm1198_vm6, %v6834_v41, 0.0  ;;  %v5633_v59 = vpop.permute.xlu1 %5632 }
0x11b1   : > { %v3252_v38 = vsub.f32 %v3237_v53, %v3249_v24  ;;  %5732 = vpow2.f32 %v3255_v37  ;;  %v5634_v11 = vunpack.i.l.bf16 %v5633_v59 }
0x11b3   : > { %v3257_v40 = vmul.f32 1.442695, %v3252_v38  ;;  %v6838_v39 = vpop.eup %5728 }
0x11b4   : > { %v5638_v25 = vpop.permute.xlu0 %5637  ;;  %v3014_v44 = vsel %vm1205_vm7, %v6838_v39, 0.0 }
0x11b5   : > { %v5640_v26 = vunpack.i.h.bf16 %v5638_v25  ;;  %v5639_v27 = vunpack.i.l.bf16 %v5638_v25  ;;  %5734 = vpow2.f32 %v3257_v40 }
0x11b6   : > { %3398 = vrot.lane.b32.xlu1 %v6698_v60, %s7418_s25 }
0x11b7   : > { %v6823_v28 = vpack.c.bf16 %v5640_v26, %v5639_v27  ;;  %v6840_v42 = vpop.eup %5730 }
0x11b8   : > { %v3259_v46 = vsel %vm1198_vm6, %v6840_v42, 0.0 }
0x11b9   : > { %5437 = vmatpush3.bf16.xpose.msk.msra.mxu0 %vm6257_vm5, %v6823_v28 }
0x11ba   : > { %5159 = vmatprep.subr.mxu0 %v5889_v18 }
0x11bb   : > { %v6844_v45 = vpop.eup %5732 }
0x11bc   : > { %v3262_v47 = vsel %vm1198_vm6, %v6844_v45, 0.0 }
0x11bf   : > { %v6850_v51 = vpop.eup %5734 }
0x11c0   : > { %v3265_v53 = vsel %vm1205_vm7, %v6850_v51, 0.0 }
0x11c3   : > { %3278 = vrot.lane.b32.xlu0 %v6698_v60, %s7417_s26 }
0x11da   : > { %3012 = vadd.xlane.f32.xlu1 %v3011_v36 }
0x11de   : > { %3015 = vadd.xlane.f32.xlu1 %v3014_v44 }
0x11e2   : > { %3260 = vadd.xlane.f32.xlu1 %v3259_v46  ;;  %3263 = vadd.xlane.f32.xlu0 %v3262_v47 }
0x11e6   : > { %3266 = vadd.xlane.f32.xlu1 %v3265_v53 }
0x11f7   : > { %3390 = vrot.lane.b32.xlu1 %v6694_v55, %s7419_s28 }
0x11f8   : > { %3388 = vrot.lane.b32.xlu0 %v6712_v61, %s7419_s28  ;;  %v5425_v61 = vpack.c.bf16 %v5630_v4, %v5629_v5 }
0x11fc   : > { %3392 = vrot.lane.b32.xlu0 %v6719_v49, %s7419_s28 }
0x122a   : > { %v2771_v43 = vpop.xlane.xlu1 %2770 }
0x122b   : > { %5736 = vrcp.f32 %v2771_v43 }
0x122e   : > { %v2774_v1 = vpop.xlane.xlu0 %2773 }
0x122f   : > { %5738 = vrcp.f32 %v2774_v1 }
0x1232   : > { %v2777_v2 = vpop.xlane.xlu1 %2776 }
0x1233   : > { %5740 = vrcp.f32 %v2777_v2 }
0x1235   : > { %v5737_v6 = vpop.eup %5736 }
0x1236   : > { %v2781_v55 = vmul.f32 %v5737_v6, %v6805_v10  ;;  %v6863_v7 = vpop.permute.xlu1 %3398  ;;  %v5635_v10 = vunpack.i.h.bf16 %v5633_v59 }
0x1237   : > { %5160 = vmatpush3.xpose.msk.msra.mxu0 %vm1102_vm4, %v6863_v7 }
0x1238   : > { %5087 = vmatmul.mubr.msk.f32.vlgmr.msra.gmra.mrb[48].mxu1 %vm1198_vm6, %v2781_v55  ;;  %5441 = vmatprep.subr.bf16.mxu0 %v5887_v3 }
0x1239   : > { %v5739_v49 = vpop.eup %5738  ;;  %5426 = vmatpush3.bf16.msra.mxu1 %v5425_v61  ;;  %5089 = vmatprep.mubr.msk.f32.mxu1 %vm5888_vm3, %v5889_v18 }
0x123a   : > { %v3010_v0 = vpop.xlane.xlu0 %3009  ;;  %5114 = vmatprep.subr.mxu1 %v5889_v18  ;;  %v2782_v58 = vmul.f32 %v5739_v49, %v6809_v14  ;;  %v5432_v14 = vpack.c.bf16 %v5635_v10, %v5634_v11 }
0x123b   : > { %5742 = vrcp.f32 %v3010_v0 }
0x123c   : > { %5090 = vmatmul.mubr.msk.f32.gmra.mrb[50].mxu1 %vm1198_vm6, %v2782_v58 }
0x123d   : > { %v5741_v8 = vpop.eup %5740  ;;  %5115 = vmatpush3.msk.msra.mxu1 %vm1250_vm8, %v6801_v63  ;;  %5092 = vmatprep.mubr.msk.f32.mxu1 %vm5888_vm3, %v5889_v18 }
0x123e   : > { %v2783_v9 = vmul.f32 %v5741_v8, %v6813_v17  ;;  %5431 = vmatprep.subr.bf16.mxu1 %v5887_v3  ;;  %v3279_v63 = vpop.permute.xlu0 %3278 }
0x1240   : > { %5093 = vmatmul.mubr.msk.f32.gmra.mrb[52].mxu1 %vm1198_vm6, %v2783_v9 }
0x1241   : > { %5116 = vmatprep.mubr.msk.f32.mxu1 %vm5888_vm3, %v5889_v18 }
0x1245   : > { %v5743_v12 = vpop.eup %5742 }
0x1246   : > { %v3020_v13 = vmul.f32 %v5743_v12, %v6817_v21 }
0x1248   : > { %5117 = vmatmul.mubr.msk.f32.vlgmr.msra.gmra.mrb[54].mxu1 %vm1198_vm6, %v3020_v13 }
0x1249   : > { %5433 = vmatpush3.bf16.msra.mxu1 %v5432_v14  ;;  %5119 = vmatprep.mubr.msk.f32.mxu1 %vm5888_vm3, %v5889_v18 }
0x124a   : > { %5144 = vmatprep.subr.mxu1 %v5889_v18 }
0x124d   : > { %5145 = vmatpush3.msk.msra.mxu1 %vm1250_vm8, %v3279_v63 }
0x124e   : > { %5501 = vmatprep.subr.bf16.mxu1 %v5887_v3 }
0x1267   : > { %v3013_v15 = vpop.xlane.xlu1 %3012 }
0x1268   : > { %5744 = vrcp.f32 %v3013_v15 }
0x126b   : > { %v3016_v16 = vpop.xlane.xlu1 %3015 }
0x126c   : > { %5746 = vrcp.f32 %v3016_v16 }
0x126f   : > { %v3261_v17 = vpop.xlane.xlu1 %3260  ;;  %v3264_v19 = vpop.xlane.xlu0 %3263 }
0x1270   : > { %5748 = vrcp.f32 %v3261_v17 }
0x1271   : > { %5750 = vrcp.f32 %v3264_v19 }
0x1272   : > { %v5745_v20 = vpop.eup %5744 }
0x1273   : > { %v3267_v21 = vpop.xlane.xlu1 %3266  ;;  %v3389_v22 = vpop.permute.xlu0 %3388  ;;  %v3021_v23 = vmul.f32 %v5745_v20, %v6834_v41 }
0x1274   : > { %5162 = vmatmul.mubr.msk.f32.vlgmr.msra.gmra.mrb[52].mxu0 %vm1102_vm4, %v3389_v22  ;;  %5752 = vrcp.f32 %v3267_v21 }
0x1275   : > { %5120 = vmatmul.mubr.msk.f32.gmra.mrb[56].mxu1 %vm1198_vm6, %v3021_v23  ;;  %5164 = vmatprep.mubr.msk.f32.mxu0 %vm5888_vm3, %v5889_v18 }
0x1276   : > { %v5747_v24 = vpop.eup %5746  ;;  %5122 = vmatprep.mubr.msk.f32.mxu1 %vm5888_vm3, %v5889_v18 }
0x1277   : > { %v3391_v25 = vpop.permute.xlu1 %3390  ;;  %v3022_v26 = vmul.f32 %v5747_v24, %v6838_v39  ;;  %v3393_v57 = vpop.permute.xlu0 %3392 }
0x1278   : > { %5165 = vmatmul.mubr.msk.f32.gmra.mrb[54].mxu0 %vm1102_vm4, %v3391_v25 }
0x1279   : > { %5123 = vmatmul.mubr.msk.f32.gmra.mrb[58].mxu1 %vm1198_vm6, %v3022_v26  ;;  %5193 = vmatprep.mubr.msk.f32.mxu0 %vm5888_vm3, %v5889_v18 }
0x127a   : > { %v5749_v27 = vpop.eup %5748  ;;  %5146 = vmatprep.mubr.msk.f32.mxu1 %vm5888_vm3, %v5889_v18 }
0x127b   : > { %v3271_v29 = vmul.f32 %v5749_v27, %v6840_v42  ;;  %v5751_v50 = vpop.eup %5750 }
0x127c   : > { %v3272_v30 = vmul.f32 %v5751_v50, %v6844_v45 }
0x127d   : > { %5147 = vmatmul.mubr.msk.f32.vlgmr.msra.gmra.mrb[60].mxu1 %vm1198_vm6, %v3271_v29 }
0x127e   : > { %5503 = vmatpush3.bf16.xpose.msk.msra.mxu1 %vm6257_vm5, %v6823_v28  ;;  %5149 = vmatprep.mubr.msk.f32.mxu1 %vm5888_vm3, %v5889_v18  ;;  %v5753_v31 = vpop.eup %5752 }
0x127f   : > { %5502 = vmatprep.subr.mxu1 %v5889_v18  ;;  %v3273_v32 = vmul.f32 %v5753_v31, %v6850_v51 }
0x1281   : > { %5150 = vmatmul.mubr.msk.f32.gmra.mrb[62].mxu1 %vm1198_vm6, %v3272_v30 }
0x1282   : > { %5152 = vmatprep.mubr.msk.f32.mxu1 %vm5888_vm3, %v5889_v18 }
0x1285   : > { %5153 = vmatmul.mubr.msk.f32.gmra.mrb[64].mxu1 %vm1198_vm6, %v3273_v32 }
0x1286   : > { %5504 = vmatpush3.xpose.msk.msra.mxu1 %vm1102_vm4, %v6863_v7  ;;  %5167 = vmatprep.mubr.msk.f32.mxu1 %vm5888_vm3, %v5889_v18 }
0x1287   : > { %5438 = vmatprep.subr.bf16.mxu1 %v5887_v3 }
0x1289   : > { %5168 = vmatmul.mubr.msk.f32.vlgmr.msra.gmra.mrb[66].mxu1 %vm1102_vm4, %v3393_v57 }
0x128a   : > { %5176 = vmatprep.mubr.msk.f32.mxu1 %vm5888_vm3, %v5889_v18 }
0x130b   : > { %v2869_v28 = vpop.f32.mrb[48].mxu1 }
0x130c   : > { %2883 = vst.msk [vmem:[#allocation3] sm:$0xff] %vm1102_vm4, %v2869_v28  ;;  %v5088_v52 = vpop.f32.mrb[49].mxu1  ;;  %v4596_v28 = vld [vmem:[%s7407_s5 + $0x20] sm:$0xff] }
0x130d   : > { %v4597_v52 = vld [vmem:[%s7407_s5 + $0x28] sm:$0xff] }
0x130f   : > { %v2874_v33 = vpop.f32.mrb[50].mxu1 }
0x1310   : > { %2884 = vst.msk [vmem:[#allocation3 + $0x8] sm:$0xff] %vm1102_vm4, %v2874_v33  ;;  %v5091_v34 = vpop.f32.mrb[51].mxu1  ;;  %v5442_v33 = vpack.c.bf16 %v4597_v52, %v4596_v28 }
0x1311   : > { %v4598_v34 = vld [vmem:[%s7407_s5 + $0x30] sm:$0xff] }
0x1312   : > { %5443 = vmatpush3.bf16.msra.mxu0 %v5442_v33 }
0x1313   : > { %v2879_v35 = vpop.f32.mrb[52].mxu1  ;;  %5444 = vmatprep.subr.bf16.mxu0 %v5887_v3 }
0x1314   : > { %2885 = vst.msk [vmem:[#allocation3 + $0x10] sm:$0x1] %vm1335_vm9, %v2879_v35  ;;  %v5094_v37 = vpop.f32.mrb[53].mxu1  ;;  %v4599_v35 = vld [vmem:[%s7407_s5 + $0x38] sm:$0xff]  ;;  %s5904_s5 = smov [#allocation6]  }
0x1315   : > { %v5445_v37 = vpack.c.bf16 %v4599_v35, %v4598_v34  ;;  %s5795_s6 = sshll.u32 %s5904_s5, 4  ;;  %s5796_s6 = int_to_ptr.vmem [resolvable:$false] %s5795_s6 }
0x1316   : > { %s5797_s9 = scalar_lea.vmem %s5796_s6, 32 }
0x1317   : > { %5446 = vmatpush3.bf16.msra.mxu0 %v5445_v37 }
0x1318   : > { %5453 = vmatprep.subr.bf16.mxu0 %v5887_v3 }
0x131b   : > { %v3108_v38 = vpop.f32.mrb[54].mxu1 }
0x131c   : > { %v5118_v40 = vpop.f32.mrb[55].mxu1 }
0x1347   : > { %v3478_v41 = vpop.f32.mrb[52].mxu0 }
0x1348   : > { %v3113_v36 = vpop.f32.mrb[56].mxu1  ;;  %v5163_v39 = vpop.f32.mrb[53].mxu0  ;;  %v3492_v42 = vsel %vm1198_vm6, %v3478_v41, -inf }
0x1349   : > { %3493 = vmax.xlane.f32.xlu1 %v3492_v42  ;;  %v5121_v44 = vpop.f32.mrb[57].mxu1 }
0x134b   : > { %v3483_v45 = vpop.f32.mrb[54].mxu0 }
0x134c   : > { %v6930_v46 = vpop.f32.mrb[58].mxu1  ;;  %v5166_v47 = vpop.f32.mrb[55].mxu0  ;;  %v3495_v51 = vsel %vm1198_vm6, %v3483_v45, -inf }
0x134d   : > { %3496 = vmax.xlane.f32.xlu0 %v3495_v51  ;;  %v5124_v53 = vpop.f32.mrb[59].mxu1 }
0x1350   : > { %v3359_v59 = vpop.f32.mrb[60].mxu1 }
0x1351   : > { %v5148_v43 = vpop.f32.mrb[61].mxu1 }
0x1354   : > { %v6933_v1 = vpop.f32.mrb[62].mxu1 }
0x1355   : > { %v5151_v2 = vpop.f32.mrb[63].mxu1 }
0x1358   : > { %v6935_v4 = vpop.f32.mrb[64].mxu1 }
0x1359   : > { %v5154_v5 = vpop.f32.mrb[65].mxu1 }
0x135c   : > { %v3488_v6 = vpop.f32.mrb[66].mxu1 }
0x135d   : > { %v5169_v55 = vpop.f32.mrb[67].mxu1  ;;  %v3498_v7 = vsel %vm1205_vm7, %v3488_v6, -inf }
0x135e   : > { %3499 = vmax.xlane.f32.xlu0 %v3498_v7 }
0x13d6   : > { %v3494_v61 = vpop.xlane.xlu1 %3493 }
0x13d7   : > { %v3501_v49 = vsub.f32 %v3478_v41, %v3494_v61 }
0x13d9   : > { %v3504_v0 = vmul.f32 1.442695, %v3501_v49 }
0x13da   : > { %v3497_v58 = vpop.xlane.xlu0 %3496 }
0x13db   : > { %5754 = vpow2.f32 %v3504_v0  ;;  %v3502_v8 = vsub.f32 %v3483_v45, %v3497_v58 }
0x13dd   : > { %v3506_v9 = vmul.f32 1.442695, %v3502_v8 }
0x13df   : > { %5756 = vpow2.f32 %v3506_v9 }
0x13e5   : > { %v5755_v10 = vpop.eup %5754 }
0x13e6   : > { %v3510_v11 = vsel %vm1198_vm6, %v5755_v10, 0.0 }
0x13e7   : > { %3511 = vadd.xlane.f32.xlu0 %v3510_v11 }
0x13e9   : > { %v5757_v12 = vpop.eup %5756 }
0x13ea   : > { %v3513_v13 = vsel %vm1198_vm6, %v5757_v12, 0.0 }
0x13eb   : > { %3514 = vadd.xlane.f32.xlu1 %v3513_v13  ;;  %v3500_v14 = vpop.xlane.xlu0 %3499 }
0x13ec   : > { %v3503_v63 = vsub.f32 %v3488_v6, %v3500_v14 }
0x13ee   : > { %v3508_v15 = vmul.f32 1.442695, %v3503_v63 }
0x13f0   : > { %5758 = vpow2.f32 %v3508_v15 }
0x13fa   : > { %v5759_v16 = vpop.eup %5758 }
0x13fb   : > { %v3516_v17 = vsel %vm1205_vm7, %v5759_v16, 0.0 }
0x13fc   : > { %5642 = vrot.lane.b32.xlu1 %v6688_v54, %s7420_s27  ;;  %3517 = vadd.xlane.f32.xlu0 %v3516_v17 }
0x1400   : > { %3125 = vrot.lane.b32.xlu1 %v3108_v38, %s7408_s1 }
0x1404   : > { %3376 = vrot.lane.b32.xlu1 %v3359_v59, %s7421_s7 }
0x1412   : > { %3529 = vrot.lane.b32.xlu0 %v6698_v60, %s7420_s27  ;;  %s7369_s27 = sshll.u32 %s6062_s8, 4 }
0x1416   : > { %3127 = vrot.lane.b32.xlu0 %v3113_v36, %s7408_s1 }
0x1474   : > { %v3512_v21 = vpop.xlane.xlu0 %3511 }
0x1475   : > { %5760 = vrcp.f32 %v3512_v21 }
0x1478   : > { %v3515_v19 = vpop.xlane.xlu1 %3514 }
0x1479   : > { %5762 = vrcp.f32 %v3515_v19 }
0x147c   : > { %v5643_v20 = vpop.permute.xlu1 %5642 }
0x147d   : > { %v5645_v22 = vunpack.i.h.bf16 %v5643_v20  ;;  %v5644_v23 = vunpack.i.l.bf16 %v5643_v20 }
0x147f   : > { %v5439_v24 = vpack.c.bf16 %v5645_v22, %v5644_v23  ;;  %v5761_v26 = vpop.eup %5760 }
0x1480   : > { %v3126_v25 = vpop.permute.xlu1 %3125  ;;  %v3522_v27 = vmul.f32 %v5761_v26, %v5755_v10 }
0x1481   : > { %3134 = vst.msk [vmem:[#allocation3] sm:$0xff] %vm1585_vm10, %v3126_v25  ;;  %5440 = vmatpush3.bf16.msra.mxu1 %v5439_v24 }
0x1482   : > { %5174 = vmatprep.subr.mxu1 %v5889_v18 }
0x1483   : > { %v5763_v50 = vpop.eup %5762 }
0x1484   : > { %v3377_v54 = vpop.permute.xlu1 %3376  ;;  %v3523_v31 = vmul.f32 %v5763_v50, %v5757_v12 }
0x1485   : > { %3385 = vst.msk [vmem:[#allocation3] sm:$0xff] %vm1838_vm11, %v3377_v54  ;;  %v4606_v54 = vld [vmem:[%s7305_s13 + $0x20] sm:$0xff] }
0x1489   : > { %v3518_v60 = vpop.xlane.xlu0 %3517 }
0x148a   : > { %5764 = vrcp.f32 %v3518_v60  ;;  %v4607_v60 = vld [vmem:[%s7305_s13 + $0x28] sm:$0xff] }
0x148b   : > { %v5448_v26 = vpack.c.bf16 %v4607_v60, %v4606_v54 }
0x148d   : > { %v3530_v29 = vpop.permute.xlu0 %3529 }
0x148e   : > { %5175 = vmatpush3.msk.msra.mxu1 %vm1250_vm8, %v3530_v29  ;;  %v4609_v29 = vld [vmem:[%s7305_s13 + $0x38] sm:$0xff] }
0x148f   : > { %5177 = vmatmul.mubr.msk.f32.vlgmr.msra.gmra.mrb[68].mxu1 %vm1198_vm6, %v3522_v27  ;;  %5447 = vmatprep.subr.bf16.mxu1 %v5887_v3  ;;  %v4608_v27 = vld [vmem:[%s7305_s13 + $0x30] sm:$0xff] }
0x1490   : > { %5179 = vmatprep.mubr.msk.f32.mxu1 %vm5888_vm3, %v5889_v18  ;;  %5449 = vmatpush3.bf16.msra.mxu1 %v5448_v26  ;;  %v5451_v50 = vpack.c.bf16 %v4609_v29, %v4608_v27 }
0x1491   : > { %v3128_v30 = vpop.permute.xlu0 %3127  ;;  %5450 = vmatprep.subr.bf16.mxu1 %v5887_v3 }
0x1492   : > { %3135 = vst.msk [vmem:[#allocation3 + $0x8] sm:$0xff] %vm1585_vm10, %v3128_v30  ;;  %v4614_v30 = vld [vmem:[%s7307_s15 + $0x80] sm:$0xff] }
0x1493   : > { %5180 = vmatmul.mubr.msk.f32.gmra.mrb[70].mxu1 %vm1198_vm6, %v3523_v31  ;;  %v4615_v31 = vld [vmem:[%s7307_s15 + $0x88] sm:$0xff] }
0x1494   : > { %v5765_v32 = vpop.eup %5764  ;;  %5182 = vmatprep.mubr.msk.f32.mxu1 %vm5888_vm3, %v5889_v18  ;;  %5452 = vmatpush3.bf16.msra.mxu1 %v5451_v50 }
0x1495   : > { %v3524_v57 = vmul.f32 %v5765_v32, %v5759_v16  ;;  %5477 = vmatprep.subr.bf16.mxu1 %v5887_v3  ;;  %v5454_v32 = vpack.c.bf16 %v4615_v31, %v4614_v30 }
0x1497   : > { %5183 = vmatmul.mubr.msk.f32.gmra.mrb[72].mxu1 %vm1198_vm6, %v3524_v57 }
0x1498   : > { %5210 = vmatprep.mubr.msk.f32.mxu1 %vm5888_vm3, %v5889_v18 }
0x1562   : > { %v3610_v38 = vpop.f32.mrb[68].mxu1 }
0x1563   : > { %3627 = vrot.lane.b32.xlu1 %v3610_v38, %s7422_s30  ;;  %v5178_v40 = vpop.f32.mrb[69].mxu1 }
0x1566   : > { %v3615_v41 = vpop.f32.mrb[70].mxu1 }
0x1567   : > { %3378 = vrot.lane.b32.xlu1 %v6933_v1, %s7421_s7  ;;  %3629 = vrot.lane.b32.xlu0 %v3615_v41, %s7422_s30  ;;  %v5181_v36 = vpop.f32.mrb[71].mxu1  ;;  %v4604_v41 = vld [vmem:[%s7303_s11 + $0x1] ss:$0 sm:$0xff] }
0x156a   : > { %v3620_v39 = vpop.f32.mrb[72].mxu1 }
0x156b   : > { %3129 = vrot.lane.b32.xlu1 %v6930_v46, %s7408_s1  ;;  %3380 = vrot.lane.b32.xlu0 %v6935_v4, %s7421_s7  ;;  %v5184_v42 = vpop.f32.mrb[73].mxu1  ;;  %v4603_v4 = vld [vmem:[%s7409_s29 + $0x1] ss:$0 sm:$0xff]  ;;  %s7155_s7 = sand.u32 1, %s5877_s3   ;;  %s7423_s1 = sld [smem:[#allocation29_spill]] }
0x156c   : > { %v4605_v42 = vld [vmem:[%s7304_s12 + $0x1] ss:$0 sm:$0xff]  ;;  %s796_s0 = scalar_lea.vmem [#allocation6], %s7155_s7  ;;  %s4371_s25 = scalar_lea.sflag [#allocation7], %s7155_s7 }
0x156d   : > { %s4396_s26 = sshll.u32 %s796_s0, 4  ;;  %s4397_s26 = int_to_ptr.vmem [resolvable:$true] %s4396_s26 }
0x156e   : > { %s5791_s28 = scalar_lea.vmem %s4397_s26, 16  ;;  %p5798_p0 = scmp.lt.s32.totalorder %s4397_s26, %s5796_s6 }
0x156f   : > { %3631 = vrot.lane.b32.xlu1 %v3620_v39, %s7422_s30  ;;  %p5792_p11 = scmp.ne.s32.totalorder %s4397_s26, %s5791_s28  ;;  %p5799_p1 = scmp.lt.s32.totalorder %s5797_s9, %s5791_s28 }
0x1571   : > { %s7218_s24 = scalar_lea.hbm %s7423_s1, %s7369_s27  ;;  %p5793_p12 = pnand %p5792_p11, %p6079_p5 }
0x1572   : > { %p5800_p2 = por %p5799_p1, %p5798_p0 }
0x1573   : > { %p5794_p13 = pneg %p5793_p12 }
0x1575   : > { %p5801_p3 = pnand %p5800_p2, %p5794_p13 }
0x15d5   : > { %v3628_v44 = vpop.permute.xlu1 %3627 }
0x15d6   : > { %3636 = vst.msk [vmem:[#allocation3] sm:$0xff] %vm2091_vm12, %v3628_v44 }
0x15d9   : > { %v3379_v45 = vpop.permute.xlu1 %3378  ;;  %v3630_v47 = vpop.permute.xlu0 %3629 }
0x15da   : > { %3386 = vst.msk [vmem:[#allocation3 + $0x8] sm:$0xff] %vm1838_vm11, %v3379_v45 }
0x15db   : > { %3637 = vst.msk [vmem:[#allocation3 + $0x8] sm:$0xff] %vm2091_vm12, %v3630_v47 }
0x15dd   : > { %v3130_v51 = vpop.permute.xlu1 %3129  ;;  %v3381_v53 = vpop.permute.xlu0 %3380  ;;  %v3639_v59 = vld [vmem:[#allocation3] sm:$0xff] }
0x15de   : > { %3136 = vst.msk [vmem:[#allocation3 + $0x10] sm:$0x1] %vm1588_vm13, %v3130_v51  ;;  %5194 = vmatmul.mubr.msk.f32.vlgmr.msra.gmra.mrb[56].mxu0 %vm930_vm2, %v3639_v59 }
0x15df   : > { %3387 = vst.msk [vmem:[#allocation3 + $0x10] sm:$0x1] %vm1841_vm14, %v3381_v53  ;;  %5196 = vmatprep.mubr.msk.f32.mxu0 %vm5888_vm3, %v5889_v18  ;;  %5455 = vmatpush3.bf16.msra.mxu0 %v5454_v32 }
0x15e0   : > { %5456 = vmatprep.subr.bf16.mxu0 %v5887_v3 }
0x15e1   : > { %v3632_v46 = vpop.permute.xlu1 %3631 }
0x15e2   : > { %3638 = vst.msk [vmem:[#allocation3 + $0x10] sm:$0x1] %vm2094_vm15, %v3632_v46  ;;  %v3640_v43 = vld [vmem:[#allocation3 + $0x8] sm:$0xff] }
0x15e3   : > { %5197 = vmatmul.mubr.msk.f32.gmra.mrb[58].mxu0 %vm930_vm2, %v3640_v43 }
0x15e4   : > { %5199 = vmatprep.mubr.msk.f32.mxu0 %vm5888_vm3, %v5889_v18 }
0x15e9   : > { %v3641_v1 = vld [vmem:[#allocation3 + $0x10] sm:$0x1] }
0x15ea   : > { %5200 = vmatmul.mubr.msk.f32.gmra.mrb[60].mxu0 %vm930_vm2, %v3641_v1 }
0x15eb   : > { %5251 = vmatprep.mubr.msk.f32.mxu0 %vm5888_vm3, %v5889_v18 }
0x16b1   : > { %v3722_v2 = vpop.f32.mrb[56].mxu0 }
0x16b2   : > { %v3736_v5 = vadd.f32 %v3722_v2, %v6636_v48  ;;  %v5195_v6 = vpop.f32.mrb[57].mxu0 }
0x16b4   : > { %v7005_v55 = vadd.f32 %v4603_v4, %v3736_v5  ;;  %v4617_v5 = vld [vmem:[%s7307_s15 + $0x98] sm:$0xff] }
0x16b6   : > { %v3727_v7 = vpop.f32.mrb[58].mxu0  ;;  %v3749_v61 = vsel %vm930_vm2, %v7005_v55, 0.0 }
0x16b7   : > { %v3737_v49 = vadd.f32 %v3727_v7, %v6641_v56  ;;  %3750 = vadd.xlane.f32.xlu0 %v3749_v61  ;;  %v5198_v0 = vpop.f32.mrb[59].mxu0  ;;  %v4618_v7 = vld [vmem:[%s7307_s15 + $0xa0] sm:$0xff]  ;;  %v4619_v61 = vld [vmem:[%s7307_s15 + $0xa8] sm:$0xff] }
0x16b8   : > { %v4620_v0 = vld [vmem:[%s7307_s15 + $0xb0] sm:$0xff] }
0x16b9   : > { %v7010_v58 = vadd.f32 %v4603_v4, %v3737_v49  ;;  %v5460_v49 = vpack.c.bf16 %v4619_v61, %v4618_v7 }
0x16bb   : > { %v3752_v8 = vsel %vm930_vm2, %v7010_v58, 0.0 }
0x16bc   : > { %3753 = vadd.xlane.f32.xlu1 %v3752_v8  ;;  %v4621_v8 = vld [vmem:[%s7307_s15 + $0xb8] sm:$0xff] }
0x16bd   : > { %v3732_v9 = vpop.f32.mrb[60].mxu0 }
0x16be   : > { %v3738_v48 = vadd.f32 %v3732_v9, %v6646_v62  ;;  %v5201_v10 = vpop.f32.mrb[61].mxu0  ;;  %v5463_v9 = vpack.c.bf16 %v4621_v8, %v4620_v0 }
0x16bf   : > { %v4623_v10 = vld [vmem:[%s7307_s15 + $0xc8] sm:$0xff] }
0x16c0   : > { %v7015_v11 = vadd.f32 %v4603_v4, %v3738_v48  ;;  %v4616_v4 = vld [vmem:[%s7307_s15 + $0x90] sm:$0xff]  ;;  %v4622_v48 = vld [vmem:[%s7307_s15 + $0xc0] sm:$0xff] }
0x16c1   : > { %v5457_v6 = vpack.c.bf16 %v4617_v5, %v4616_v4  ;;  %v4630_v4 = vld [vmem:[%s7308_s16 + $0x1] ss:$0 sm:$0xff] }
0x16c2   : > { %v3755_v12 = vsel %vm924_vm1, %v7015_v11, 0.0 }
0x16c3   : > { %3756 = vadd.xlane.f32.xlu0 %v3755_v12  ;;  %5458 = vmatpush3.bf16.msra.mxu0 %v5457_v6  ;;  %v5466_v12 = vpack.c.bf16 %v4623_v10, %v4622_v48 }
0x16c4   : > { %5459 = vmatprep.subr.bf16.mxu0 %v5887_v3 }
0x16c7   : > { %5461 = vmatpush3.bf16.msra.mxu0 %v5460_v49 }
0x16c8   : > { %5462 = vmatprep.subr.bf16.mxu0 %v5887_v3 }
0x16cb   : > { %5464 = vmatpush3.bf16.msra.mxu0 %v5463_v9 }
0x16cc   : > { %5465 = vmatprep.subr.bf16.mxu0 %v5887_v3 }
0x16cf   : > { %5467 = vmatpush3.bf16.msra.mxu0 %v5466_v12 }
0x16d0   : > { %5468 = vmatprep.subr.bf16.mxu0 %v5887_v3 }
0x1744   : > { %v3751_v13 = vpop.xlane.xlu0 %3750 }
0x1745   : > { %v3758_v56 = vmul.f32 0.03125, %v3751_v13  ;;  %v4624_v13 = vld [vmem:[%s7307_s15 + $0xd0] sm:$0xff] }
0x1747   : > { %v3761_v14 = vsub.f32 %v7005_v55, %v3758_v56  ;;  %v4625_v56 = vld [vmem:[%s7307_s15 + $0xd8] sm:$0xff] }
0x1749   : > { %v3754_v63 = vpop.xlane.xlu1 %3753  ;;  %v3764_v15 = vmul.f32 %v3761_v14, %v3761_v14 }
0x174a   : > { %v3759_v16 = vmul.f32 0.03125, %v3754_v63  ;;  %v4626_v63 = vld [vmem:[%s7307_s15 + $0xe0] sm:$0xff] }
0x174b   : > { %v3767_v17 = vsel %vm930_vm2, %v3764_v15, 0.0  ;;  %v4627_v15 = vld [vmem:[%s7307_s15 + $0xe8] sm:$0xff] }
0x174c   : > { %v3762_v19 = vsub.f32 %v7010_v58, %v3759_v16  ;;  %3768 = vadd.xlane.f32.xlu0 %v3767_v17  ;;  %v5472_v16 = vpack.c.bf16 %v4627_v15, %v4626_v63  ;;  %v4628_v17 = vld [vmem:[%s7307_s15 + $0xf0] sm:$0xff] }
0x174e   : > { %v3765_v62 = vmul.f32 %v3762_v19, %v3762_v19 }
0x1750   : > { %v3757_v20 = vpop.xlane.xlu0 %3756  ;;  %v3770_v21 = vsel %vm930_vm2, %v3765_v62, 0.0 }
0x1751   : > { %v3760_v22 = vmul.f32 0.03125, %v3757_v20  ;;  %3771 = vadd.xlane.f32.xlu0 %v3770_v21  ;;  %v4610_v20 = vld [vmem:[%s7306_s14 + $0x1] ss:$0 sm:$0xff] }
0x1753   : > { %v3763_v23 = vsub.f32 %v7015_v11, %v3760_v22 }
0x1755   : > { %v3766_v24 = vmul.f32 %v3763_v23, %v3763_v23 }
0x1757   : > { %v3773_v25 = vsel %vm924_vm1, %v3766_v24, 0.0 }
0x1758   : > { %3774 = vadd.xlane.f32.xlu1 %v3773_v25 }
0x17d9   : > { %v3769_v57 = vpop.xlane.xlu0 %3768 }
0x17da   : > { %v3776_v28 = vmul.f32 0.03125, %v3769_v57 }
0x17dc   : > { %v3779_v52 = vadd.f32 1e-06, %v3776_v28 }
0x17de   : > { %5766 = vrsqrt.f32 %v3779_v52  ;;  %v3772_v33 = vpop.xlane.xlu0 %3771 }
0x17df   : > { %v3777_v34 = vmul.f32 0.03125, %v3772_v33 }
0x17e1   : > { %v3780_v35 = vadd.f32 1e-06, %v3777_v34 }
0x17e3   : > { %5768 = vrsqrt.f32 %v3780_v35 }
0x17e5   : > { %v3775_v37 = vpop.xlane.xlu1 %3774 }
0x17e6   : > { %v3778_v38 = vmul.f32 0.03125, %v3775_v37 }
0x17e8   : > { %v5767_v40 = vpop.eup %5766  ;;  %v3781_v36 = vadd.f32 1e-06, %v3778_v38 }
0x17e9   : > { %v3785_v39 = vmul.f32 %v5767_v40, %v3761_v14  ;;  %v5469_v14 = vpack.c.bf16 %v4625_v56, %v4624_v13 }
0x17ea   : > { %5770 = vrsqrt.f32 %v3781_v36 }
0x17eb   : > { %v3792_v44 = vmul.f32 %v4604_v41, %v3785_v39  ;;  %5470 = vmatpush3.bf16.msra.mxu0 %v5469_v14 }
0x17ec   : > { %5471 = vmatprep.subr.bf16.mxu0 %v5887_v3 }
0x17ed   : > { %v5769_v45 = vpop.eup %5768  ;;  %v3799_v47 = vadd.f32 %v4605_v42, %v3792_v44 }
0x17ee   : > { %v3786_v51 = vmul.f32 %v5769_v45, %v3762_v19  ;;  %v4629_v19 = vld [vmem:[%s7307_s15 + $0xf8] sm:$0xff] }
0x17ef   : > { %5211 = vmatmul.mubr.msk.f32.vlgmr.msra.gmra.mrb[74].mxu1 %vm930_vm2, %v3799_v47  ;;  %5473 = vmatpush3.bf16.msra.mxu0 %v5472_v16  ;;  %v5475_v62 = vpack.c.bf16 %v4629_v19, %v4628_v17 }
0x17f0   : > { %5213 = vmatprep.mubr.msk.f32.mxu1 %vm5888_vm3, %v5889_v18  ;;  %v3793_v53 = vmul.f32 %v4604_v41, %v3786_v51  ;;  %5474 = vmatprep.subr.bf16.mxu0 %v5887_v3 }
0x17f2   : > { %v3800_v59 = vadd.f32 %v4605_v42, %v3793_v53 }
0x17f3   : > { %5476 = vmatpush3.bf16.msra.mxu0 %v5475_v62 }
0x17f4   : > { %v5771_v46 = vpop.eup %5770  ;;  %5214 = vmatmul.mubr.msk.f32.gmra.mrb[76].mxu1 %vm930_vm2, %v3800_v59  ;;  %5495 = vmatprep.subr.bf16.mxu0 %v5887_v3 }
0x17f5   : > { %5216 = vmatprep.mubr.msk.f32.mxu1 %vm5888_vm3, %v5889_v18  ;;  %v3787_v43 = vmul.f32 %v5771_v46, %v3763_v23 }
0x17f7   : > { %v3794_v1 = vmul.f32 %v4604_v41, %v3787_v43 }
0x17f9   : > { %v3801_v2 = vadd.f32 %v4605_v42, %v3794_v1 }
0x17fb   : > { %5217 = vmatmul.mubr.msk.f32.gmra.mrb[78].mxu1 %vm930_vm2, %v3801_v2 }
0x17fc   : > { %5268 = vmatprep.mubr.msk.f32.mxu1 %vm5888_vm3, %v5889_v18 }
0x18c2   : > { %v3887_v21 = vpop.f32.mrb[74].mxu1 }
0x18c3   : > { %v3888_v22 = vadd.f32 %v4610_v20, %v3887_v21  ;;  %v5212_v23 = vpop.f32.mrb[75].mxu1 }
0x18c5   : > { %v3901_v24 = vmul.f32 %v3888_v22, %v3888_v22 }
0x18c7   : > { %v3904_v25 = vmul.f32 %v3901_v24, %v3888_v22  ;;  %v3892_v54 = vpop.f32.mrb[76].mxu1 }
0x18c8   : > { %v3893_v60 = vadd.f32 %v4610_v20, %v3892_v54  ;;  %v5215_v26 = vpop.f32.mrb[77].mxu1  ;;  %v4109_v54 = vld [vmem:[%s7311_s19] sm:$0xff] }
0x18c9   : > { %v3907_v27 = vmul.f32 0.044715, %v3904_v25  ;;  %v4111_v26 = vld [vmem:[%s7311_s19 + $0x10] sm:$0xff] }
0x18ca   : > { %v3902_v29 = vmul.f32 %v3893_v60, %v3893_v60 }
0x18cb   : > { %v3910_v50 = vadd.f32 %v3907_v27, %v3888_v22 }
0x18cc   : > { %v3905_v30 = vmul.f32 %v3902_v29, %v3893_v60  ;;  %v4112_v29 = vld [vmem:[%s7311_s19 + $0x18] sm:$0xff] }
0x18cd   : > { %v3913_v31 = vmul.f32 0.7978846, %v3910_v50  ;;  %v5481_v50 = vpack.c.bf16 %v4112_v29, %v4111_v26  ;;  %v4288_v29 = vld [vmem:[%s7315_s23 + $0x8] sm:$0xff] }
0x18ce   : > { %v3908_v32 = vmul.f32 0.044715, %v3905_v30  ;;  %v3897_v57 = vpop.f32.mrb[78].mxu1 }
0x18cf   : > { %5772 = vtanh.f32 %v3913_v31  ;;  %v3898_v28 = vadd.f32 %v4610_v20, %v3897_v57  ;;  %v5218_v52 = vpop.f32.mrb[79].mxu1 }
0x18d0   : > { %v3911_v33 = vadd.f32 %v3908_v32, %v3893_v60 }
0x18d1   : > { %v3903_v34 = vmul.f32 %v3898_v28, %v3898_v28 }
0x18d2   : > { %v3914_v35 = vmul.f32 0.7978846, %v3911_v33 }
0x18d3   : > { %v3906_v37 = vmul.f32 %v3903_v34, %v3898_v28 }
0x18d4   : > { %5774 = vtanh.f32 %v3914_v35 }
0x18d5   : > { %v3909_v38 = vmul.f32 0.044715, %v3906_v37 }
0x18d7   : > { %v3912_v40 = vadd.f32 %v3909_v38, %v3898_v28 }
0x18d9   : > { %v5773_v41 = vpop.eup %5772  ;;  %v3915_v36 = vmul.f32 0.7978846, %v3912_v40 }
0x18da   : > { %v3919_v39 = vadd.f32 1.0, %v5773_v41  ;;  %v4631_v41 = vld [vmem:[%s7309_s17] ss:$0 sm:$0xff] }
0x18db   : > { %5776 = vtanh.f32 %v3915_v36 }
0x18dc   : > { %v3922_v42 = vmul.f32 0.5, %v3919_v39 }
0x18de   : > { %v5775_v44 = vpop.eup %5774  ;;  %v3925_v45 = vmul.f32 %v3922_v42, %v3888_v22 }
0x18df   : > { %v3920_v47 = vadd.f32 1.0, %v5775_v44  ;;  %v4632_v44 = vld [vmem:[%s7310_s18] ss:$0 sm:$0xff] }
0x18e0   : > { %5252 = vmatmul.mubr.f32.vlgmr.msra.gmra.mrb[62].mxu0 %v3925_v45 }
0x18e1   : > { %5254 = vmatprep.mubr.msk.f32.mxu0 %vm5888_vm3, %v5889_v18  ;;  %v3923_v51 = vmul.f32 0.5, %v3920_v47 }
0x18e3   : > { %v3926_v53 = vmul.f32 %v3923_v51, %v3893_v60  ;;  %v4110_v60 = vld [vmem:[%s7311_s19 + $0x8] sm:$0xff] }
0x18e4   : > { %v5478_v27 = vpack.c.bf16 %v4110_v60, %v4109_v54 }
0x18e5   : > { %v5777_v59 = vpop.eup %5776  ;;  %5255 = vmatmul.mubr.f32.gmra.mrb[64].mxu0 %v3926_v53 }
0x18e6   : > { %5257 = vmatprep.mubr.msk.f32.mxu0 %vm5888_vm3, %v5889_v18  ;;  %v3921_v46 = vadd.f32 1.0, %v5777_v59  ;;  %5479 = vmatpush3.bf16.msra.mxu1 %v5478_v27  ;;  %v4287_v27 = vld [vmem:[%s7315_s23] sm:$0xff] }
0x18e7   : > { %5480 = vmatprep.subr.bf16.mxu1 %v5887_v3 }
0x18e8   : > { %v3924_v43 = vmul.f32 0.5, %v3921_v46 }
0x18ea   : > { %v3927_v1 = vmul.f32 %v3924_v43, %v3898_v28  ;;  %5482 = vmatpush3.bf16.msra.mxu1 %v5481_v50  ;;  %v5496_v50 = vpack.c.bf16 %v4288_v29, %v4287_v27 }
0x18eb   : > { %5483 = vmatprep.subr.bf16.mxu1 %v5887_v3 }
0x18ec   : > { %5258 = vmatmul.mubr.f32.gmra.mrb[66].mxu0 %v3927_v1 }
0x18ed   : > { %5298 = vmatprep.mubr.msk.f32.mxu0 %vm5888_vm3, %v5889_v18  ;;  %5497 = vmatpush3.bf16.msra.mxu0 %v5496_v50 }
0x18ee   : > { %5498 = vmatprep.subr.bf16.mxu0 %v5887_v3 }
0x19b3   : > { %v4011_v2 = vpop.f32.mrb[62].mxu0 }
0x19b4   : > { %v4025_v5 = vadd.f32 %v4011_v2, %v7005_v55  ;;  %v5253_v6 = vpop.f32.mrb[63].mxu0 }
0x19b6   : > { %v4033_v7 = vadd.f32 %v4630_v4, %v4025_v5 }
0x19b8   : > { %v4016_v61 = vpop.f32.mrb[64].mxu0  ;;  %v4038_v49 = vsel %vm930_vm2, %v4033_v7, 0.0 }
0x19b9   : > { %v4026_v0 = vadd.f32 %v4016_v61, %v7010_v58  ;;  %4039 = vadd.xlane.f32.xlu0 %v4038_v49  ;;  %v5256_v8 = vpop.f32.mrb[65].mxu0 }
0x19bb   : > { %v4034_v9 = vadd.f32 %v4630_v4, %v4026_v0 }
0x19bd   : > { %v4041_v48 = vsel %vm930_vm2, %v4034_v9, 0.0 }
0x19be   : > { %4042 = vadd.xlane.f32.xlu1 %v4041_v48  ;;  %v4196_v48 = vld [vmem:[%s7313_s21] sm:$0xff] }
0x19bf   : > { %v4021_v10 = vpop.f32.mrb[66].mxu0 }
0x19c0   : > { %v4027_v12 = vadd.f32 %v4021_v10, %v7015_v11  ;;  %v5259_v13 = vpop.f32.mrb[67].mxu0  ;;  %v4197_v10 = vld [vmem:[%s7313_s21 + $0x8] sm:$0xff] }
0x19c1   : > { %v4198_v13 = vld [vmem:[%s7313_s21 + $0x10] sm:$0xff] }
0x19c2   : > { %v4035_v56 = vadd.f32 %v4630_v4, %v4027_v12  ;;  %v5484_v12 = vpack.c.bf16 %v4197_v10, %v4196_v48 }
0x19c4   : > { %v4044_v55 = vsel %vm924_vm1, %v4035_v56, 0.0 }
0x19c5   : > { %4045 = vadd.xlane.f32.xlu0 %v4044_v55  ;;  %v4200_v55 = vld [vmem:[%s7313_s21 + $0x20] sm:$0xff] }
0x1a46   : > { %v4040_v14 = vpop.xlane.xlu0 %4039 }
0x1a47   : > { %v4047_v63 = vmul.f32 0.03125, %v4040_v14  ;;  %v4201_v14 = vld [vmem:[%s7313_s21 + $0x28] sm:$0xff] }
0x1a49   : > { %v4050_v15 = vsub.f32 %v4033_v7, %v4047_v63  ;;  %v5490_v63 = vpack.c.bf16 %v4201_v14, %v4200_v55 }
0x1a4b   : > { %v4043_v16 = vpop.xlane.xlu1 %4042  ;;  %v4053_v17 = vmul.f32 %v4050_v15, %v4050_v15 }
0x1a4c   : > { %v4048_v58 = vmul.f32 0.03125, %v4043_v16  ;;  %v4203_v16 = vld [vmem:[%s7313_s21 + $0x38] sm:$0xff] }
0x1a4d   : > { %v4056_v19 = vsel %vm930_vm2, %v4053_v17, 0.0 }
0x1a4e   : > { %v4051_v62 = vsub.f32 %v4034_v9, %v4048_v58  ;;  %4057 = vadd.xlane.f32.xlu1 %v4056_v19  ;;  %v4113_v58 = vld [vmem:[%s7312_s20] sm:$0x1] }
0x1a50   : > { %v4054_v20 = vmul.f32 %v4051_v62, %v4051_v62 }
0x1a52   : > { %v4046_v21 = vpop.xlane.xlu0 %4045  ;;  %v4059_v22 = vsel %vm930_vm2, %v4054_v20, 0.0 }
0x1a53   : > { %v4049_v11 = vmul.f32 0.03125, %v4046_v21  ;;  %4060 = vadd.xlane.f32.xlu0 %v4059_v22 }
0x1a55   : > { %v4052_v23 = vsub.f32 %v4035_v56, %v4049_v11 }
0x1a57   : > { %v4055_v24 = vmul.f32 %v4052_v23, %v4052_v23 }
0x1a59   : > { %v4062_v25 = vsel %vm924_vm1, %v4055_v24, 0.0 }
0x1a5a   : > { %4063 = vadd.xlane.f32.xlu1 %v4062_v25 }
0x1adb   : > { %v4058_v30 = vpop.xlane.xlu1 %4057 }
0x1adc   : > { %v4065_v31 = vmul.f32 0.03125, %v4058_v30  ;;  %v4289_v30 = vld [vmem:[%s7315_s23 + $0x10] sm:$0xff] }
0x1ade   : > { %v4068_v32 = vadd.f32 1e-06, %v4065_v31  ;;  %v4290_v31 = vld [vmem:[%s7315_s23 + $0x18] sm:$0xff] }
0x1ae0   : > { %v4061_v57 = vpop.xlane.xlu0 %4060  ;;  %5778 = vrsqrt.f32 %v4068_v32  ;;  %v5499_v32 = vpack.c.bf16 %v4290_v31, %v4289_v30 }
0x1ae1   : > { %v4066_v28 = vmul.f32 0.03125, %v4061_v57  ;;  %v4204_v57 = vld [vmem:[%s7314_s22] sm:$0x1] }
0x1ae2   : > { %5500 = vmatpush3.bf16.msra.mxu0 %v5499_v32 }
0x1ae3   : > { %v4069_v52 = vadd.f32 1e-06, %v4066_v28 }
0x1ae5   : > { %5780 = vrsqrt.f32 %v4069_v52 }
0x1ae7   : > { %v4064_v33 = vpop.xlane.xlu1 %4063 }
0x1ae8   : > { %v4067_v34 = vmul.f32 0.03125, %v4064_v33 }
0x1aea   : > { %v4070_v35 = vadd.f32 1e-06, %v4067_v34  ;;  %v5779_v37 = vpop.eup %5778 }
0x1aeb   : > { %v4074_v40 = vmul.f32 %v5779_v37, %v4050_v15  ;;  %v4202_v15 = vld [vmem:[%s7313_s21 + $0x30] sm:$0xff] }
0x1aec   : > { %5782 = vrsqrt.f32 %v4070_v35  ;;  %v5493_v17 = vpack.c.bf16 %v4203_v16, %v4202_v15 }
0x1aed   : > { %v4083_v42 = vmul.f32 %v4631_v41, %v4074_v40 }
0x1aef   : > { %v5781_v38 = vpop.eup %5780  ;;  %v4092_v51 = vadd.f32 %v4632_v44, %v4083_v42 }
0x1af0   : > { %v4075_v36 = vmul.f32 %v5781_v38, %v4051_v62 }
0x1af1   : > { %v4095_v43 = vsel %vm930_vm2, %v4092_v51, 0.0 }
0x1af2   : > { %v4084_v39 = vmul.f32 %v4631_v41, %v4075_v36 }
0x1af4   : > { %v4093_v45 = vadd.f32 %v4632_v44, %v4084_v39 }
0x1af6   : > { %v5783_v47 = vpop.eup %5782  ;;  %v4096_v59 = vsel %vm930_vm2, %v4093_v45, 0.0 }
0x1af7   : > { %v4076_v53 = vmul.f32 %v5783_v47, %v4052_v23  ;;  %v4097_v2 = vadd.f32 %v4096_v59, %v4095_v43 }
0x1af9   : > { %v4085_v46 = vmul.f32 %v4631_v41, %v4076_v53 }
0x1afb   : > { %v4094_v1 = vadd.f32 %v4632_v44, %v4085_v46 }
0x1afd   : > { %v4098_v4 = vsel %vm924_vm1, %v4094_v1, 0.0 }
0x1afe   : > { %v4099_v5 = vadd.f32 %v4098_v4, %v4097_v2 }
0x1b00   : > { %v4100_v6 = vrot.slane %v4099_v5, 4 }
0x1b02   : > { %v4101_v7 = vadd.f32 %v4100_v6, %v4099_v5 }
0x1b04   : > { %v4102_v61 = vrot.slane %v4101_v7, 2 }
0x1b06   : > { %v4103_v49 = vadd.f32 %v4102_v61, %v4101_v7 }
0x1b08   : > { %v4104_v0 = vrot.slane %v4103_v49, 1 }
0x1b0a   : > { %v4105_v8 = vadd.f32 %v4104_v0, %v4103_v49 }
0x1b0c   : > { %v4107_v9 = vmul.f32 0.05882353, %v4105_v8 }
0x1b0e   : > { %5269 = vmatmul.mubr.msk.f32.vlgmr.msra.gmra.mrb[80].mxu1 %vm930_vm2, %v4107_v9  ;;  %4108 = vst.msk [vmem:[%s796_s0] sm:$0x1] %vm924_vm1, %v4107_v9 }
0x1b0f   : > { %5287 = vmatprep.mubr.msk.f32.mxu1 %vm5888_vm3, %v5889_v18  ;;  %5485 = vmatpush3.bf16.msra.mxu1 %v5484_v12  ;;  %v4199_v18 = vld [vmem:[%s7313_s21 + $0x18] sm:$0xff] }
0x1b10   : > { %5486 = vmatprep.subr.bf16.mxu1 %v5887_v3  ;;  %v5487_v56 = vpack.c.bf16 %v4199_v18, %v4198_v13 }
0x1b13   : > { %5488 = vmatpush3.bf16.msra.mxu1 %v5487_v56 }
0x1b14   : > { %5489 = vmatprep.subr.bf16.mxu1 %v5887_v3 }
0x1b17   : > { %5491 = vmatpush3.bf16.msra.mxu1 %v5490_v63 }
0x1b18   : > { %5492 = vmatprep.subr.bf16.mxu1 %v5887_v3 }
0x1b1b   : > { %5494 = vmatpush3.bf16.msra.mxu1 %v5493_v17 }
0x1be1   : > { %v4183_v19 = vpop.f32.mrb[80].mxu1 }
0x1be2   : > { %v4184_v62 = vadd.f32 %v4183_v19, %v4113_v58  ;;  %v5270_v20 = vpop.f32.mrb[81].mxu1 }
0x1be4   : > { %v4187_v21 = vmul.f32 %v4184_v62, %v4184_v62 }
0x1be6   : > { %v4188_v22 = vmul.f32 %v4187_v21, %v4184_v62 }
0x1be8   : > { %v4189_v11 = vmul.f32 0.044715, %v4188_v22 }
0x1bea   : > { %v4190_v23 = vadd.f32 %v4189_v11, %v4184_v62 }
0x1bec   : > { %v4191_v24 = vmul.f32 0.7978846, %v4190_v23 }
0x1bee   : > { %5784 = vtanh.f32 %v4191_v24 }
0x1bf8   : > { %v5785_v25 = vpop.eup %5784 }
0x1bf9   : > { %v4193_v54 = vadd.f32 1.0, %v5785_v25 }
0x1bfb   : > { %v4194_v60 = vmul.f32 0.5, %v4193_v54 }
0x1bfd   : > { %v4195_v26 = vmul.f32 %v4194_v60, %v4184_v62 }
0x1bff   : > { %5288 = vmatmul.mubr.msk.f32.vlgmr.msra.gmra.mrb[82].mxu1 %vm839_vm0, %v4195_v26 }
0x1cd2   : > { %v4274_v28 = vpop.f32.mrb[82].mxu1 }
0x1cd3   : > { %v4275_v52 = vadd.f32 %v4274_v28, %v4204_v57  ;;  %v5289_v3 = vpop.f32.mrb[83].mxu1 }
0x1cd5   : > { %v4278_v33 = vmul.f32 %v4275_v52, %v4275_v52 }
0x1cd7   : > { %v4279_v34 = vmul.f32 %v4278_v33, %v4275_v52 }
0x1cd9   : > { %v4280_v35 = vmul.f32 0.044715, %v4279_v34 }
0x1cdb   : > { %v4281_v37 = vadd.f32 %v4280_v35, %v4275_v52 }
0x1cdd   : > { %v4282_v38 = vmul.f32 0.7978846, %v4281_v37 }
0x1cdf   : > { %5786 = vtanh.f32 %v4282_v38 }
0x1ce9   : > { %v5787_v40 = vpop.eup %5786 }
0x1cea   : > { %v4284_v41 = vadd.f32 1.0, %v5787_v40 }
0x1cec   : > { %v4285_v36 = vmul.f32 0.5, %v4284_v41 }
0x1cee   : > { %v4286_v39 = vmul.f32 %v4285_v36, %v4275_v52 }
0x1cf0   : > { %5299 = vmatmul.mubr.msk.f32.vlgmr.msra.gmra.mrb[68].mxu0 %vm930_vm2, %v4286_v39 }
0x1cf1   : > { %5804 = shalt.err (!%p5801_p3)
}
0x1cf2   : > { %s5805_s0 = scalar_lea.hbm %s7218_s24, 16  ;;  %s5809_s5 = scalar_lea.hbm %s7423_s1, 32 }
0x1cf3   : > { %p5806_p4 = scmp.ne.s32.totalorder %s7218_s24, %s5805_s0  ;;  %p5810_p9 = scmp.lt.u32.totalorder %s7218_s24, %s7423_s1 }
0x1cf4   : > { %p5811_p10 = scmp.lt.u32.totalorder %s5809_s5, %s5805_s0  ;;  %p5813_p12 = scmp.lt.u32.totalorder %s5805_s0, %s7218_s24 }
0x1cf5   : > { %p5807_p7 = pnand %p5806_p4, %p6079_p5 }
0x1cf6   : > { %p5812_p11 = por %p5811_p10, %p5810_p9 }
0x1cf7   : > { %p5808_p8 = pneg %p5807_p7 }
0x1cf8   : > { %p5814_p13 = por %p5813_p12, %p5812_p11 }
0x1cfa   : > { %p5815_p0 = pnand %p5814_p13, %p5808_p8 }
0x1cfc   : > { %5818 = shalt.err (!%p5815_p0)
}
0x1cfd   : > { %5506 = dma.vmem_to_hbm [thread:$0]  (%p6079_p5), %s4397_s26, 16, %s7218_s24, %s4371_s25  }
0x1cfe   : > { %s7424_s30 = sld [smem:[#allocation27_spill]]  ;;  %s790_s27 = scalar_lea.vmem [#allocation4], %s7155_s7 }
0x1cff   : > { %s4383_s4 = sshll.u32 %s790_s27, 4  ;;  %s7425_s0 = sshll.u32 %s6062_s8, 4  ;;  %s7251_s4 = int_to_ptr.vmem [resolvable:$true] %s4383_s4 }
0x1d00   : > { %s7426_s1 = sld [smem:[#allocation28_spill]]  ;;  %s4367_s24 = scalar_lea.sflag [#allocation5], %s7155_s7 }
0x1d01   : > { %s5819_s26 = scalar_lea.vmem %s7251_s4, 16  ;;  %s5905_s25 = smov [#allocation4]  }
0x1d02   : > { %p5820_p1 = scmp.ne.s32.totalorder %s7251_s4, %s5819_s26  ;;  %s5823_s9 = sshll.u32 %s5905_s25, 4  ;;  %s5824_s9 = int_to_ptr.vmem [resolvable:$false] %s5823_s9 }
0x1d03   : > { %s5825_s8 = scalar_lea.vmem %s5824_s9, 32  ;;  %p5826_p4 = scmp.lt.s32.totalorder %s7251_s4, %s5824_s9 }
0x1d04   : > { %v4291_v42 = vld [vmem:[%s7424_s30] sm:$0x1]  ;;  %p5821_p2 = pnand %p5820_p1, %p6079_p5  ;;  %p5827_p7 = scmp.lt.s32.totalorder %s5825_s8, %s5819_s26 }
0x1d06   : > { %s7249_s10 = scalar_lea.hbm %s7426_s1, %s7425_s0  ;;  %p5822_p3 = pneg %p5821_p2 }
0x1d07   : > { %p5828_p8 = por %p5827_p7, %p5826_p4 }
0x1d09   : > { %p5829_p9 = pnand %p5828_p8, %p5822_p3 }
0x1dc3   : > { %v4361_v44 = vpop.f32.mrb[68].mxu0 }
0x1dc4   : > { %v4362_v45 = vadd.f32 %v4361_v44, %v4291_v42  ;;  %v5300_v47 = vpop.f32.mrb[69].mxu0 }
0x1dc6   : > { %4365 = vst [vmem:[%s790_s27] sm:$0x1] %v4362_v45 }
0x1dc7   : > { %5832 = shalt.err (!%p5829_p9)
}
0x1dc8   : > { %s5833_s7 = scalar_lea.hbm %s7249_s10, 16  ;;  %s5837_s27 = scalar_lea.hbm %s7426_s1, 32 }
0x1dc9   : > { %p5834_p10 = scmp.ne.s32.totalorder %s7249_s10, %s5833_s7  ;;  %p5838_p13 = scmp.lt.u32.totalorder %s7249_s10, %s7426_s1 }
0x1dca   : > { %p5839_p0 = scmp.lt.u32.totalorder %s5837_s27, %s5833_s7  ;;  %p5841_p2 = scmp.lt.u32.totalorder %s5833_s7, %s7249_s10 }
0x1dcb   : > { %p5835_p11 = pnand %p5834_p10, %p6079_p5 }
0x1dcc   : > { %p5840_p1 = por %p5839_p0, %p5838_p13 }
0x1dcd   : > { %p5836_p12 = pneg %p5835_p11 }
0x1dce   : > { %p5842_p3 = por %p5841_p2, %p5840_p1 }
0x1dd0   : > { %p5843_p4 = pnand %p5842_p3, %p5836_p12 }
0x1dd2   : > { %5846 = shalt.err (!%p5843_p4)
}
0x1dd3   : > { %5505 = dma.vmem_to_hbm [thread:$0]  (%p6079_p5), %s7251_s4, 16, %s7249_s10, %s4367_s24  }
0x1dd4 PF: > { %s7427_s6 = sld [smem:[#allocation12_spill]]  ;;  %s7428_s26 = sld [smem:[#allocation10_spill]] }
0x1dda   : > { %p5516_p7 = scmp.ge.s32.totalorder %s7427_s6, 2  ;;  %s4408_s9 = sand.u32 1, %s7428_s26  }
0x1ddb   : > { %s4409_s8 = scalar_lea.sflag [#allocation5], %s4408_s9 }
0x1ddc   : > { %p5510_p8 = pnand %p5516_p7, %p6083_p6 }
0x1dde   : > { %5864 = dma.done.wait (!%p5510_p8), %s4409_s8, 16  }
0x1ddf   : > { %5866 = vsyncadd (!%p5510_p8), %s4409_s8, 4294967280  ;;  %s4417_s7 = scalar_lea.sflag [#allocation7], %s4408_s9 }
0x1de0   : > { %5868 = dma.done.wait (!%p5510_p8), %s4417_s7, 16  }
0x1de1   : > { %5870 = vsyncadd (!%p5510_p8), %s4417_s7, 4294967280  ;;  %s7430_s28 = sld [smem:[#allocation13_spill]]  ;;  %s7431_s2 = sld [smem:[#allocation11_spill]] }
0x1de2   : > { %s7432_s7 = sld [smem:[#allocation14_spill]]  ;;  %s7433_s27 = smov %s5877_s3 }
0x1de7   : > { %p40_p5 = scmp.ge.s32.totalorder %s7430_s28, 4   ;;  %s7434_s3 = smov %s7431_s2 }
0x1de9   :  { %42 = sbr.rel (!%p40_p5) target bundleno = 20 (0x14), region = 176 }
0x1df0   :  { %4421 = vsyncpa [#allocation5], 1 }
0x1df1   :  { %4423 = vsyncpa [#allocation5 + $0x1], 1 }
0x1df2   :  { %4424 = vsyncpa [#allocation7], 1 }
0x1df3   :  { %4426 = vsyncpa [#allocation7 + $0x1], 1 }

</bundles_post_ra>
